<compile_context>
chip_gen: v7x
topology: tpu7x:2x2x1
jax: 0.10.0
libtpu: 0.0.40
codegen_flags: <defaults>
</compile_context>

<pallas_src>
import functools

import jax
import jax.numpy as jnp
from jax.experimental import pallas as pl
from jax.experimental.pallas import tpu as pltpu

SELU_ALPHA = 1.6732632423543772848170429916717
SELU_LAMBDA = 1.0507009873554804934193349852946


def _selu(x):
    return SELU_LAMBDA * jnp.where(
        x > 0, x, SELU_ALPHA * (jnp.exp(jnp.minimum(x, 0.0)) - 1.0))


def _residual_block_kernel(
    x_ref, wpack_ref, mask_ref, sel_ref, o_ref,
    *, B, C_in, C_out, Wp, LY, LR, LM, downsample,
):
    """One grid step = B images.

    Slot coordinates: per image, lane q of x_ref holds x_pad.flatten()[q-1]
    (q=0 and q>LY are zero lanes).  conv1's output for spatial (h,w) is
    produced at lane f = h*Wp + (w+1), which is exactly where conv2 expects
    its (width-padded) input, so no re-alignment pass is needed.
    """
    f32 = jnp.float32
    hi = jax.lax.Precision.HIGHEST

    K1 = 6 * C_in
    Kf = 6 * C_out + (3 * C_in if downsample else 0)

    wp = wpack_ref[...]                       # (C_out, K1 + Kf + 2)
    w1f = wp[:, 0:K1]                         # conv1 weights, BN scale folded
    wf2 = wp[:, K1:K1 + Kf]                   # fused conv2 [+ downsample] weights
    bn_t = wp[:, K1 + Kf:K1 + Kf + 1]         # BN shift + scale*conv1_bias
    bias2 = wp[:, K1 + Kf + 1:K1 + Kf + 2]    # conv2 bias [+ downsample bias]

    mask = mask_ref[...]                      # (1, LY): zero grid cols {0, Wp-1}
    sel = sel_ref[...]                        # (LM, HWp): 0/1 pool selection

    offs1 = [dh * Wp + dw for dh in range(2) for dw in range(3)]   # conv1/conv2 taps
    offs_ds = [Wp + 1 + dw for dw in range(3)]                     # downsample taps
    off_id = Wp + 2                                                # identity tap

    for b in range(B):
        xi = x_ref[0, b, :, :]                # (C_in, Wslot) lane-extended slot

        # ---- conv1 (+ folded BN scale): one dot, K = 6*C_in ----------------
        p1 = jnp.concatenate([xi[:, o:o + LY] for o in offs1], axis=0)
        acc1 = jnp.dot(w1f, p1, preferred_element_type=f32, precision=hi)

        # ---- BN shift (+ conv1 bias) + SELU; zero conv2's width-pad columns
        y = _selu(acc1 + bn_t) * mask         # (C_out, LY)

        # ---- fused conv2 + downsample: one dot, K = 6*C_out (+ 3*C_in) -----
        taps = [y[:, o:o + LR] for o in offs1]
        if downsample:
            taps += [xi[:, o:o + LR] for o in offs_ds]
        p2 = jnp.concatenate(taps, axis=0)
        r = jnp.dot(wf2, p2, preferred_element_type=f32, precision=hi)
        if not downsample:
            r = r + xi[:, off_id:off_id + LR]   # identity residual (C_in == C_out)

        # ---- MaxPool2d((1,3)) floor mode: shifted maxes + exact 0/1 dot ----
        m = jnp.maximum(jnp.maximum(r[:, 0:LM], r[:, 1:1 + LM]), r[:, 2:2 + LM])
        pooled = jnp.dot(m, sel, preferred_element_type=f32, precision=hi) + bias2

        o_ref[0, b, :, :] = pooled.astype(o_ref.dtype)   # (C_out, H*W_pool), NCHW order


def residual_block_forward(x_nchw, params, *, downsample, images_per_step=8):
    N, C_in, H, W = x_nchw.shape
    C_out = params["w1"].shape[-1]
    if not downsample:
        assert C_in == C_out, "identity path requires C_in == C_out"
    W_pool = W // 3
    HWp = H * W_pool
    Hp, Wp = H + 2, W + 2
    LY = Hp * Wp              # conv1-output grid width (flattened on lanes)
    LR = LY - (Wp + 2)        # conv2/residual width
    LM = LR - 2               # pool-candidate width
    Wslot = LY + Wp + 2       # per-image lane-extended input width

    # Images per grid step (must divide N) — amortizes grid/DMA overhead.
    B = 1
    for d in range(1, min(N, images_per_step) + 1):
        if N % d == 0:
            B = d
    G = N // B

    f32 = jnp.float32

    # ---- wrapper-side constant folding & weight re-layout (tiny, XLA-side) --
    # Weights are HWIO; matrix rows = output channel, cols = (dh,dw)-major,
    # input-channel minor — matching the kernel's tap concatenation order.
    w1m = jnp.transpose(params["w1"], (3, 0, 1, 2)).reshape(C_out, 6 * C_in)
    w1f = params["bn2_scale"][:, None] * w1m           # fold BN scale into conv1
    w2m = jnp.transpose(params["w2"], (3, 0, 1, 2)).reshape(C_out, 6 * C_out)
    if downsample:
        wdsm = jnp.transpose(params["wds"], (3, 0, 1, 2)).reshape(C_out, 3 * C_in)
        wf2 = jnp.concatenate([w2m, wdsm], axis=1)
        bias2 = params["b2"] + params["bds"]
    else:
        wf2 = w2m
        bias2 = params["b2"]
    bn_t = params["bn2_shift"] + params["bn2_scale"] * params["b1"]
    wpack = jnp.concatenate(
        [w1f, wf2, bn_t[:, None], bias2[:, None]], axis=1).astype(f32)

    # Lane mask zeroing the grid columns that act as conv2's width padding.
    col = jnp.arange(LY, dtype=jnp.int32) % Wp
    mask = ((col >= 1) & (col <= W)).astype(f32)[None, :]          # (1, LY)

    # 0/1 selection matrix: pooled (h, p) <- residual lane h*Wp + 3p.
    rows = (Wp * jnp.arange(H)[:, None]
            + 3 * jnp.arange(W_pool)[None, :]).reshape(-1)
    sel = jnp.zeros((LM, HWp), f32).at[rows, jnp.arange(HWp)].set(1.0)

    # NCHW input -> per-image zero-padded, flattened, lane-extended slots.
    # (No NHWC transpose: channels stay on sublanes, spatial goes to lanes.)
    x_pad = jnp.pad(x_nchw.astype(f32), ((0, 0), (0, 0), (1, 1), (1, 1)))
    x_slot = jnp.pad(x_pad.reshape(N, C_in, LY),
                     ((0, 0), (0, 0), (1, Wslot - LY - 1)))
    x_slot = x_slot.reshape(G, B, C_in, Wslot)

    kernel = functools.partial(
        _residual_block_kernel, B=B, C_in=C_in, C_out=C_out, Wp=Wp,
        LY=LY, LR=LR, LM=LM, downsample=downsample)

    out = pl.pallas_call(
        kernel,
        out_shape=jax.ShapeDtypeStruct((G, B, C_out, HWp), f32),
        grid_spec=pltpu.PrefetchScalarGridSpec(
            num_scalar_prefetch=0,
            grid=(G,),
            in_specs=[
                pl.BlockSpec((1, B, C_in, Wslot), lambda g: (g, 0, 0, 0)),
                pl.BlockSpec(wpack.shape, lambda g: (0, 0)),
                pl.BlockSpec(mask.shape, lambda g: (0, 0)),
                pl.BlockSpec(sel.shape, lambda g: (0, 0)),
            ],
            out_specs=pl.BlockSpec((1, B, C_out, HWp), lambda g: (g, 0, 0, 0)),
        ),
        compiler_params=pltpu.CompilerParams(
            dimension_semantics=("parallel",)),
    )(x_slot, wpack, mask, sel)

    # Kernel output is already in NCHW element order -> pure reshape.
    return out.reshape(N, C_out, H, W_pool)


def _ref_forward(x_nchw, params, *, downsample):
    """Pure-XLA reference (same folded-BN inference semantics)."""
    dn = ("NHWC", "HWIO", "NHWC")
    hi = jax.lax.Precision.HIGHEST
    x = jnp.transpose(x_nchw, (0, 2, 3, 1)).astype(jnp.float32)
    y = jax.lax.conv_general_dilated(
        x, params["w1"], (1, 1), ((1, 1), (1, 1)),
        dimension_numbers=dn, precision=hi) + params["b1"]
    y = y * params["bn2_scale"] + params["bn2_shift"]
    y = jax.nn.selu(y)
    y = jax.lax.conv_general_dilated(
        y, params["w2"], (1, 1), ((0, 0), (1, 1)),
        dimension_numbers=dn, precision=hi) + params["b2"]
    if downsample:
        ident = jax.lax.conv_general_dilated(
            x, params["wds"], (1, 1), ((0, 0), (1, 1)),
            dimension_numbers=dn, precision=hi) + params["bds"]
    else:
        ident = x
    out = y + ident
    out = jax.lax.reduce_window(out, -jnp.inf, jax.lax.max,
                                (1, 1, 3, 1), (1, 1, 3, 1), "VALID")
    return jnp.transpose(out, (0, 3, 1, 2))


def init_params(key, C_in, C_out):
    """Deterministic synthetic parameters (weights in HWIO layout).
    Real PyTorch OIHW weights would need a (2,3,1,0) transpose here."""
    ks = jax.random.split(key, 8)
    w1 = 0.1 * jax.random.normal(ks[0], (2, 3, C_in, C_out), jnp.float32)
    b1 = 0.05 * jax.random.normal(ks[1], (C_out,), jnp.float32)
    w2 = 0.1 * jax.random.normal(ks[2], (2, 3, C_out, C_out), jnp.float32)
    b2 = 0.05 * jax.random.normal(ks[3], (C_out,), jnp.float32)
    wds = 0.1 * jax.random.normal(ks[4], (1, 3, C_in, C_out), jnp.float32)
    bds = 0.05 * jax.random.normal(ks[5], (C_out,), jnp.float32)

    # BatchNorm2d(C_out) in inference mode, folded to scale/shift.
    gamma = 1.0 + 0.1 * jax.random.normal(ks[6], (C_out,), jnp.float32)
    beta = 0.05 * jax.random.normal(ks[7], (C_out,), jnp.float32)
    running_mean = jnp.zeros((C_out,), jnp.float32)
    running_var = jnp.ones((C_out,), jnp.float32)
    eps = 1e-5
    scale = gamma / jnp.sqrt(running_var + eps)
    shift = beta - running_mean * scale

    return {
        "w1": w1, "b1": b1,
        "w2": w2, "b2": b2,
        "wds": wds, "bds": bds,
        "bn2_scale": scale, "bn2_shift": shift,
    }


if __name__ == "__main__":
    key = jax.random.PRNGKey(0)
    kx, kp = jax.random.split(key)

    # nb_filts = [4, 8] -> downsample path; input NCHW like PyTorch.
    N, C_in, C_out, H, W = 2, 4, 8, 16, 16
    x = jax.random.normal(kx, (N, C_in, H, W), jnp.float32)
    params = init_params(kp, C_in, C_out)
    downsample = (C_in != C_out)

    out = residual_block_forward(x, params, downsample=downsample)
    out = jax.block_until_ready(out)
    assert out.shape == (N, C_out, H, W // 3), out.shape
    assert bool(jnp.all(jnp.isfinite(out)))

    # Numerical check against the pure-XLA reference.
    ref = _ref_forward(x, params, downsample=downsample)
    err = float(jnp.max(jnp.abs(out - ref)))
    assert err < 2e-3, f"max abs err vs reference: {err}"

    print("KERNEL_OK")
</pallas_src>

<mosaic_0001>
module attributes {stable_mosaic.version = 11 : i64} {
  func.func @_residual_block_kernel(%arg0: i32, %arg1: memref<1x2x4x344xf32, #tpu.memory_space<vmem>>, %arg2: memref<8x86xf32, #tpu.memory_space<vmem>>, %arg3: memref<1x324xf32, #tpu.memory_space<vmem>>, %arg4: memref<302x80xf32, #tpu.memory_space<vmem>>, %arg5: memref<1x2x8x80xf32, #tpu.memory_space<vmem>>) attributes {dimension_semantics = [#tpu.dimension_semantics<parallel>], iteration_bounds = array<i64: 1>, scalar_prefetch = 0 : i64, scratch_operands = 0 : i64, tpu.core_type = #tpu.core_type<tc>, window_params = [{transform_indices = @transform_0, window_bounds = array<i64: 1, 2, 4, 344>}, {pipeline_mode = #tpu.pipeline_mode<synchronous>, transform_indices = @transform_1, window_bounds = array<i64: 8, 86>}, {pipeline_mode = #tpu.pipeline_mode<synchronous>, transform_indices = @transform_2, window_bounds = array<i64: 1, 324>}, {pipeline_mode = #tpu.pipeline_mode<synchronous>, transform_indices = @transform_3, window_bounds = array<i64: 302, 80>}, {transform_indices = @transform_4, window_bounds = array<i64: 1, 2, 8, 80>}]} {
    %c0 = arith.constant 0 : index
    %c0_0 = arith.constant 0 : index
    %0 = vector.load %arg2[%c0, %c0_0] : memref<8x86xf32, #tpu.memory_space<vmem>>, vector<8x86xf32>
    %1 = vector.extract_strided_slice %0 {offsets = [0, 0], sizes = [8, 24], strides = [1, 1]} : vector<8x86xf32> to vector<8x24xf32>
    %2 = vector.extract_strided_slice %0 {offsets = [0, 24], sizes = [8, 60], strides = [1, 1]} : vector<8x86xf32> to vector<8x60xf32>
    %3 = vector.extract_strided_slice %0 {offsets = [0, 84], sizes = [8, 1], strides = [1, 1]} : vector<8x86xf32> to vector<8x1xf32>
    %4 = vector.extract_strided_slice %0 {offsets = [0, 85], sizes = [8, 1], strides = [1, 1]} : vector<8x86xf32> to vector<8x1xf32>
    %c0_1 = arith.constant 0 : index
    %c0_2 = arith.constant 0 : index
    %5 = vector.load %arg3[%c0_1, %c0_2] : memref<1x324xf32, #tpu.memory_space<vmem>>, vector<1x324xf32>
    %c0_3 = arith.constant 0 : index
    %c0_4 = arith.constant 0 : index
    %6 = vector.load %arg4[%c0_3, %c0_4] : memref<302x80xf32, #tpu.memory_space<vmem>>, vector<302x80xf32>
    %c0_5 = arith.constant 0 : index
    %c0_6 = arith.constant 0 : index
    %c0_7 = arith.constant 0 : index
    %c0_8 = arith.constant 0 : index
    %7 = vector.load %arg1[%c0_5, %c0_6, %c0_7, %c0_8] : memref<1x2x4x344xf32, #tpu.memory_space<vmem>>, vector<1x1x4x344xf32>
    %8 = vector.shape_cast %7 : vector<1x1x4x344xf32> to vector<4x344xf32>
    %9 = vector.extract_strided_slice %8 {offsets = [0, 0], sizes = [4, 324], strides = [1, 1]} : vector<4x344xf32> to vector<4x324xf32>
    %10 = vector.extract_strided_slice %8 {offsets = [0, 1], sizes = [4, 324], strides = [1, 1]} : vector<4x344xf32> to vector<4x324xf32>
    %11 = vector.extract_strided_slice %8 {offsets = [0, 2], sizes = [4, 324], strides = [1, 1]} : vector<4x344xf32> to vector<4x324xf32>
    %12 = vector.extract_strided_slice %8 {offsets = [0, 18], sizes = [4, 324], strides = [1, 1]} : vector<4x344xf32> to vector<4x324xf32>
    %13 = vector.extract_strided_slice %8 {offsets = [0, 19], sizes = [4, 324], strides = [1, 1]} : vector<4x344xf32> to vector<4x324xf32>
    %14 = vector.extract_strided_slice %8 {offsets = [0, 20], sizes = [4, 324], strides = [1, 1]} : vector<4x344xf32> to vector<4x324xf32>
    %15 = tpu.concatenate %9, %10, %11, %12, %13, %14 in 0 : vector<4x324xf32>, vector<4x324xf32>, vector<4x324xf32>, vector<4x324xf32>, vector<4x324xf32>, vector<4x324xf32> -> vector<24x324xf32>
    %cst = arith.constant dense<0.000000e+00> : vector<8x324xf32>
    %16 = tpu.matmul %1, %15, %cst {dimension_numbers = #tpu.dot_dimension_numbers<[1], [0], [0], [1], [0, 0, 1, 1], [], []>, precision = #tpu.contract_precision<fp32>} : vector<8x24xf32>, vector<24x324xf32>, vector<8x324xf32> -> vector<8x324xf32>
    %17 = vector.broadcast %3 : vector<8x1xf32> to vector<8x324xf32>
    %18 = arith.addf %16, %17 : vector<8x324xf32>
    %cst_9 = arith.constant 0.000000e+00 : f32
    %19 = vector.broadcast %cst_9 : f32 to vector<8x324xf32>
    %20 = arith.cmpf ogt, %18, %19 : vector<8x324xf32>
    %cst_10 = arith.constant 0.000000e+00 : f32
    %21 = vector.broadcast %cst_10 : f32 to vector<8x324xf32>
    %22 = arith.minimumf %18, %21 : vector<8x324xf32>
    %23 = math.exp %22 : vector<8x324xf32>
    %cst_11 = arith.constant 1.000000e+00 : f32
    %24 = vector.broadcast %cst_11 : f32 to vector<8x324xf32>
    %25 = arith.subf %23, %24 : vector<8x324xf32>
    %cst_12 = arith.constant 1.67326319 : f32
    %26 = vector.broadcast %cst_12 : f32 to vector<8x324xf32>
    %27 = arith.mulf %26, %25 : vector<8x324xf32>
    %28 = arith.select %20, %18, %27 : vector<8x324xi1>, vector<8x324xf32>
    %cst_13 = arith.constant 1.05070102 : f32
    %29 = vector.broadcast %cst_13 : f32 to vector<8x324xf32>
    %30 = arith.mulf %29, %28 : vector<8x324xf32>
    %31 = vector.broadcast %5 : vector<1x324xf32> to vector<8x324xf32>
    %32 = arith.mulf %30, %31 : vector<8x324xf32>
    %33 = vector.extract_strided_slice %32 {offsets = [0, 0], sizes = [8, 304], strides = [1, 1]} : vector<8x324xf32> to vector<8x304xf32>
    %34 = vector.extract_strided_slice %32 {offsets = [0, 1], sizes = [8, 304], strides = [1, 1]} : vector<8x324xf32> to vector<8x304xf32>
    %35 = vector.extract_strided_slice %32 {offsets = [0, 2], sizes = [8, 304], strides = [1, 1]} : vector<8x324xf32> to vector<8x304xf32>
    %36 = vector.extract_strided_slice %32 {offsets = [0, 18], sizes = [8, 304], strides = [1, 1]} : vector<8x324xf32> to vector<8x304xf32>
    %37 = vector.extract_strided_slice %32 {offsets = [0, 19], sizes = [8, 304], strides = [1, 1]} : vector<8x324xf32> to vector<8x304xf32>
    %38 = vector.extract_strided_slice %32 {offsets = [0, 20], sizes = [8, 304], strides = [1, 1]} : vector<8x324xf32> to vector<8x304xf32>
    %39 = vector.extract_strided_slice %8 {offsets = [0, 19], sizes = [4, 304], strides = [1, 1]} : vector<4x344xf32> to vector<4x304xf32>
    %40 = vector.extract_strided_slice %8 {offsets = [0, 20], sizes = [4, 304], strides = [1, 1]} : vector<4x344xf32> to vector<4x304xf32>
    %41 = vector.extract_strided_slice %8 {offsets = [0, 21], sizes = [4, 304], strides = [1, 1]} : vector<4x344xf32> to vector<4x304xf32>
    %42 = tpu.concatenate %33, %34, %35, %36, %37, %38, %39, %40, %41 in 0 : vector<8x304xf32>, vector<8x304xf32>, vector<8x304xf32>, vector<8x304xf32>, vector<8x304xf32>, vector<8x304xf32>, vector<4x304xf32>, vector<4x304xf32>, vector<4x304xf32> -> vector<60x304xf32>
    %cst_14 = arith.constant dense<0.000000e+00> : vector<8x304xf32>
    %43 = tpu.matmul %2, %42, %cst_14 {dimension_numbers = #tpu.dot_dimension_numbers<[1], [0], [0], [1], [0, 0, 1, 1], [], []>, precision = #tpu.contract_precision<fp32>} : vector<8x60xf32>, vector<60x304xf32>, vector<8x304xf32> -> vector<8x304xf32>
    %44 = vector.extract_strided_slice %43 {offsets = [0, 0], sizes = [8, 302], strides = [1, 1]} : vector<8x304xf32> to vector<8x302xf32>
    %45 = vector.extract_strided_slice %43 {offsets = [0, 1], sizes = [8, 302], strides = [1, 1]} : vector<8x304xf32> to vector<8x302xf32>
    %46 = arith.maximumf %44, %45 : vector<8x302xf32>
    %47 = vector.extract_strided_slice %43 {offsets = [0, 2], sizes = [8, 302], strides = [1, 1]} : vector<8x304xf32> to vector<8x302xf32>
    %48 = arith.maximumf %46, %47 : vector<8x302xf32>
    %cst_15 = arith.constant dense<0.000000e+00> : vector<8x80xf32>
    %49 = tpu.matmul %48, %6, %cst_15 {dimension_numbers = #tpu.dot_dimension_numbers<[1], [0], [0], [1], [0, 0, 1, 1], [], []>, precision = #tpu.contract_precision<fp32>} : vector<8x302xf32>, vector<302x80xf32>, vector<8x80xf32> -> vector<8x80xf32>
    %50 = vector.broadcast %4 : vector<8x1xf32> to vector<8x80xf32>
    %51 = arith.addf %49, %50 : vector<8x80xf32>
    %c0_16 = arith.constant 0 : index
    %c0_17 = arith.constant 0 : index
    %c0_18 = arith.constant 0 : index
    %c0_19 = arith.constant 0 : index
    %52 = vector.load %arg5[%c0_16, %c0_17, %c0_18, %c0_19] : memref<1x2x8x80xf32, #tpu.memory_space<vmem>>, vector<1x1x8x80xf32>
    %53 = vector.shape_cast %52 : vector<1x1x8x80xf32> to vector<8x80xf32>
    %54 = vector.shape_cast %51 : vector<8x80xf32> to vector<1x1x8x80xf32>
    tpu.vector_store %arg5[%c0_16, %c0_17, %c0_18, %c0_19], %54 {strides = array<i32>} : memref<1x2x8x80xf32, #tpu.memory_space<vmem>>, vector<1x1x8x80xf32>,
    %c0_20 = arith.constant 0 : index
    %c1 = arith.constant 1 : index
    %c0_21 = arith.constant 0 : index
    %c0_22 = arith.constant 0 : index
    %55 = vector.load %arg1[%c0_20, %c1, %c0_21, %c0_22] : memref<1x2x4x344xf32, #tpu.memory_space<vmem>>, vector<1x1x4x344xf32>
    %56 = vector.shape_cast %55 : vector<1x1x4x344xf32> to vector<4x344xf32>
    %57 = vector.extract_strided_slice %56 {offsets = [0, 0], sizes = [4, 324], strides = [1, 1]} : vector<4x344xf32> to vector<4x324xf32>
    %58 = vector.extract_strided_slice %56 {offsets = [0, 1], sizes = [4, 324], strides = [1, 1]} : vector<4x344xf32> to vector<4x324xf32>
    %59 = vector.extract_strided_slice %56 {offsets = [0, 2], sizes = [4, 324], strides = [1, 1]} : vector<4x344xf32> to vector<4x324xf32>
    %60 = vector.extract_strided_slice %56 {offsets = [0, 18], sizes = [4, 324], strides = [1, 1]} : vector<4x344xf32> to vector<4x324xf32>
    %61 = vector.extract_strided_slice %56 {offsets = [0, 19], sizes = [4, 324], strides = [1, 1]} : vector<4x344xf32> to vector<4x324xf32>
    %62 = vector.extract_strided_slice %56 {offsets = [0, 20], sizes = [4, 324], strides = [1, 1]} : vector<4x344xf32> to vector<4x324xf32>
    %63 = tpu.concatenate %57, %58, %59, %60, %61, %62 in 0 : vector<4x324xf32>, vector<4x324xf32>, vector<4x324xf32>, vector<4x324xf32>, vector<4x324xf32>, vector<4x324xf32> -> vector<24x324xf32>
    %cst_23 = arith.constant dense<0.000000e+00> : vector<8x324xf32>
    %64 = tpu.matmul %1, %63, %cst_23 {dimension_numbers = #tpu.dot_dimension_numbers<[1], [0], [0], [1], [0, 0, 1, 1], [], []>, precision = #tpu.contract_precision<fp32>} : vector<8x24xf32>, vector<24x324xf32>, vector<8x324xf32> -> vector<8x324xf32>
    %65 = vector.broadcast %3 : vector<8x1xf32> to vector<8x324xf32>
    %66 = arith.addf %64, %65 : vector<8x324xf32>
    %cst_24 = arith.constant 0.000000e+00 : f32
    %67 = vector.broadcast %cst_24 : f32 to vector<8x324xf32>
    %68 = arith.cmpf ogt, %66, %67 : vector<8x324xf32>
    %cst_25 = arith.constant 0.000000e+00 : f32
    %69 = vector.broadcast %cst_25 : f32 to vector<8x324xf32>
    %70 = arith.minimumf %66, %69 : vector<8x324xf32>
    %71 = math.exp %70 : vector<8x324xf32>
    %cst_26 = arith.constant 1.000000e+00 : f32
    %72 = vector.broadcast %cst_26 : f32 to vector<8x324xf32>
    %73 = arith.subf %71, %72 : vector<8x324xf32>
    %cst_27 = arith.constant 1.67326319 : f32
    %74 = vector.broadcast %cst_27 : f32 to vector<8x324xf32>
    %75 = arith.mulf %74, %73 : vector<8x324xf32>
    %76 = arith.select %68, %66, %75 : vector<8x324xi1>, vector<8x324xf32>
    %cst_28 = arith.constant 1.05070102 : f32
    %77 = vector.broadcast %cst_28 : f32 to vector<8x324xf32>
    %78 = arith.mulf %77, %76 : vector<8x324xf32>
    %79 = vector.broadcast %5 : vector<1x324xf32> to vector<8x324xf32>
    %80 = arith.mulf %78, %79 : vector<8x324xf32>
    %81 = vector.extract_strided_slice %80 {offsets = [0, 0], sizes = [8, 304], strides = [1, 1]} : vector<8x324xf32> to vector<8x304xf32>
    %82 = vector.extract_strided_slice %80 {offsets = [0, 1], sizes = [8, 304], strides = [1, 1]} : vector<8x324xf32> to vector<8x304xf32>
    %83 = vector.extract_strided_slice %80 {offsets = [0, 2], sizes = [8, 304], strides = [1, 1]} : vector<8x324xf32> to vector<8x304xf32>
    %84 = vector.extract_strided_slice %80 {offsets = [0, 18], sizes = [8, 304], strides = [1, 1]} : vector<8x324xf32> to vector<8x304xf32>
    %85 = vector.extract_strided_slice %80 {offsets = [0, 19], sizes = [8, 304], strides = [1, 1]} : vector<8x324xf32> to vector<8x304xf32>
    %86 = vector.extract_strided_slice %80 {offsets = [0, 20], sizes = [8, 304], strides = [1, 1]} : vector<8x324xf32> to vector<8x304xf32>
    %87 = vector.extract_strided_slice %56 {offsets = [0, 19], sizes = [4, 304], strides = [1, 1]} : vector<4x344xf32> to vector<4x304xf32>
    %88 = vector.extract_strided_slice %56 {offsets = [0, 20], sizes = [4, 304], strides = [1, 1]} : vector<4x344xf32> to vector<4x304xf32>
    %89 = vector.extract_strided_slice %56 {offsets = [0, 21], sizes = [4, 304], strides = [1, 1]} : vector<4x344xf32> to vector<4x304xf32>
    %90 = tpu.concatenate %81, %82, %83, %84, %85, %86, %87, %88, %89 in 0 : vector<8x304xf32>, vector<8x304xf32>, vector<8x304xf32>, vector<8x304xf32>, vector<8x304xf32>, vector<8x304xf32>, vector<4x304xf32>, vector<4x304xf32>, vector<4x304xf32> -> vector<60x304xf32>
    %cst_29 = arith.constant dense<0.000000e+00> : vector<8x304xf32>
    %91 = tpu.matmul %2, %90, %cst_29 {dimension_numbers = #tpu.dot_dimension_numbers<[1], [0], [0], [1], [0, 0, 1, 1], [], []>, precision = #tpu.contract_precision<fp32>} : vector<8x60xf32>, vector<60x304xf32>, vector<8x304xf32> -> vector<8x304xf32>
    %92 = vector.extract_strided_slice %91 {offsets = [0, 0], sizes = [8, 302], strides = [1, 1]} : vector<8x304xf32> to vector<8x302xf32>
    %93 = vector.extract_strided_slice %91 {offsets = [0, 1], sizes = [8, 302], strides = [1, 1]} : vector<8x304xf32> to vector<8x302xf32>
    %94 = arith.maximumf %92, %93 : vector<8x302xf32>
    %95 = vector.extract_strided_slice %91 {offsets = [0, 2], sizes = [8, 302], strides = [1, 1]} : vector<8x304xf32> to vector<8x302xf32>
    %96 = arith.maximumf %94, %95 : vector<8x302xf32>
    %cst_30 = arith.constant dense<0.000000e+00> : vector<8x80xf32>
    %97 = tpu.matmul %96, %6, %cst_30 {dimension_numbers = #tpu.dot_dimension_numbers<[1], [0], [0], [1], [0, 0, 1, 1], [], []>, precision = #tpu.contract_precision<fp32>} : vector<8x302xf32>, vector<302x80xf32>, vector<8x80xf32> -> vector<8x80xf32>
    %98 = vector.broadcast %4 : vector<8x1xf32> to vector<8x80xf32>
    %99 = arith.addf %97, %98 : vector<8x80xf32>
    %c0_31 = arith.constant 0 : index
    %c1_32 = arith.constant 1 : index
    %c0_33 = arith.constant 0 : index
    %c0_34 = arith.constant 0 : index
    %100 = vector.load %arg5[%c0_31, %c1_32, %c0_33, %c0_34] : memref<1x2x8x80xf32, #tpu.memory_space<vmem>>, vector<1x1x8x80xf32>
    %101 = vector.shape_cast %100 : vector<1x1x8x80xf32> to vector<8x80xf32>
    %102 = vector.shape_cast %99 : vector<8x80xf32> to vector<1x1x8x80xf32>
    tpu.vector_store %arg5[%c0_31, %c1_32, %c0_33, %c0_34], %102 {strides = array<i32>} : memref<1x2x8x80xf32, #tpu.memory_space<vmem>>, vector<1x1x8x80xf32>,
    return
  }
  func.func @transform_0(%arg0: i32) -> (i32, i32, i32, i32) {
    %c0_i32 = arith.constant 0 : i32
    %c0_i32_0 = arith.constant 0 : i32
    %c0_i32_1 = arith.constant 0 : i32
    %c0_i32_2 = arith.constant 0 : i32
    return %arg0, %c0_i32, %c0_i32_0, %c0_i32_1 : i32, i32, i32, i32
  }
  func.func @transform_1(%arg0: i32) -> (i32, i32) {
    %c0_i32 = arith.constant 0 : i32
    %c0_i32_0 = arith.constant 0 : i32
    %c0_i32_1 = arith.constant 0 : i32
    return %c0_i32, %c0_i32_0 : i32, i32
  }
  func.func @transform_2(%arg0: i32) -> (i32, i32) {
    %c0_i32 = arith.constant 0 : i32
    %c0_i32_0 = arith.constant 0 : i32
    %c0_i32_1 = arith.constant 0 : i32
    return %c0_i32, %c0_i32_0 : i32, i32
  }
  func.func @transform_3(%arg0: i32) -> (i32, i32) {
    %c0_i32 = arith.constant 0 : i32
    %c0_i32_0 = arith.constant 0 : i32
    %c0_i32_1 = arith.constant 0 : i32
    return %c0_i32, %c0_i32_0 : i32, i32
  }
  func.func @transform_4(%arg0: i32) -> (i32, i32, i32, i32) {
    %c0_i32 = arith.constant 0 : i32
    %c0_i32_0 = arith.constant 0 : i32
    %c0_i32_1 = arith.constant 0 : i32
    %c0_i32_2 = arith.constant 0 : i32
    return %arg0, %c0_i32, %c0_i32_0, %c0_i32_1 : i32, i32, i32, i32
  }
}

</mosaic_0001>

<bundles_post_ra>
// kernel: tpu_custom_call.1
= control target key start
LH: loop header
LB: loop body
LE: loop exit
PB: predicated region body
PF: predicated region fallthrough
CT: control target
= control target key end

     0   :  { %s9892_s19 = smov 127   ;;  %s12178_s0 = inlined_call_operand.vmem [shape: f32[1,2,4,344], index: 0, kind: input, shape index: {}]   ;;  %s12179_s1 = inlined_call_operand.vmem [shape: f32[8,86], index: 1, kind: input, shape index: {}]   ;;  %s12180_s2 = inlined_call_operand.vmem [shape: f32[1,324], index: 2, kind: input, shape index: {}]   ;;  %s12181_s3 = inlined_call_operand.vmem [shape: f32[302,80], index: 3, kind: input, shape index: {}]   ;;  %s12182_s4 = inlined_call_operand.hbm [shape: f32[1,2,8,80], index: 4, kind: output, shape index: {}]  }
   0x1   :  { %v9935_v0 = vld [vmem:[%s12178_s0] sm:$0xff]  ;;  %v9940_v1 = vld [vmem:[%s12178_s0 + $0x8] sm:$0xf] }
   0x2   :  { %68 = vrot.lane.b32.xlu0 %v9935_v0, %s9892_s19  ;;  %v9946_v2 = vcombine.high %v9935_v0, %v9935_v0  ;;  %v65_v3 = vcombine.low %v9940_v1, %v9940_v1 }
   0x3   :  { %9 = vsyncpa [#allocation3], 0  ;;  %s9893_s20 = smov 126   ;;  %s9894_s21 = smov 110   ;;  %v64_v4 = vcombine.low %v9935_v0, %v9935_v0  ;;  %v12186_v5 = vmov 0.0   ;;  %v9979_v6 = vld [vmem:[%s12179_s1] sm:$0xff] }
   0x4   :  { %80 = vrot.lane.b32.xlu1 %v9946_v2, %s9893_s20  ;;  %s9895_s22 = smov 109   ;;  %214 = vmatprep.mubr.f32.mxu1 %v12186_v5  ;;  %s9897_s23 = smov 108   ;;  %v9898_v7 = vmov 84   ;;  %vm72_vm0 = vcmask 1039360   ;;  %vm126_vm1 = vcmask 1043456   ;;  %vm84_vm2 = vcmask 1031168  }
   0x5   :  { %320 = vmatprep.mubr.f32.mxu0 %v12186_v5  ;;  %9845 = vset.pattern.permute.xlu1 %v9898_v7  ;;  %vm96_vm3 = vcmask 900096   ;;  %vm141_vm4 = vcmask 195584   ;;  %vm108_vm5 = vcmask 891904   ;;  %vm120_vm6 = vcmask 883712   ;;  %s9902_s28 = smov 104  }
   0x6   :  { %70 = vrot.lane.b32.xlu0 %v65_v3, %s9892_s19  ;;  %v142_v20 = vsel %vm141_vm4, %v9979_v6, 0  ;;  %vm9900_vm7 = vmmov 0   ;;  %vm1240_vm11 = vcmask 875520   ;;  %vm1245_vm12 = vcmask 490496  }
   0x7   :  { %v9995_v28 = vand.u32 4294901760, %v142_v20  ;;  %vm2473_vm13 = vcmask 375808   ;;  %vm2477_vm14 = vcmask 1045504  }
   0x8   :  { %82 = vrot.lane.b32.xlu1 %v9940_v1, %s9893_s20 }
   0x9   :  { %12362 = vst [vmem:[#allocation5_spill] sm:$0xff] %v9995_v28  ;;  %v10018_v43 = vsub.f32 %v142_v20, %v9995_v28 }
   0xa   :  { %92 = vrot.lane.b32.xlu0 %v9935_v0, %s9894_s21 }
   0xb   :  { %12363 = vst [vmem:[#allocation6_spill] sm:$0xff] %v10018_v43  ;;  %v10032_v55 = vand.u32 4294901760, %v10018_v43 }
   0xc   :  { %94 = vrot.lane.b32.xlu1 %v65_v3, %s9894_s21 }
   0xd   :  { %12364 = vst [vmem:[#allocation7_spill] sm:$0xff] %v10032_v55 }
   0xe   :  { %66 = vrot.lane.b32.xlu0 %v64_v4, %s9892_s19 }
  0x10   :  { %78 = vrot.lane.b32.xlu1 %v9935_v0, %s9893_s20 }
  0x12   :  { %90 = vrot.lane.b32.xlu0 %v64_v4, %s9894_s21 }
  0x14   :  { %104 = vrot.lane.b32.xlu1 %v9946_v2, %s9895_s22 }
  0x16   :  { %106 = vrot.lane.b32.xlu0 %v9940_v1, %s9895_s22 }
  0x18   :  { %116 = vrot.lane.b32.xlu1 %v9935_v0, %s9897_s23 }
  0x1a   :  { %118 = vrot.lane.b32.xlu0 %v65_v3, %s9897_s23 }
  0x1c   :  { %102 = vrot.lane.b32.xlu1 %v9935_v0, %s9895_s22 }
  0x1e   :  { %114 = vrot.lane.b32.xlu0 %v64_v4, %s9897_s23 }
  0x20   :  { %138 = vperm.xlu1 %9845, %v9979_v6  }
  0x74   :  { %v69_v8 = vpop.permute.xlu0 %68 }
  0x76   :  { %v81_v9 = vpop.permute.xlu1 %80 }
  0x78   :  { %v71_v10 = vpop.permute.xlu0 %70 }
  0x79   :  { %v74_v11 = vsel %vm72_vm0, %v69_v8, %v71_v10  ;;  %v129_v33 = vsel %vm126_vm1, %v9940_v1, %v71_v10 }
  0x7a   :  { %v128_v12 = vsel %vm126_vm1, %v9946_v2, %v74_v11  ;;  %v83_v13 = vpop.permute.xlu1 %82  ;;  %v662_v47 = vand.u32 4294901760, %v129_v33 }
  0x7b   :  { %v144_v14 = vand.u32 4294901760, %v128_v12  ;;  %v86_v18 = vsel %vm84_vm2, %v81_v9, %v83_v13 }
  0x7c   :  { %v93_v15 = vpop.permute.xlu0 %92  ;;  %v10039_v59 = vsub.f32 %v129_v33, %v662_v47 }
  0x7d   :  { %v9985_v16 = vsub.f32 %v128_v12, %v144_v14 }
  0x7e   :  { %v95_v17 = vpop.permute.xlu1 %94 }
  0x7f   :  { %v98_v19 = vsel %vm96_vm3, %v93_v15, %v95_v17  ;;  %v228_v23 = vand.u32 4294901760, %v9985_v16  ;;  %v9998_v29 = vsel %vm126_vm1, %v83_v13, %v95_v17 }
  0x80   :  { %v131_v21 = vsel %vm126_vm1, %v86_v18, %v98_v19  ;;  %v67_v22 = vpop.permute.xlu0 %66  ;;  %v665_v40 = vand.u32 4294901760, %v9998_v29 }
  0x81   :  { %v148_v24 = vand.u32 4294901760, %v131_v21  ;;  %v73_v25 = vsel %vm72_vm0, %v67_v22, %v69_v8  ;;  %v229_v35 = vsub.f32 %v9985_v16, %v228_v23 }
  0x82   :  { %v127_v26 = vsel %vm126_vm1, %v9935_v0, %v73_v25  ;;  %v79_v27 = vpop.permute.xlu1 %78  ;;  %v10029_v53 = vsub.f32 %v9998_v29, %v665_v40 }
  0x83   :  { %v10000_v30 = vsub.f32 %v131_v21, %v148_v24  ;;  %v146_v31 = vand.u32 4294901760, %v127_v26  ;;  %v10002_v32 = vpack.c.bf16 %v148_v24, %v144_v14  ;;  %v85_v37 = vsel %vm84_vm2, %v79_v27, %v81_v9 }
  0x84   :  { %v91_v34 = vpop.permute.xlu0 %90  ;;  %v230_v51 = vand.u32 4294901760, %v229_v35  ;;  %v749_v4 = vand.u32 4294901760, %v10029_v53  ;;  %v218_v9 = vsub.f32 %v10018_v43, %v10032_v55  ;;  %v742_v14 = vand.u32 4294901760, %v10039_v59 }
  0x85   :  { %v10009_v36 = vsub.f32 %v127_v26, %v146_v31  ;;  %v97_v38 = vsel %vm96_vm3, %v91_v34, %v93_v15  ;;  %8811 = vmatprep.subr.bf16.mxu1 %v10002_v32  ;;  %v240_v39 = vand.u32 4294901760, %v10000_v30  ;;  %v12190_v35 = vmov 0.0|0.0  }
  0x86   :  { %v130_v41 = vsel %vm126_vm1, %v85_v37, %v97_v38  ;;  %v105_v42 = vpop.permute.xlu1 %104  ;;  %v10063_v22 = vand.u32 4294901760, %v218_v9  ;;  %v750_v24 = vsub.f32 %v10029_v53, %v749_v4  ;;  %v743_v29 = vsub.f32 %v10039_v59, %v742_v14 }
  0x87   :  { %v150_v44 = vand.u32 4294901760, %v130_v41  ;;  %v241_v45 = vsub.f32 %v10000_v30, %v240_v39  ;;  %v234_v46 = vand.u32 4294901760, %v10009_v36 }
  0x88   :  { %v107_v48 = vpop.permute.xlu0 %106  ;;  %12365 = vst [vmem:[#allocation8_spill] sm:$0xff] %v10063_v22  ;;  %v751_v37 = vand.u32 4294901760, %v750_v24 }
  0x89   :  { %v10024_v49 = vsub.f32 %v130_v41, %v150_v44  ;;  %v10026_v50 = vpack.c.bf16 %v150_v44, %v146_v31  ;;  %v242_v52 = vand.u32 4294901760, %v241_v45  ;;  %v235_v57 = vsub.f32 %v10009_v36, %v234_v46 }
  0x8a   :  { %v117_v54 = vpop.permute.xlu1 %116  ;;  %v110_v61 = vsel %vm108_vm5, %v105_v42, %v107_v48  ;;  %v10079_v31 = vpack.c.bf16 %v665_v40, %v662_v47 }
  0x8b   :  { %8813 = vmatpush1.bf16.msra.mxu1 %v10026_v50  ;;  %v8814_v56 = vpack.c.bf16 %v242_v52, %v230_v51  ;;  %v246_v58 = vand.u32 4294901760, %v10024_v49  ;;  %v236_v12 = vand.u32 4294901760, %v235_v57  ;;  %v8818_v51 = vpack.c.bf16 %v10000_v30, %v9985_v16 }
  0x8c   :  { %v119_v60 = vpop.permute.xlu0 %118  ;;  %v8820_v52 = vpack.c.bf16 %v10024_v49, %v10009_v36  ;;  %v8826_v57 = vpack.c.bf16 %v240_v39, %v228_v23  ;;  %v8847_v16 = vpack.c.bf16 %v749_v4, %v742_v14 }
  0x8d   :  { %v122_v62 = vsel %vm120_vm6, %v117_v54, %v119_v60  ;;  %v135_v63 = vsel %vm126_vm1, %v107_v48, %v119_v60  ;;  %8815 = vmatprep.subr.bf16.mxu0 %v8814_v56  ;;  %v247_v3 = vsub.f32 %v10024_v49, %v246_v58  ;;  %v8841_v56 = vpack.c.bf16 %v10029_v53, %v10039_v59 }
  0x8e   :  { %v134_v7 = vsel %vm126_vm1, %v110_v61, %v122_v62  ;;  %v103_v8 = vpop.permute.xlu1 %102  ;;  %v10053_v11 = vand.u32 4294901760, %v135_v63  ;;  %v8828_v60 = vpack.c.bf16 %v246_v58, %v234_v46 }
  0x8f   :  { %v10051_v10 = vand.u32 4294901760, %v134_v7  ;;  %v248_v13 = vand.u32 4294901760, %v247_v3  ;;  %v109_v18 = vsel %vm108_vm5, %v103_v8, %v105_v42  ;;  %v744_v42 = vand.u32 4294901760, %v743_v29 }
  0x90   :  { %v115_v15 = vpop.permute.xlu0 %114  ;;  %v10069_v25 = vsub.f32 %v135_v63, %v10053_v11 }
  0x91   :  { %v10057_v17 = vsub.f32 %v134_v7, %v10051_v10  ;;  %v121_v19 = vsel %vm120_vm6, %v115_v15, %v117_v54  ;;  %153 = vmatprep.subr.mxu1 %v10051_v10  ;;  %v8816_v20 = vpack.c.bf16 %v248_v13, %v236_v12  ;;  %v8838_v47 = vpack.c.bf16 %v751_v37, %v744_v42 }
  0x92   :  { %v133_v21 = vsel %vm126_vm1, %v109_v18, %v121_v19  ;;  %v10090_v38 = vand.u32 4294901760, %v10069_v25  ;;  %v1158_v7 = vlaneseq  ;;  %v19_v18 = vld [vmem:[%s12180_s2] sm:$0x7]  ;;  %s9901_s2 = smov 107  }
  0x93   :  { %v10071_v26 = vand.u32 4294901760, %v133_v21  ;;  %8817 = vmatpush1.bf16.msra.mxu0 %v8816_v20  ;;  %v10074_v27 = vand.u32 4294901760, %v10057_v17 }
  0x94   :  { %12367 = vst [vmem:[#allocation10_spill] sm:$0xff] %v10090_v38  ;;  %v757_v48 = vsub.f32 %v10069_v25, %v10090_v38  ;;  %v1159_v9 = vshrl.u32 %v1158_v7, 7 }
  0x95   :  { %12366 = vst [vmem:[#allocation9_spill] sm:$0xff] %v10074_v27  ;;  %v10082_v33 = vsub.f32 %v133_v21, %v10071_v26  ;;  %155 = vmatpush1.msra.mxu1 %v10071_v26  ;;  %v253_v34 = vsub.f32 %v10057_v17, %v10074_v27 }
  0x96   :  { %8834 = vmatprep.subr.bf16.mxu1 %v12190_v35  ;;  %220 = vmatmul.mubr.f32.vlgmr.msra.gmra.mrb[0].mxu1 %v10063_v22  ;;  %v10118_v54 = vand.u32 4294901760, %v757_v48  ;;  %v1160_v14 = vsub.s32 0, %v1159_v9 }
  0x97   :  { %8836 = vmatpush3.bf16.msra.mxu1 %v10079_v31  ;;  %v10093_v40 = vand.u32 4294901760, %v253_v34  ;;  %8300 = vmatprep.mubr.msk.f32.mxu1 %vm9900_vm7, %v12186_v5  ;;  %v10098_v41 = vand.u32 4294901760, %v10082_v33 }
  0x98   :  { %8298 = vmatprep.subr.mxu1 %v12186_v5  ;;  %v10196_v24 = vrot.slane %v19_v18, %v1160_v14 }
  0x99   :  { %12368 = vst [vmem:[#allocation11_spill] sm:$0xff] %v10098_v41  ;;  %255 = vmatprep.subr.mxu0 %v10093_v40  ;;  %v259_v44 = vsub.f32 %v10082_v33, %v10098_v41 }
  0x9a   :  { %12370 = vst [vmem:[#allocation13_spill] sm:$0xff] %v10196_v24 }
  0x9b   :  { %8299 = vmatpush3.msra.mxu1 %v10053_v11  ;;  %v10105_v45 = vand.u32 4294901760, %v259_v44 }
  0x9c   :  { %8301 = vmatmul.mubr.f32.vlgmr.msra.gmra.mrb[2].mxu1 %v10063_v22  ;;  %8837 = vmatprep.subr.bf16.mxu1 %v12190_v35 }
  0x9d   :  { %261 = vmatpush1.msra.mxu0 %v10105_v45  ;;  %8839 = vmatpush3.bf16.msra.mxu1 %v8838_v47 }
  0x9e   :  { %322 = vmatmul.mubr.f32.vlgmr.msra.gmra.mrb[0].mxu0 %v9995_v28  ;;  %8819 = vmatprep.subr.bf16.mxu0 %v8818_v51 }
  0x9f   :  { %8821 = vmatpush1.bf16.msra.mxu0 %v8820_v52  ;;  %8307 = vmatprep.subr.mxu1 %v12186_v5 }
  0xa0   :  { %342 = vmatprep.subr.mxu0 %v10057_v17  ;;  %8309 = vmatprep.mubr.msk.f32.mxu1 %vm9900_vm7, %v12186_v5 }
  0xa1   :  { %8308 = vmatpush3.msra.mxu1 %v10118_v54  ;;  %404 = vmatprep.mubr.f32.mxu0 %v12186_v5 }
  0xa2   :  { %8840 = vmatprep.subr.bf16.mxu1 %v12190_v35 }
  0xa3   :  { %345 = vmatpush1.msra.mxu0 %v10082_v33 }
  0xa4   :  { %8823 = vmatprep.subr.bf16.mxu0 %v10002_v32  ;;  %8310 = vmatmul.mubr.f32.vlgmr.msra.gmra.mrb[2].mxu1 %v9995_v28 }
  0xa5   :  { %8842 = vmatpush3.bf16.msra.mxu1 %v8841_v56  ;;  %8318 = vmatprep.mubr.msk.f32.mxu1 %vm9900_vm7, %v12186_v5 }
  0xa6   :  { %407 = vmatmul.mubr.f32.vlgmr.msra.gmra.mrb[0].mxu0 %v10018_v43  ;;  %8316 = vmatprep.subr.mxu1 %v12186_v5 }
  0xa7   :  { %8825 = vmatpush1.bf16.msra.mxu0 %v10026_v50  ;;  %483 = vmatprep.mubr.f32.mxu0 %v12186_v5 }
  0xa8   :  { %422 = vmatprep.subr.mxu0 %v10051_v10 }
  0xa9   :  { %8317 = vmatpush3.msra.mxu1 %v10069_v25 }
  0xaa   :  { %8843 = vmatprep.subr.bf16.mxu1 %v12190_v35 }
  0xab   :  { %424 = vmatpush1.msra.mxu0 %v10071_v26 }
  0xac   :  { %8827 = vmatprep.subr.bf16.mxu0 %v8826_v57  ;;  %8319 = vmatmul.mubr.f32.vlgmr.msra.gmra.mrb[2].mxu1 %v10018_v43 }
  0xad   :  { %8845 = vmatpush3.bf16.msra.mxu1 %v10079_v31  ;;  %8327 = vmatprep.mubr.msk.f32.mxu1 %vm9900_vm7, %v12186_v5 }
  0xae   :  { %487 = vmatmul.mubr.f32.vlgmr.msra.gmra.mrb[0].mxu0 %v10032_v55  ;;  %8325 = vmatprep.subr.mxu1 %v12186_v5 }
  0xaf   :  { %8829 = vmatpush1.bf16.msra.mxu0 %v8828_v60  ;;  %575 = vmatprep.mubr.f32.mxu0 %v12186_v5  ;;  %v1168_v60 = vsub.s32 2, %v1159_v9 }
  0xb0   :  { %512 = vmatprep.subr.mxu0 %v10074_v27 }
  0xb1   :  { %8326 = vmatpush3.msra.mxu1 %v10053_v11 }
  0xb2   :  { %8846 = vmatprep.subr.bf16.mxu1 %v12190_v35 }
  0xb3   :  { %516 = vmatpush1.msra.mxu0 %v10098_v41 }
  0xb4   :  { %8831 = vmatprep.subr.bf16.mxu0 %v10002_v32  ;;  %8328 = vmatmul.mubr.f32.vlgmr.msra.gmra.mrb[2].mxu1 %v10032_v55  ;;  %v10188_v32 = vpop.permute.xlu1 %138 }
  0xb5   :  { %8848 = vmatpush3.bf16.msra.mxu1 %v8847_v16  ;;  %8336 = vmatprep.mubr.msk.f32.mxu1 %vm9900_vm7, %v12186_v5  ;;  %12369 = vst [vmem:[#allocation12_spill] sm:$0xff] %v10188_v32 }
  0xb6   :  { %577 = vmatmul.mubr.f32.vlgmr.msra.gmra.mrb[0].mxu0 %v9995_v28  ;;  %8334 = vmatprep.subr.mxu1 %v12186_v5 }
  0xb7   :  { %8833 = vmatpush1.bf16.msra.mxu0 %v10026_v50  ;;  %653 = vmatprep.mubr.f32.mxu0 %v12186_v5 }
  0xb8   :  { %592 = vmatprep.subr.mxu0 %v10051_v10 }
  0xb9   :  { %8335 = vmatpush3.msra.mxu1 %v10090_v38 }
  0xba   :  { %8849 = vmatprep.subr.bf16.mxu1 %v12190_v35 }
  0xbb   :  { %594 = vmatpush1.msra.mxu0 %v10071_v26 }
  0xbc   :  { %8337 = vmatmul.mubr.f32.vlgmr.msra.gmra.mrb[2].mxu1 %v9995_v28 }
  0xbd   :  { %8851 = vmatpush3.bf16.msra.mxu1 %v10079_v31  ;;  %8345 = vmatprep.mubr.msk.f32.mxu1 %vm9900_vm7, %v12186_v5  ;;  %v1164_v31 = vsub.s32 1, %v1159_v9 }
  0xbe   :  { %655 = vmatmul.mubr.f32.vlgmr.msra.gmra.mrb[0].mxu0 %v9995_v28  ;;  %8343 = vmatprep.subr.mxu1 %v12186_v5 }
  0xbf   :  { %1334 = vmatprep.mubr.f32.mxu0 %v12186_v5  ;;  %v10201_v48 = vrot.slane %v19_v18, %v1164_v31 }
  0xc1   :  { %8344 = vmatpush3.msra.mxu1 %v10053_v11  ;;  %12371 = vst [vmem:[#allocation14_spill] sm:$0xff] %v10201_v48 }
  0xc2   :  { %8948 = vmatprep.subr.bf16.mxu1 %v12190_v35 }
  0xc4   :  { %8346 = vmatmul.mubr.f32.vlgmr.msra.gmra.mrb[2].mxu1 %v9995_v28 }
  0xc5   :  { %8364 = vmatprep.mubr.msk.f32.mxu1 %vm9900_vm7, %v12186_v5 }
 0x169   :  { %v221_v23 = vpop.f32.mrb[0].mxu1 }
 0x16a   :  { %v223_v30 = vpop.f32.mrb[1].mxu1  ;;  %v222_v36 = vadd.f32 %v221_v23, %v10188_v32 }
 0x16b   :  { %v224_v39 = vadd.f32 %v223_v30, %v10188_v32  ;;  %v10222_v30 = vrot.slane %v19_v18, %v1168_v60 }
 0x16d   :  { %12372 = vst [vmem:[#allocation15_spill] sm:$0xff] %v10222_v30 }
 0x191   :  { %v656_v46 = vpop.f32.mrb[0].mxu0 }
 0x192   :  { %v9723_v49 = vadd.f32 %v656_v46, %v222_v36  ;;  %v658_v50 = vpop.f32.mrb[1].mxu0 }
 0x193   :  { %v9725_v53 = vadd.f32 %v658_v50, %v224_v39 }
 0x194   :  { %v1136_v58 = vmin.f32 %v9723_v49, 0.0  ;;  %vm1133_vm8 = vcmp.gt.f32.partialorder %v9723_v49, 0.0 }
 0x195   :  { %v1137_v59 = vmin.f32 %v9725_v53, 0.0  ;;  %vm1134_vm9 = vcmp.gt.f32.partialorder %v9725_v53, 0.0 }
 0x196   :  { %v1139_v61 = vmul.f32 1.442695, %v1136_v58 }
 0x197   :  { %v1141_v62 = vmul.f32 1.442695, %v1137_v59  ;;  %v1129_v63 = vpop.f32.mrb[2].mxu1 }
 0x198   :  { %9853 = vpow2.f32 %v1139_v61  ;;  %v9726_v3 = vadd.f32 %v1129_v63, %v10188_v32  ;;  %v8347_v4 = vpop.f32.mrb[3].mxu1 }
 0x199   :  { %9855 = vpow2.f32 %v1141_v62 }
 0x19a   :  { %v1138_v8 = vmin.f32 %v9726_v3, 0.0  ;;  %vm1135_vm10 = vcmp.gt.f32.partialorder %v9726_v3, 0.0 }
 0x19c   :  { %v1143_v12 = vmul.f32 1.442695, %v1138_v8 }
 0x19e   :  { %9857 = vpow2.f32 %v1143_v12 }
 0x1a2   :  { %v9854_v13 = vpop.eup %9853 }
 0x1a3   :  { %v9856_v15 = vpop.eup %9855  ;;  %v7626_v19 = vadd.f32 -1.0, %v9854_v13 }
 0x1a4   :  { %v7627_v20 = vadd.f32 -1.0, %v9856_v15 }
 0x1a5   :  { %v1148_v21 = vmul.f32 1.6732632, %v7626_v19 }
 0x1a6   :  { %v1149_v29 = vmul.f32 1.6732632, %v7627_v20 }
 0x1a7   :  { %v1151_v34 = vsel %vm1133_vm8, %v9723_v49, %v1148_v21 }
 0x1a8   :  { %v1154_v37 = vmul.f32 1.050701, %v1151_v34  ;;  %v1152_v42 = vsel %vm1134_vm9, %v9725_v53, %v1149_v29  ;;  %v9858_v51 = vpop.eup %9857 }
 0x1a9   :  { %v1155_v47 = vmul.f32 1.050701, %v1152_v42  ;;  %v7628_v56 = vadd.f32 -1.0, %v9858_v51 }
 0x1aa   :  { %v10199_v44 = vmul.f32 %v10196_v24, %v1154_v37 }
 0x1ab   :  { %v10208_v52 = vmul.f32 %v10201_v48, %v1155_v47  ;;  %v1150_v57 = vmul.f32 1.6732632, %v7628_v56 }
 0x1ac   :  { %1190 = vrot.lane.b32.xlu1 %v10199_v44, %s9893_s20  ;;  %1179 = vrot.lane.b32.xlu0 %v10199_v44, %s9892_s19  ;;  %v1256_v50 = vand.u32 4294901760, %v10199_v44 }
 0x1ad   :  { %v1153_v16 = vsel %vm1135_vm10, %v9726_v3, %v1150_v57  ;;  %v1254_v53 = vand.u32 4294901760, %v10208_v52 }
 0x1ae   :  { %v1156_v23 = vmul.f32 1.050701, %v1153_v16 }
 0x1b0   :  { %1192 = vrot.lane.b32.xlu1 %v10208_v52, %s9893_s20  ;;  %1201 = vrot.lane.b32.xlu0 %v10199_v44, %s9894_s21  ;;  %v1175_v36 = vmul.f32 %v10222_v30, %v1156_v23 }
 0x1b2   :  { %v1902_v58 = vand.u32 4294901760, %v1175_v36 }
 0x1b4   :  { %1203 = vrot.lane.b32.xlu1 %v10208_v52, %s9894_s21  ;;  %1181 = vrot.lane.b32.xlu0 %v10208_v52, %s9892_s19  ;;  %v10251_v63 = vsub.f32 %v1175_v36, %v1902_v58 }
 0x1b6   :  { %v12184_v14 = vand.u32 4294901760, %v10251_v63 }
 0x1b8   :  { %1214 = vrot.lane.b32.xlu1 %v10208_v52, %s9895_s22  ;;  %1223 = vrot.lane.b32.xlu0 %v10199_v44, %s9897_s23  ;;  %v10278_v34 = vsub.f32 %v10251_v63, %v12184_v14 }
 0x1bc   :  { %1225 = vrot.lane.b32.xlu1 %v10208_v52, %s9897_s23  ;;  %1238 = vrot.lane.b32.xlu0 %v9940_v1, %s9901_s2 }
 0x1c0   :  { %1183 = vrot.lane.b32.xlu1 %v1175_v36, %s9892_s19  ;;  %1194 = vrot.lane.b32.xlu0 %v1175_v36, %s9893_s20 }
 0x1c4   :  { %1212 = vrot.lane.b32.xlu1 %v10199_v44, %s9895_s22  ;;  %1205 = vrot.lane.b32.xlu0 %v1175_v36, %s9894_s21 }
 0x1c8   :  { %1236 = vrot.lane.b32.xlu1 %v9946_v2, %s9901_s2  ;;  %1216 = vrot.lane.b32.xlu0 %v1175_v36, %s9895_s22 }
 0x1cc   :  { %1243 = vrot.lane.b32.xlu1 %v9979_v6, %s9902_s28  ;;  %1227 = vrot.lane.b32.xlu0 %v1175_v36, %s9897_s23  ;;  %v10245_v6 = vsub.f32 %v10199_v44, %v1256_v50 }
 0x1ce   :  { %v12183_v12 = vand.u32 4294901760, %v10245_v6 }
 0x1d0   :  { %1234 = vrot.lane.b32.xlu0 %v9935_v0, %s9901_s2  ;;  %v10249_v0 = vsub.f32 %v10208_v52, %v1254_v53  ;;  %v10268_v29 = vsub.f32 %v10245_v6, %v12183_v12 }
 0x1d2   :  { %v12185_v13 = vand.u32 4294901760, %v10249_v0 }
 0x1d4   :  { %v10273_v31 = vsub.f32 %v10249_v0, %v12185_v13 }
 0x21e   :  { %v1191_v1 = vpop.permute.xlu1 %1190  ;;  %v1180_v39 = vpop.permute.xlu0 %1179 }
 0x222   :  { %v1193_v46 = vpop.permute.xlu1 %1192  ;;  %v1202_v49 = vpop.permute.xlu0 %1201 }
 0x223   :  { %v1196_v62 = vsel %vm84_vm2, %v1191_v1, %v1193_v46 }
 0x224   :  { %v1264_v8 = vand.u32 4294901760, %v1196_v62 }
 0x226   :  { %v1204_v2 = vpop.permute.xlu1 %1203  ;;  %v1182_v59 = vpop.permute.xlu0 %1181  ;;  %v10263_v21 = vsub.f32 %v1196_v62, %v1264_v8 }
 0x227   :  { %v1185_v61 = vsel %vm72_vm0, %v1180_v39, %v1182_v59  ;;  %v1207_v9 = vsel %vm96_vm3, %v1202_v49, %v1204_v2 }
 0x228   :  { %v1260_v3 = vand.u32 4294901760, %v1185_v61  ;;  %v1268_v15 = vand.u32 4294901760, %v1207_v9  ;;  %v12189_v52 = vand.u32 4294901760, %v10263_v21 }
 0x22a   :  { %v10253_v4 = vpop.permute.xlu1 %1214  ;;  %v1224_v7 = vpop.permute.xlu0 %1223  ;;  %v10259_v18 = vsub.f32 %v1185_v61, %v1260_v3  ;;  %v10280_v37 = vsub.f32 %v1207_v9, %v1268_v15  ;;  %v10310_v13 = vpack.c.bf16 %v1260_v3, %v1256_v50 }
 0x22c   :  { %v12188_v42 = vand.u32 4294901760, %v10259_v18  ;;  %v12192_v62 = vand.u32 4294901760, %v10280_v37 }
 0x22e   :  { %v10261_v19 = vpop.permute.xlu1 %1225  ;;  %v1239_v20 = vpop.permute.xlu0 %1238 }
 0x22f   :  { %v1252_v44 = vsel %vm126_vm1, %v1239_v20, 0  ;;  %v10289_v16 = vsel %vm120_vm6, %v1224_v7, %v10261_v19 }
 0x230   :  { %v1923_v39 = vand.u32 4294901760, %v1252_v44  ;;  %v1276_v5 = vand.u32 4294901760, %v10289_v16 }
 0x232   :  { %v1184_v47 = vpop.permute.xlu1 %1183  ;;  %v1195_v51 = vpop.permute.xlu0 %1194  ;;  %v10335_v61 = vsub.f32 %v10289_v16, %v1276_v5 }
 0x233   :  { %v1186_v56 = vsel %vm72_vm0, %v1182_v59, %v1184_v47  ;;  %v1905_v57 = vand.u32 4294901760, %v1184_v47  ;;  %v1908_v36 = vand.u32 4294901760, %v1195_v51  ;;  %v10299_v59 = vsub.f32 %v10259_v18, %v12188_v42 }
 0x234   :  { %v1258_v23 = vand.u32 4294901760, %v1186_v56  ;;  %v1197_v60 = vsel %vm84_vm2, %v1193_v46, %v1195_v51  ;;  %v10315_v42 = vpack.c.bf16 %v1268_v15, %v1264_v8  ;;  %v10330_v8 = vsub.f32 %v10280_v37, %v12192_v62 }
 0x235   :  { %v10292_v49 = vpack.c.bf16 %v1905_v57, %v1902_v58  ;;  %v10301_v9 = vsub.f32 %v1184_v47, %v1905_v57  ;;  %v10308_v58 = vsub.f32 %v10263_v21, %v12189_v52  ;;  %v10317_v47 = vsub.f32 %v1195_v51, %v1908_v36 }
 0x236   :  { %v1213_v7 = vpop.permute.xlu1 %1212  ;;  %v1206_v12 = vpop.permute.xlu0 %1205  ;;  %v10303_v14 = vpack.c.bf16 %v1258_v23, %v1254_v53  ;;  %12373 = vst [vmem:[#allocation16_spill] sm:$0xff] %v10315_v42  ;;  %v10322_v57 = vsub.f32 %v1252_v44, %v1923_v39  ;;  %v1262_v51 = vand.u32 4294901760, %v1197_v60  ;;  %v10340_v1 = vsub.f32 %v1186_v56, %v1258_v23 }
 0x237   :  { %8950 = vmatpush3.bf16.msra.mxu1 %v10292_v49  ;;  %v1208_v53 = vsel %vm96_vm3, %v1204_v2, %v1206_v12  ;;  %v1218_v50 = vsel %vm108_vm5, %v1213_v7, %v10253_v4  ;;  %v1911_v46 = vand.u32 4294901760, %v1206_v12  ;;  %v10338_v7 = vpack.c.bf16 %v1923_v39, %v10053_v11 }
 0x238   :  { %8853 = vmatprep.subr.bf16.mxu0 %v10303_v14  ;;  %8951 = vmatprep.subr.bf16.mxu1 %v12190_v35  ;;  %v1266_v3 = vand.u32 4294901760, %v1208_v53  ;;  %v1272_v30 = vand.u32 4294901760, %v1218_v50  ;;  %v12375_v56 = vand.u32 4294901760, %v10301_v9 }
 0x239   :  { %8855 = vmatpush1.bf16.msra.mxu0 %v10310_v13  ;;  %12374 = vst [vmem:[#allocation17_spill] sm:$0xff] %v10338_v7  ;;  %v10342_v35 = vpack.c.bf16 %v1911_v46, %v1908_v36  ;;  %v10345_v48 = vsub.f32 %v1206_v12, %v1911_v46  ;;  %v10360_v12 = vsub.f32 %v1197_v60, %v1262_v51 }
 0x23a   :  { %v1237_v52 = vpop.permute.xlu1 %1236  ;;  %v1217_v44 = vpop.permute.xlu0 %1216  ;;  %v10353_v11 = vpack.c.bf16 %v1266_v3, %v1262_v51  ;;  %v10358_v23 = vsub.f32 %v10301_v9, %v12375_v56  ;;  %v12377_v56 = vand.u32 4294901760, %v10317_v47  ;;  %v10373_v51 = vpack.c.bf16 %v1276_v5, %v1272_v30 }
 0x23b   :  { %v1242_v2 = vsel %vm1240_vm11, %v1237_v52, %v1239_v20  ;;  %v1219_v16 = vsel %vm108_vm5, %v10253_v4, %v1217_v44  ;;  %8953 = vmatpush3.bf16.msra.mxu1 %v10342_v35  ;;  %v1914_v36 = vand.u32 4294901760, %v1217_v44  ;;  %v10377_v43 = vsub.f32 %v1218_v50, %v1272_v30 }
 0x23c   :  { %v1250_v24 = vsel %vm126_vm1, %v1242_v2, 0  ;;  %v12376_v2 = vmov 0.0|0.0   ;;  %8857 = vmatprep.subr.bf16.mxu0 %v10353_v11  ;;  %v10371_v60 = vsub.f32 %v10317_v47, %v12377_v56  ;;  %12378 = vst [vmem:[#allocation18_spill] sm:$0xff] %v10373_v51  ;;  %v1270_v20 = vand.u32 4294901760, %v1219_v16 }
 0x23d   :  { %8954 = vmatprep.subr.bf16.mxu1 %v12376_v2  ;;  %v1282_v15 = vand.u32 4294901760, %v1250_v24  ;;  %8859 = vmatpush1.bf16.msra.mxu0 %v10315_v42  ;;  %v10384_v41 = vsub.f32 %v1208_v53, %v1266_v3  ;;  %v10386_v56 = vsub.f32 %v1217_v44, %v1914_v36  ;;  %v12381_v27 = vand.u32 4294901760, %v10345_v48 }
 0x23e   :  { %v1244_v39 = vpop.permute.xlu1 %1243  ;;  %v1228_v46 = vpop.permute.xlu0 %1227  ;;  %v10400_v53 = vsub.f32 %v1219_v16, %v1270_v20  ;;  %v12383_v44 = vand.u32 4294901760, %v10340_v1 }
 0x23f   :  { %v1246_v4 = vsel %vm1245_vm12, %v1244_v39, 0  ;;  %v1230_v62 = vsel %vm120_vm6, %v10261_v19, %v1228_v46  ;;  %v1917_v32 = vand.u32 4294901760, %v1228_v46  ;;  %v1996_v19 = vand.u32 4294901760, %v10358_v23 }
 0x240   :  { %v10379_v28 = vand.u32 4294901760, %v1246_v4  ;;  %v1274_v39 = vand.u32 4294901760, %v1230_v62  ;;  %v2009_v55 = vsub.f32 %v10345_v48, %v12381_v27  ;;  %v10393_v30 = vsub.f32 %v1250_v24, %v1282_v15 }
 0x241   :  { %v10381_v22 = vpack.c.bf16 %v1917_v32, %v1914_v36  ;;  %v10388_v5 = vsub.f32 %v1228_v46, %v1917_v32  ;;  %v1361_v27 = vsub.f32 %v10340_v1, %v12383_v44  ;;  %v12220_v36 = vand.u32 4294901760, %v10384_v41 }
 0x242   :  { %12379 = vst [vmem:[#allocation19_spill] sm:$0xff] %v10379_v28  ;;  %v1235_v38 = vpop.permute.xlu0 %1234  ;;  %v10396_v50 = vsub.f32 %v1246_v4, %v10379_v28  ;;  %v10403_v32 = vpack.c.bf16 %v1274_v39, %v1270_v20  ;;  %v10416_v16 = vsub.f32 %v1230_v62, %v1274_v39  ;;  %v12215_v20 = vand.u32 4294901760, %v10360_v12 }
 0x243   :  { %12380 = vst [vmem:[#allocation20_spill] sm:$0xff] %v10381_v22  ;;  %v1241_v42 = vsel %vm1240_vm11, %v1235_v38, %v1237_v52  ;;  %8956 = vmatpush3.bf16.msra.mxu1 %v10381_v22  ;;  %v12223_v23 = vand.u32 4294901760, %v10388_v5  ;;  %v10414_v52 = vpack.c.bf16 %v1282_v15, %v10051_v10  ;;  %v2010_v62 = vand.u32 4294901760, %v2009_v55 }
 0x244   :  { %12382 = vst [vmem:[#allocation21_spill] sm:$0xff] %v10396_v50  ;;  %v1248_v3 = vsel %vm126_vm1, %v1241_v42, 0  ;;  %8957 = vmatprep.subr.bf16.mxu1 %v12376_v2  ;;  %v10410_v24 = vand.u32 4294901760, %v10396_v50  ;;  %8861 = vmatprep.subr.bf16.mxu0 %v10403_v32  ;;  %v1362_v42 = vand.u32 4294901760, %v1361_v27  ;;  %v1373_v15 = vsub.f32 %v10360_v12, %v12215_v20 }
 0x245   :  { %v1284_v38 = vand.u32 4294901760, %v1248_v3  ;;  %12385 = vst [vmem:[#allocation23_spill] sm:$0xff] %v10414_v52  ;;  %8863 = vmatpush1.bf16.msra.mxu0 %v10373_v51  ;;  %v2023_v55 = vsub.f32 %v10388_v5, %v12223_v23  ;;  %v12388_v20 = vand.u32 4294901760, %v10278_v34  ;;  %v1392_v39 = vand.u32 4294901760, %v10330_v8 }
 0x246   :  { %12384 = vst [vmem:[#allocation22_spill] sm:$0xff] %v10410_v24  ;;  %v1338_v10 = vsub.f32 %v10396_v50, %v10410_v24  ;;  %8865 = vmatprep.subr.bf16.mxu0 %v10414_v52  ;;  %v12387_v24 = vand.u32 4294901760, %v10273_v31  ;;  %v1414_v27 = vand.u32 4294901760, %v10335_v61  ;;  %v12389_v22 = vand.u32 4294901760, %v10322_v57 }
 0x247   :  { %v10424_v44 = vpack.c.bf16 %v1284_v38, %v10071_v26  ;;  %8959 = vmatpush3.bf16.msra.mxu1 %v10338_v7  ;;  %v1385_v26 = vsub.f32 %v10384_v41, %v12220_v36  ;;  %v10443_v46 = vsub.f32 %v1248_v3, %v1284_v38  ;;  %v8961_v52 = vpack.c.bf16 %v1996_v19, %v12388_v20 }
 0x248   :  { %8960 = vmatprep.subr.bf16.mxu1 %v12376_v2  ;;  %v10445_v4 = vand.u32 4294901760, %v1338_v10  ;;  %v8868_v7 = vpack.c.bf16 %v1362_v42, %v12387_v24  ;;  %v12224_v36 = vand.u32 4294901760, %v10416_v16  ;;  %v2037_v3 = vsub.f32 %v10322_v57, %v12389_v22 }
 0x249   :  { %v1386_v51 = vand.u32 4294901760, %v1385_v26  ;;  %v2003_v38 = vand.u32 4294901760, %v10371_v60  ;;  %8867 = vmatpush1.bf16.msra.mxu0 %v10424_v44  ;;  %v12390_v31 = vand.u32 4294901760, %v10386_v56  ;;  %v1374_v19 = vand.u32 4294901760, %v1373_v15 }
 0x24a   :  { %12386 = vst [vmem:[#allocation24_spill] sm:$0xff] %v10445_v4  ;;  %8365 = vmatmul.mubr.f32.vlgmr.msra.gmra.mrb[4].mxu1 %v10445_v4  ;;  %8869 = vmatprep.subr.bf16.mxu0 %v8868_v7  ;;  %v12391_v8 = vand.u32 4294901760, %v10400_v53  ;;  %v1409_v22 = vsub.f32 %v10416_v16, %v12224_v36  ;;  %v12392_v60 = vand.u32 4294901760, %v10377_v43  ;;  %v2024_v20 = vand.u32 4294901760, %v2023_v55 }
 0x24b   :  { %v2016_v34 = vsub.f32 %v10386_v56, %v12390_v31  ;;  %8962 = vmatpush3.bf16.msra.mxu1 %v8961_v52  ;;  %v1438_v10 = vand.u32 4294901760, %v10443_v46  ;;  %v12393_v26 = vand.u32 4294901760, %v10268_v29  ;;  %v12394_v7 = vand.u32 4294901760, %v10299_v59 }
 0x24c   :  { %v1397_v24 = vsub.f32 %v10400_v53, %v12391_v8  ;;  %v1403_v42 = vsub.f32 %v10377_v43, %v12392_v60  ;;  %8963 = vmatprep.subr.bf16.mxu1 %v12376_v2  ;;  %v12395_v15 = vmov 0.0   ;;  %1340 = vmatmul.mubr.f32.vlgmr.msra.gmra.mrb[2].mxu0 %v10445_v4  ;;  %v8872_v31 = vpack.c.bf16 %v1386_v51, %v1374_v19 }
 0x24d   :  { %v8870_v52 = vpack.c.bf16 %v12394_v7, %v12393_v26  ;;  %8383 = vmatprep.mubr.msk.f32.mxu1 %vm9900_vm7, %v12395_v15  ;;  %v8964_v8 = vpack.c.bf16 %v2010_v62, %v2003_v38  ;;  %v1410_v23 = vand.u32 4294901760, %v1409_v22  ;;  %v12396_v60 = vand.u32 4294901760, %v10393_v30  ;;  %1490 = vmatprep.mubr.f32.mxu0 %v12395_v15 }
 0x24e   :  { %v1380_v36 = vand.u32 4294901760, %v10308_v58  ;;  %v1415_v29 = vsub.f32 %v10335_v61, %v1414_v27  ;;  %v2017_v59 = vand.u32 4294901760, %v2016_v34  ;;  %v1398_v26 = vand.u32 4294901760, %v1397_v24 }
 0x24f   :  { %v1433_v55 = vsub.f32 %v10393_v30, %v12396_v60  ;;  %8871 = vmatpush1.bf16.msra.mxu0 %v8870_v52  ;;  %8965 = vmatpush3.bf16.msra.mxu1 %v8964_v8  ;;  %v1404_v51 = vand.u32 4294901760, %v1403_v42  ;;  %v1439_v62 = vsub.f32 %v10443_v46, %v1438_v10  ;;  %v2038_v58 = vand.u32 4294901760, %v2037_v3 }
 0x250   :  { %8873 = vmatprep.subr.bf16.mxu0 %v8872_v31  ;;  %v8874_v38 = vpack.c.bf16 %v1392_v39, %v1380_v36  ;;  %8966 = vmatprep.subr.bf16.mxu1 %v12376_v2  ;;  %v8876_v19 = vpack.c.bf16 %v1410_v23, %v1398_v26  ;;  %v8967_v22 = vpack.c.bf16 %v2024_v20, %v2017_v59  ;;  %v1416_v60 = vand.u32 4294901760, %v1415_v29  ;;  %v12400_v26 = vld [vmem:[#allocation23_spill] sm:$0xff] }
 0x251   :  { %v1434_v7 = vand.u32 4294901760, %v1433_v55  ;;  %v1440_v34 = vand.u32 4294901760, %v1439_v62  ;;  %v8970_v42 = vpack.c.bf16 %v2038_v58, %v10118_v54  ;;  %v8884_v23 = vpack.c.bf16 %v10340_v1, %v10249_v0 }
 0x252   :  { %v8878_v52 = vpack.c.bf16 %v1416_v60, %v1404_v51  ;;  %v8973_v39 = vpack.c.bf16 %v10301_v9, %v10251_v63  ;;  %v8976_v54 = vpack.c.bf16 %v10345_v48, %v10317_v47  ;;  %v8890_v3 = vpack.c.bf16 %v10280_v37, %v10263_v21  ;;  %v12401_v51 = vld [vmem:[#allocation17_spill] sm:$0xff]  ;;  %v12406_v60 = vld [vmem:[#allocation22_spill] sm:$0xff] }
 0x253   :  { %8875 = vmatpush1.bf16.msra.mxu0 %v8874_v38  ;;  %8968 = vmatpush3.bf16.msra.mxu1 %v8967_v22  ;;  %v8880_v24 = vpack.c.bf16 %v1434_v7, %v10093_v40  ;;  %v8882_v36 = vpack.c.bf16 %v1440_v34, %v10105_v45  ;;  %v8886_v40 = vpack.c.bf16 %v10259_v18, %v10245_v6  ;;  %v12402_v62 = vand.u32 4294901760, %v10249_v0 }
 0x254   :  { %8877 = vmatprep.subr.bf16.mxu0 %v8876_v19  ;;  %8969 = vmatprep.subr.bf16.mxu1 %v12376_v2  ;;  %v8888_v45 = vpack.c.bf16 %v10384_v41, %v10360_v12  ;;  %v8892_v20 = vpack.c.bf16 %v10416_v16, %v10400_v53  ;;  %v8979_v31 = vpack.c.bf16 %v10388_v5, %v10386_v56  ;;  %v12403_v38 = vand.u32 4294901760, %v10340_v1 }
 0x255   :  { %v8894_v8 = vpack.c.bf16 %v10335_v61, %v10377_v43  ;;  %v8982_v55 = vpack.c.bf16 %v10322_v57, %v10069_v25  ;;  %v8896_v29 = vpack.c.bf16 %v10393_v30, %v10057_v17  ;;  %v8898_v59 = vpack.c.bf16 %v10443_v46, %v10082_v33  ;;  %v12397_v17 = vld [vmem:[#allocation16_spill] sm:$0xff]  ;;  %v12399_v33 = vld [vmem:[#allocation18_spill] sm:$0xff] }
 0x256   :  { %v12398_v25 = vld [vmem:[#allocation20_spill] sm:$0xff]  ;;  %v8916_v58 = vpack.c.bf16 %v12403_v38, %v12402_v62  ;;  %v12404_v19 = vand.u32 4294901760, %v10251_v63  ;;  %v12405_v22 = vand.u32 4294901760, %v10301_v9  ;;  %v12407_v34 = vand.u32 4294901760, %v10245_v6 }
 0x257   :  { %8879 = vmatpush1.bf16.msra.mxu0 %v8878_v52  ;;  %8971 = vmatpush3.bf16.msra.mxu1 %v8970_v42  ;;  %v12408_v52 = vand.u32 4294901760, %v10259_v18  ;;  %v12409_v0 = vand.u32 4294901760, %v10360_v12  ;;  %v12410_v63 = vand.u32 4294901760, %v10384_v41  ;;  %v12411_v9 = vand.u32 4294901760, %v10317_v47 }
 0x258   :  { %8881 = vmatprep.subr.bf16.mxu0 %v8880_v24  ;;  %8972 = vmatprep.subr.bf16.mxu1 %v12376_v2  ;;  %v8997_v7 = vpack.c.bf16 %v12405_v22, %v12404_v19  ;;  %v12412_v42 = vand.u32 4294901760, %v10345_v48  ;;  %v12413_v18 = vand.u32 4294901760, %v10263_v21  ;;  %v12415_v41 = vand.u32 4294901760, %v10400_v53 }
 0x259   :  { %v8918_v24 = vpack.c.bf16 %v12408_v52, %v12407_v34  ;;  %v8920_v1 = vpack.c.bf16 %v12410_v63, %v12409_v0  ;;  %v12416_v12 = vand.u32 4294901760, %v10416_v16  ;;  %v12417_v48 = vand.u32 4294901760, %v10386_v56  ;;  %v40_v34 = vld [vmem:[%s12181_s3 + $0xa0] sm:$0xff]  ;;  %v41_v52 = vld [vmem:[%s12181_s3 + $0xa8] sm:$0xff] }
 0x25a   :  { %8384 = vmatmul.mubr.f32.vlgmr.msra.gmra.mrb[4].mxu1 %v10379_v28  ;;  %v9000_v6 = vpack.c.bf16 %v12412_v42, %v12411_v9  ;;  %v12419_v21 = vand.u32 4294901760, %v10377_v43  ;;  %v12421_v53 = vand.u32 4294901760, %v10393_v30  ;;  %v12423_v56 = vand.u32 4294901760, %v10322_v57  ;;  %v21_v57 = vld [vmem:[%s12181_s3 + $0x8] sm:$0xff] }
 0x25b   :  { %8883 = vmatpush1.bf16.msra.mxu0 %v8882_v36  ;;  %8974 = vmatpush3.bf16.msra.mxu1 %v8973_v39  ;;  %v12414_v36 = vand.u32 4294901760, %v10280_v37  ;;  %v8924_v47 = vpack.c.bf16 %v12416_v12, %v12415_v41  ;;  %v12418_v39 = vand.u32 4294901760, %v10388_v5  ;;  %v12424_v5 = vld [vmem:[#allocation11_spill] sm:$0xff]  ;;  %v2485_v30 = vand.u32 4294901760, %v21_v57  ;;  %v25_v9 = vld [vmem:[%s12181_s3 + $0x28] sm:$0xff] }
 0x25c   :  { %8885 = vmatprep.subr.bf16.mxu0 %v8884_v23  ;;  %8975 = vmatprep.subr.bf16.mxu1 %v12376_v2  ;;  %v8926_v37 = vpack.c.bf16 %v1414_v27, %v12419_v21  ;;  %v8930_v43 = vpack.c.bf16 %v1438_v10, %v12424_v5  ;;  %v2542_v63 = vand.u32 4294901760, %v40_v34 }
 0x25d   :  { %8402 = vmatprep.mubr.msk.f32.mxu1 %vm9900_vm7, %v12395_v15  ;;  %v8922_v23 = vpack.c.bf16 %v12414_v36, %v12413_v18  ;;  %v43_v18 = vld [vmem:[%s12181_s3 + $0xb8] sm:$0xff] }
 0x25e   :  { %1492 = vmatmul.mubr.f32.vlgmr.msra.gmra.mrb[2].mxu0 %v10379_v28  ;;  %v2551_v12 = vand.u32 4294901760, %v43_v18 }
 0x25f   :  { %8887 = vmatpush1.bf16.msra.mxu0 %v8886_v40  ;;  %1594 = vmatprep.mubr.f32.mxu0 %v12395_v15  ;;  %v9003_v40 = vpack.c.bf16 %v12418_v39, %v12417_v48  ;;  %v27_v48 = vld [vmem:[%s12181_s3 + $0x38] sm:$0xff] }
 0x260   :  { %8889 = vmatprep.subr.bf16.mxu0 %v8888_v45  ;;  %8977 = vmatpush3.bf16.msra.mxu1 %v8976_v54  ;;  %v12420_v45 = vld [vmem:[#allocation9_spill] sm:$0xff]  ;;  %v12422_v54 = vld [vmem:[#allocation10_spill] sm:$0xff] }
 0x261   :  { %8978 = vmatprep.subr.bf16.mxu1 %v12376_v2  ;;  %v8928_v16 = vpack.c.bf16 %v12421_v53, %v12420_v45 }
 0x263   :  { %8891 = vmatpush1.bf16.msra.mxu0 %v8890_v3  ;;  %v9006_v3 = vpack.c.bf16 %v12423_v56, %v12422_v54 }
 0x264   :  { %8893 = vmatprep.subr.bf16.mxu0 %v8892_v20  ;;  %8980 = vmatpush3.bf16.msra.mxu1 %v8979_v31  ;;  %v10650_v20 = vsub.f32 %v21_v57, %v2485_v30  ;;  %v38_v31 = vld [vmem:[%s12181_s3 + $0x90] sm:$0xff] }
 0x265   :  { %8981 = vmatprep.subr.bf16.mxu1 %v12376_v2 }
 0x267   :  { %8895 = vmatpush1.bf16.msra.mxu0 %v8894_v8  ;;  %v39_v8 = vld [vmem:[%s12181_s3 + $0x98] sm:$0xff] }
 0x268   :  { %8897 = vmatprep.subr.bf16.mxu0 %v8896_v29  ;;  %8983 = vmatpush3.bf16.msra.mxu1 %v8982_v55  ;;  %v22_v55 = vld [vmem:[%s12181_s3 + $0x10] sm:$0xff] }
 0x269   :  { %8984 = vmatprep.subr.bf16.mxu1 %v12376_v2 }
 0x26b   :  { %8899 = vmatpush1.bf16.msra.mxu0 %v8898_v59  ;;  %8403 = vmatmul.mubr.f32.vlgmr.msra.gmra.mrb[4].mxu1 %v10396_v50  ;;  %v2536_v59 = vand.u32 4294901760, %v38_v31 }
 0x26c   :  { %8901 = vmatprep.subr.bf16.mxu0 %v10303_v14  ;;  %8986 = vmatpush3.bf16.msra.mxu1 %v10292_v49 }
 0x26d   :  { %8987 = vmatprep.subr.bf16.mxu1 %v12376_v2  ;;  %8421 = vmatprep.mubr.msk.f32.mxu1 %vm9900_vm7, %v12395_v15  ;;  %v10677_v38 = vsub.f32 %v38_v31, %v2536_v59 }
 0x26e   :  { %1597 = vmatmul.mubr.f32.vlgmr.msra.gmra.mrb[2].mxu0 %v10396_v50 }
 0x26f   :  { %8903 = vmatpush1.bf16.msra.mxu0 %v10310_v13  ;;  %1683 = vmatprep.mubr.f32.mxu0 %v12395_v15 }
 0x270   :  { %8905 = vmatprep.subr.bf16.mxu0 %v10353_v11  ;;  %8989 = vmatpush3.bf16.msra.mxu1 %v10342_v35 }
 0x271   :  { %8990 = vmatprep.subr.bf16.mxu1 %v12376_v2 }
 0x273   :  { %8907 = vmatpush1.bf16.msra.mxu0 %v12397_v17 }
 0x274   :  { %8909 = vmatprep.subr.bf16.mxu0 %v10403_v32  ;;  %8992 = vmatpush3.bf16.msra.mxu1 %v12398_v25 }
 0x275   :  { %8993 = vmatprep.subr.bf16.mxu1 %v12376_v2 }
 0x277   :  { %8911 = vmatpush1.bf16.msra.mxu0 %v12399_v33 }
 0x278   :  { %8913 = vmatprep.subr.bf16.mxu0 %v12400_v26  ;;  %8995 = vmatpush3.bf16.msra.mxu1 %v12401_v51 }
 0x279   :  { %8996 = vmatprep.subr.bf16.mxu1 %v12376_v2 }
 0x27b   :  { %8915 = vmatpush1.bf16.msra.mxu0 %v10424_v44  ;;  %8422 = vmatmul.mubr.f32.vlgmr.msra.gmra.mrb[4].mxu1 %v12406_v60 }
 0x27c   :  { %8917 = vmatprep.subr.bf16.mxu0 %v8916_v58  ;;  %8998 = vmatpush3.bf16.msra.mxu1 %v8997_v7 }
 0x27d   :  { %8999 = vmatprep.subr.bf16.mxu1 %v12376_v2  ;;  %8440 = vmatprep.mubr.msk.f32.mxu1 %vm9900_vm7, %v12395_v15 }
 0x27e   :  { %1687 = vmatmul.mubr.f32.vlgmr.msra.gmra.mrb[2].mxu0 %v12406_v60 }
 0x27f   :  { %8919 = vmatpush1.bf16.msra.mxu0 %v8918_v24  ;;  %1805 = vmatprep.mubr.f32.mxu0 %v12395_v15  ;;  %v24_v24 = vld [vmem:[%s12181_s3 + $0x20] sm:$0xff] }
 0x280   :  { %8921 = vmatprep.subr.bf16.mxu0 %v8920_v1  ;;  %9001 = vmatpush3.bf16.msra.mxu1 %v9000_v6  ;;  %v2545_v1 = vand.u32 4294901760, %v41_v52  ;;  %v2494_v42 = vand.u32 4294901760, %v24_v24  ;;  %v42_v6 = vld [vmem:[%s12181_s3 + $0xb0] sm:$0xff] }
 0x281   :  { %9002 = vmatprep.subr.bf16.mxu1 %v12376_v2  ;;  %v2548_v41 = vand.u32 4294901760, %v42_v6 }
 0x282   :  { %v10723_v39 = vpack.c.bf16 %v2545_v1, %v2542_v63  ;;  %v10727_v21 = vsub.f32 %v41_v52, %v2545_v1  ;;  %v47_v52 = vld [vmem:[%s12181_s3 + $0xd8] sm:$0xff] }
 0x283   :  { %8923 = vmatpush1.bf16.msra.mxu0 %v8922_v23  ;;  %v2497_v23 = vand.u32 4294901760, %v25_v9  ;;  %v10738_v54 = vsub.f32 %v42_v6, %v2548_v41  ;;  %v2563_v1 = vand.u32 4294901760, %v47_v52 }
 0x284   :  { %8925 = vmatprep.subr.bf16.mxu0 %v8924_v47  ;;  %9004 = vmatpush3.bf16.msra.mxu1 %v9003_v40  ;;  %v26_v47 = vld [vmem:[%s12181_s3 + $0x30] sm:$0xff]  ;;  %12433 = vst [vmem:[#allocation25_spill] sm:$0xff] %v10723_v39  ;;  %v10725_v40 = vsub.f32 %v40_v34, %v2542_v63 }
 0x285   :  { %9005 = vmatprep.subr.bf16.mxu1 %v12376_v2  ;;  %v10732_v45 = vpack.c.bf16 %v2497_v23, %v2494_v42  ;;  %v10734_v53 = vsub.f32 %v25_v9, %v2497_v23  ;;  %v2500_v5 = vand.u32 4294901760, %v26_v47  ;;  %v46_v34 = vld [vmem:[%s12181_s3 + $0xd0] sm:$0xff] }
 0x286   :  { %v10742_v56 = vpack.c.bf16 %v10727_v21, %v10725_v40  ;;  %v2560_v63 = vand.u32 4294901760, %v46_v34 }
 0x287   :  { %8927 = vmatpush1.bf16.msra.mxu0 %v8926_v37  ;;  %v10729_v37 = vsub.f32 %v24_v24, %v2494_v42  ;;  %12434 = vst [vmem:[#allocation26_spill] sm:$0xff] %v10732_v45 }
 0x288   :  { %8929 = vmatprep.subr.bf16.mxu0 %v8928_v16  ;;  %9007 = vmatpush3.bf16.msra.mxu1 %v9006_v3  ;;  %v10736_v16 = vpack.c.bf16 %v2551_v12, %v2548_v41  ;;  %12436 = vst [vmem:[#allocation28_spill] sm:$0xff] %v10742_v56  ;;  %v10744_v3 = vsub.f32 %v43_v18, %v2551_v12 }
 0x289   :  { %9008 = vmatprep.subr.bf16.mxu1 %v12376_v2  ;;  %v10807_v23 = vpack.c.bf16 %v2563_v1, %v2560_v63  ;;  %v10809_v41 = vsub.f32 %v46_v34, %v2560_v63  ;;  %v10812_v12 = vsub.f32 %v47_v52, %v2563_v1  ;;  %v48_v1 = vld [vmem:[%s12181_s3 + $0xe0] sm:$0xff] }
 0x28a   :  { %12435 = vst [vmem:[#allocation27_spill] sm:$0xff] %v10736_v16 }
 0x28b   :  { %8931 = vmatpush1.bf16.msra.mxu0 %v8930_v43  ;;  %8441 = vmatmul.mubr.f32.vlgmr.msra.gmra.mrb[4].mxu1 %v10379_v28  ;;  %v2503_v43 = vand.u32 4294901760, %v27_v48  ;;  %12444 = vst [vmem:[#allocation36_spill] sm:$0xff] %v10807_v23 }
 0x28c   :  { %8933 = vmatprep.subr.bf16.mxu0 %v10303_v14  ;;  %9010 = vmatpush3.bf16.msra.mxu1 %v10292_v49  ;;  %v20_v14 = vld [vmem:[%s12181_s3] sm:$0xff] }
 0x28d   :  { %9011 = vmatprep.subr.bf16.mxu1 %v12376_v2  ;;  %8459 = vmatprep.mubr.msk.f32.mxu1 %vm9900_vm7, %v12395_v15 }
 0x28e   :  { %1807 = vmatmul.mubr.f32.vlgmr.msra.gmra.mrb[2].mxu0 %v10379_v28 }
 0x28f   :  { %8935 = vmatpush1.bf16.msra.mxu0 %v10310_v13  ;;  %1893 = vmatprep.mubr.f32.mxu0 %v12395_v15  ;;  %v37_v13 = vld [vmem:[%s12181_s3 + $0x88] sm:$0xff] }
 0x290   :  { %8937 = vmatprep.subr.bf16.mxu0 %v10353_v11  ;;  %9013 = vmatpush3.bf16.msra.mxu1 %v10342_v35  ;;  %v36_v35 = vld [vmem:[%s12181_s3 + $0x80] sm:$0xff]  ;;  %v2533_v61 = vand.u32 4294901760, %v37_v13  ;;  %v2482_v11 = vand.u32 4294901760, %v20_v14 }
 0x291   :  { %9014 = vmatprep.subr.bf16.mxu1 %v12376_v2  ;;  %v2530_v49 = vand.u32 4294901760, %v36_v35 }
 0x292   :  { %v10646_v27 = vsub.f32 %v20_v14, %v2482_v11  ;;  %v10648_v10 = vpack.c.bf16 %v2485_v30, %v2482_v11  ;;  %v10757_v14 = vpack.c.bf16 %v2503_v43, %v2500_v5  ;;  %v44_v11 = vld [vmem:[%s12181_s3 + $0xc0] sm:$0xff]  ;;  %v45_v30 = vld [vmem:[%s12181_s3 + $0xc8] sm:$0xff] }
 0x293   :  { %8939 = vmatpush1.bf16.msra.mxu0 %v12397_v17  ;;  %v10642_v46 = vsub.f32 %v36_v35, %v2530_v49  ;;  %v2539_v17 = vand.u32 4294901760, %v39_v8  ;;  %v10749_v35 = vpack.c.bf16 %v10734_v53, %v10729_v37  ;;  %v2554_v31 = vand.u32 4294901760, %v44_v11 }
 0x294   :  { %8941 = vmatprep.subr.bf16.mxu0 %v10403_v32  ;;  %9016 = vmatpush3.bf16.msra.mxu1 %v12398_v25  ;;  %v10640_v32 = vpack.c.bf16 %v2533_v61, %v2530_v49  ;;  %12426 = vst [vmem:[#allocation20_spill] sm:$0xff] %v10648_v10  ;;  %v23_v25 = vld [vmem:[%s12181_s3 + $0x18] sm:$0xff]  ;;  %12439 = vst [vmem:[#allocation31_spill] sm:$0xff] %v10757_v14  ;;  %v10759_v49 = vsub.f32 %v26_v47, %v2500_v5 }
 0x295   :  { %9017 = vmatprep.subr.bf16.mxu1 %v12376_v2  ;;  %v10675_v62 = vpack.c.bf16 %v2539_v17, %v2536_v59  ;;  %v10679_v58 = vsub.f32 %v39_v8, %v2539_v17  ;;  %12437 = vst [vmem:[#allocation29_spill] sm:$0xff] %v10749_v35  ;;  %v2557_v8 = vand.u32 4294901760, %v45_v30  ;;  %v29_v59 = vld [vmem:[%s12181_s3 + $0x48] sm:$0xff]  ;;  %v31_v5 = vld [vmem:[%s12181_s3 + $0x58] sm:$0xff]  ;;  %v2708_v60 = vand.u32 4294901760, %v10642_v46 }
 0x296   :  { %12425 = vst [vmem:[#allocation16_spill] sm:$0xff] %v10640_v32  ;;  %v2509_v24 = vand.u32 4294901760, %v29_v59 }
 0x297   :  { %8943 = vmatpush1.bf16.msra.mxu0 %v12399_v33  ;;  %v2488_v33 = vand.u32 4294901760, %v22_v55  ;;  %12429 = vst [vmem:[#allocation17_spill] sm:$0xff] %v10675_v62  ;;  %v10699_v0 = vpack.c.bf16 %v10679_v58, %v10677_v38  ;;  %v10784_v17 = vpack.c.bf16 %v2557_v8, %v2554_v31 }
 0x298   :  { %8945 = vmatprep.subr.bf16.mxu0 %v12400_v26  ;;  %9019 = vmatpush3.bf16.msra.mxu1 %v12401_v51  ;;  %v10671_v26 = vpack.c.bf16 %v10650_v20, %v10646_v27  ;;  %v2491_v51 = vand.u32 4294901760, %v23_v25  ;;  %v10805_v18 = vsub.f32 %v29_v59, %v2509_v24 }
 0x299   :  { %9021 = vmatprep.subr.bf16.mxu1 %v10640_v32  ;;  %v10681_v19 = vsub.f32 %v22_v55, %v2488_v33  ;;  %12431 = vst [vmem:[#allocation10_spill] sm:$0xff] %v10699_v0  ;;  %v28_v55 = vld [vmem:[%s12181_s3 + $0x40] sm:$0xff]  ;;  %12441 = vst [vmem:[#allocation33_spill] sm:$0xff] %v10784_v17 }
 0x29a   :  { %12428 = vst [vmem:[#allocation23_spill] sm:$0xff] %v10671_v26  ;;  %v10684_v22 = vpack.c.bf16 %v2491_v51, %v2488_v33  ;;  %v10686_v7 = vsub.f32 %v23_v25, %v2491_v51  ;;  %v10786_v25 = vsub.f32 %v44_v11, %v2554_v31  ;;  %v10788_v33 = vsub.f32 %v45_v30, %v2557_v8 }
 0x29b   :  { %8947 = vmatpush1.bf16.msra.mxu0 %v10424_v44  ;;  %8460 = vmatmul.mubr.f32.vlgmr.msra.gmra.mrb[4].mxu1 %v10379_v28  ;;  %v10644_v44 = vsub.f32 %v37_v13, %v2533_v61  ;;  %v10755_v13 = vpack.c.bf16 %v10744_v3, %v10738_v54  ;;  %v10761_v61 = vsub.f32 %v27_v48, %v2503_v43  ;;  %v2506_v51 = vand.u32 4294901760, %v28_v55  ;;  %v30_v48 = vld [vmem:[%s12181_s3 + $0x50] sm:$0xff] }
 0x29c   :  { %9023 = vmatpush3.bf16.msra.mxu1 %v10648_v10  ;;  %12430 = vst [vmem:[#allocation9_spill] sm:$0xff] %v10684_v22  ;;  %v10713_v36 = vpack.c.bf16 %v10686_v7, %v10681_v19  ;;  %v10798_v9 = vpack.c.bf16 %v10788_v33, %v10786_v25  ;;  %v10827_v43 = vpack.c.bf16 %v10812_v12, %v10809_v41  ;;  %v2512_v11 = vand.u32 4294901760, %v30_v48 }
 0x29d   :  { %v10663_v29 = vpack.c.bf16 %v10644_v44, %v10642_v46  ;;  %9025 = vmatprep.subr.bf16.mxu1 %v10675_v62  ;;  %12438 = vst [vmem:[#allocation30_spill] sm:$0xff] %v10755_v13  ;;  %v10768_v57 = vpack.c.bf16 %v10761_v61, %v10759_v49  ;;  %v10800_v42 = vsub.f32 %v28_v55, %v2506_v51  ;;  %v2515_v30 = vand.u32 4294901760, %v31_v5 }
 0x29e   :  { %1895 = vmatmul.mubr.f32.vlgmr.msra.gmra.mrb[2].mxu0 %v10379_v28  ;;  %12432 = vst [vmem:[#allocation11_spill] sm:$0xff] %v10713_v36  ;;  %12442 = vst [vmem:[#allocation34_spill] sm:$0xff] %v10798_v9  ;;  %v10803_v6 = vpack.c.bf16 %v2509_v24, %v2506_v51  ;;  %v10834_v8 = vsub.f32 %v30_v48, %v2512_v11  ;;  %v10852_v24 = vld [vmem:[%s12178_s0 + $0x14] sm:$0xf]  ;;  %v49_v48 = vld [vmem:[%s12181_s3 + $0xe8] sm:$0xff] }
 0x29f   :  { %12427 = vst [vmem:[#allocation18_spill] sm:$0xff] %v10663_v29  ;;  %9085 = vmatprep.subr.bf16.mxu0 %v10663_v29  ;;  %12440 = vst [vmem:[#allocation32_spill] sm:$0xff] %v10768_v57  ;;  %v10816_v47 = vpack.c.bf16 %v10805_v18, %v10800_v42  ;;  %v10832_v31 = vpack.c.bf16 %v2515_v30, %v2512_v11  ;;  %v10836_v55 = vsub.f32 %v31_v5, %v2515_v30 }
 0x2a0   :  { %9087 = vmatpush3.bf16.msra.mxu0 %v10671_v26  ;;  %9027 = vmatpush3.bf16.msra.mxu1 %v10684_v22  ;;  %12443 = vst [vmem:[#allocation35_spill] sm:$0xff] %v10803_v6  ;;  %12446 = vst [vmem:[#allocation38_spill] sm:$0xff] %v10827_v43  ;;  %v2566_v5 = vand.u32 4294901760, %v48_v1  ;;  %v2569_v11 = vand.u32 4294901760, %v49_v48  ;;  %v10869_v30 = vcombine.low %v10852_v24, %v10852_v24 }
 0x2a1   :  { %9089 = vmatprep.subr.bf16.mxu0 %v10699_v0  ;;  %9029 = vmatprep.subr.bf16.mxu1 %v10723_v39  ;;  %12445 = vst [vmem:[#allocation37_spill] sm:$0xff] %v10816_v47  ;;  %12447 = vst [vmem:[#allocation39_spill] sm:$0xff] %v10832_v31  ;;  %v10844_v34 = vpack.c.bf16 %v10836_v55, %v10834_v8 }
 0x2a2   :  { %12449 = vst [vmem:[#allocation41_spill] sm:$0xff] %v10852_v24 }
 0x2a3   :  { %12448 = vst [vmem:[#allocation40_spill] sm:$0xff] %v10844_v34 }
 0x2a4   :  { %9091 = vmatpush3.bf16.msra.mxu0 %v10713_v36  ;;  %9031 = vmatpush3.bf16.msra.mxu1 %v10732_v45  ;;  %v35_v36 = vld [vmem:[%s12181_s3 + $0x78] sm:$0xff] }
 0x2a5   :  { %9093 = vmatprep.subr.bf16.mxu0 %v10742_v56  ;;  %9033 = vmatprep.subr.bf16.mxu1 %v10736_v16  ;;  %v34_v56 = vld [vmem:[%s12181_s3 + $0x70] sm:$0xff]  ;;  %v2527_v29 = vand.u32 4294901760, %v35_v36 }
 0x2a8   :  { %9095 = vmatpush3.bf16.msra.mxu0 %v10749_v35  ;;  %9035 = vmatpush3.bf16.msra.mxu1 %v10757_v14  ;;  %v51_v35 = vld [vmem:[%s12181_s3 + $0xf8] sm:$0xff] }
 0x2a9   :  { %9097 = vmatprep.subr.bf16.mxu0 %v10755_v13  ;;  %9037 = vmatprep.subr.bf16.mxu1 %v10784_v17 }
 0x2ac   :  { %9099 = vmatpush3.bf16.msra.mxu0 %v10768_v57  ;;  %9039 = vmatpush3.bf16.msra.mxu1 %v10803_v6  ;;  %v10884_v57 = vsub.f32 %v49_v48, %v2569_v11  ;;  %v2575_v48 = vand.u32 4294901760, %v51_v35 }
 0x2ad   :  { %9101 = vmatprep.subr.bf16.mxu0 %v10798_v9  ;;  %9041 = vmatprep.subr.bf16.mxu1 %v10807_v23  ;;  %v10882_v9 = vsub.f32 %v48_v1, %v2566_v5 }
 0x2ae   :  { %v10916_v23 = vsub.f32 %v51_v35, %v2575_v48  ;;  %v2709_v35 = vsub.f32 %v10642_v46, %v2708_v60  ;;  %v2799_v45 = vand.u32 4294901760, %v10884_v57 }
 0x2af   :  { %v10901_v0 = vpack.c.bf16 %v10884_v57, %v10882_v9  ;;  %v2792_v16 = vand.u32 4294901760, %v10882_v9 }
 0x2b0   :  { %9103 = vmatpush3.bf16.msra.mxu0 %v10816_v47  ;;  %9043 = vmatpush3.bf16.msra.mxu1 %v10832_v31  ;;  %v10880_v47 = vpack.c.bf16 %v2569_v11, %v2566_v5  ;;  %v2524_v11 = vand.u32 4294901760, %v34_v56  ;;  %v2813_v22 = vand.u32 4294901760, %v10916_v23 }
 0x2b1   :  { %9105 = vmatprep.subr.bf16.mxu0 %v10827_v43  ;;  %v50_v43 = vld [vmem:[%s12181_s3 + $0xf0] sm:$0xff]  ;;  %12451 = vst [vmem:[#allocation43_spill] sm:$0xff] %v10901_v0 }
 0x2b2   :  { %12450 = vst [vmem:[#allocation42_spill] sm:$0xff] %v10880_v47  ;;  %v2572_v5 = vand.u32 4294901760, %v50_v43  ;;  %9045 = vmatprep.subr.bf16.mxu1 %v10880_v47  ;;  %v10918_v6 = vsub.f32 %v34_v56, %v2524_v11  ;;  %v2715_v47 = vand.u32 4294901760, %v10644_v44  ;;  %v10935_v56 = vld [vmem:[%s12178_s0 + $0xc] sm:$0xff] }
 0x2b4   :  { %9107 = vmatpush3.bf16.msra.mxu0 %v10844_v34  ;;  %v33_v34 = vld [vmem:[%s12181_s3 + $0x68] sm:$0xff]  ;;  %v10911_v4 = vpack.c.bf16 %v2575_v48, %v2572_v5  ;;  %v10913_v31 = vsub.f32 %v50_v43, %v2572_v5  ;;  %v2716_v43 = vsub.f32 %v10644_v44, %v2715_v47  ;;  %v10958_v5 = vcombine.high %v10935_v56, %v10935_v56 }
 0x2b5   :  { %v2521_v1 = vand.u32 4294901760, %v33_v34  ;;  %9109 = vmatprep.subr.bf16.mxu0 %v10901_v0  ;;  %v2710_v48 = vand.u32 4294901760, %v2709_v35  ;;  %v2764_v44 = vand.u32 4294901760, %v10786_v25  ;;  %v2652_v35 = vand.u32 4294901760, %v10800_v42 }
 0x2b6   :  { %12453 = vst [vmem:[#allocation45_spill] sm:$0xff] %v10911_v4  ;;  %12459 = vst [vmem:[#allocation51_spill] sm:$0xff] %v10958_v5 }
 0x2b7   :  { %v10909_v28 = vsub.f32 %v33_v34, %v2521_v1  ;;  %v10929_v34 = vpack.c.bf16 %v2527_v29, %v2524_v11  ;;  %v2717_v11 = vand.u32 4294901760, %v2716_v43  ;;  %v2659_v43 = vand.u32 4294901760, %v10805_v18 }
 0x2b9   :  { %12455 = vst [vmem:[#allocation47_spill] sm:$0xff] %v10929_v34  ;;  %v10964_v46 = vpack.c.bf16 %v2717_v11, %v2710_v48  ;;  %v10986_v11 = vpack.c.bf16 %v2659_v43, %v2652_v35  ;;  %v2660_v17 = vsub.f32 %v10805_v18, %v2659_v43  ;;  %v11014_v18 = vpack.c.bf16 %v2799_v45, %v2792_v16 }
 0x2bb   :  { %12460 = vst [vmem:[#allocation52_spill] sm:$0xff] %v10964_v46  ;;  %12462 = vst [vmem:[#allocation54_spill] sm:$0xff] %v10986_v11 }
 0x2bc   :  { %12466 = vst [vmem:[#allocation58_spill] sm:$0xff] %v11014_v18 }
 0x36e   :  { %v10838_v59 = vpop.f32.mrb[4].mxu1 }
 0x36f   :  { %2445 = vrot.lane.b32.xlu0 %v10838_v59, %s9892_s19  ;;  %v8461_v51 = vpop.f32.mrb[5].mxu1 }
 0x370   :  { %v32_v51 = vld [vmem:[%s12181_s3 + $0x60] sm:$0xff] }
 0x371   :  { %v10847_v52 = vpop.f32.mrb[2].mxu0  ;;  %v2518_v13 = vand.u32 4294901760, %v32_v51 }
 0x372   :  { %2441 = vrot.lane.b32.xlu1 %v10847_v52, %s9892_s19  ;;  %v10857_v63 = vpop.f32.mrb[3].mxu0 }
 0x373   :  { %2457 = vrot.lane.b32.xlu0 %v10857_v63, %s9893_s20  ;;  %v10903_v26 = vsub.f32 %v32_v51, %v2518_v13  ;;  %v10907_v50 = vpack.c.bf16 %v2521_v1, %v2518_v13  ;;  %v10920_v51 = vsub.f32 %v35_v36, %v2527_v29  ;;  %v10941_v36 = vpack.c.bf16 %v10916_v23, %v10913_v31 }
 0x374   :  { %v10952_v1 = vpack.c.bf16 %v2715_v47, %v2708_v60  ;;  %v10976_v60 = vcombine.low %v10935_v56, %v10935_v56  ;;  %v2771_v47 = vand.u32 4294901760, %v10788_v33 }
 0x375   :  { %12452 = vst [vmem:[#allocation44_spill] sm:$0xff] %v10907_v50  ;;  %v10927_v13 = vpack.c.bf16 %v10909_v28, %v10903_v26  ;;  %9047 = vmatpush3.bf16.msra.mxu1 %v10907_v50  ;;  %12456 = vst [vmem:[#allocation48_spill] sm:$0xff] %v10941_v36  ;;  %v10947_v29 = vpack.c.bf16 %v10920_v51, %v10918_v6  ;;  %v2653_v50 = vsub.f32 %v10800_v42, %v2652_v35 }
 0x376   :  { %2443 = vrot.lane.b32.xlu1 %v10857_v63, %s9892_s19  ;;  %9049 = vmatprep.subr.bf16.mxu1 %v10911_v4  ;;  %12458 = vst [vmem:[#allocation50_spill] sm:$0xff] %v10952_v1  ;;  %v10984_v48 = vpack.c.bf16 %v2771_v47, %v2764_v44  ;;  %v2687_v42 = vand.u32 4294901760, %v10909_v28 }
 0x377   :  { %2455 = vrot.lane.b32.xlu0 %v10847_v52, %s9893_s20  ;;  %12454 = vst [vmem:[#allocation46_spill] sm:$0xff] %v10927_v13  ;;  %9111 = vmatpush3.bf16.msra.mxu0 %v10927_v13  ;;  %12457 = vst [vmem:[#allocation49_spill] sm:$0xff] %v10947_v29  ;;  %v2673_v13 = vand.u32 4294901760, %v10836_v55 }
 0x378   :  { %9113 = vmatprep.subr.bf16.mxu0 %v10941_v36  ;;  %12461 = vst [vmem:[#allocation53_spill] sm:$0xff] %v10984_v48  ;;  %v2666_v36 = vand.u32 4294901760, %v10834_v8 }
 0x379   :  { %9051 = vmatpush3.bf16.msra.mxu1 %v10929_v34  ;;  %v2772_v34 = vsub.f32 %v10788_v33, %v2771_v47  ;;  %v2661_v33 = vand.u32 4294901760, %v2660_v17 }
 0x37a   :  { %2459 = vrot.lane.b32.xlu1 %v10838_v59, %s9893_s20  ;;  %9053 = vmatprep.subr.bf16.mxu1 %v10964_v46  ;;  %v2765_v46 = vsub.f32 %v10786_v25, %v2764_v44  ;;  %v11000_v4 = vpack.c.bf16 %v2673_v13, %v2666_v36  ;;  %v2654_v25 = vand.u32 4294901760, %v2653_v50  ;;  %v2680_v44 = vand.u32 4294901760, %v10903_v26 }
 0x37b   :  { %3869 = vrot.lane.b32.xlu0 %v10869_v30, %s9892_s19  ;;  %9115 = vmatpush3.bf16.msra.mxu0 %v10947_v29  ;;  %v2785_v29 = vand.u32 4294901760, %v10812_v12  ;;  %v2773_v14 = vand.u32 4294901760, %v2772_v34  ;;  %v2667_v39 = vsub.f32 %v10834_v8, %v2666_v36  ;;  %v2674_v50 = vsub.f32 %v10836_v55, %v2673_v13 }
 0x37c   :  { %9149 = vmatprep.subr.bf16.mxu0 %v10952_v1  ;;  %v2778_v1 = vand.u32 4294901760, %v10809_v41  ;;  %12464 = vst [vmem:[#allocation56_spill] sm:$0xff] %v11000_v4  ;;  %v11018_v35 = vpack.c.bf16 %v2661_v33, %v2654_v25  ;;  %v11020_v43 = vpack.c.bf16 %v2687_v42, %v2680_v44  ;;  %v2701_v8 = vand.u32 4294901760, %v10920_v51 }
 0x37d   :  { %v2786_v34 = vsub.f32 %v10812_v12, %v2785_v29  ;;  %v2675_v12 = vand.u32 4294901760, %v2674_v50  ;;  %v2793_v13 = vsub.f32 %v10882_v9, %v2792_v16  ;;  %v2814_v16 = vsub.f32 %v10916_v23, %v2813_v22 }
 0x37e   :  { %3867 = vrot.lane.b32.xlu1 %v10935_v56, %s9892_s19  ;;  %v10996_v0 = vpack.c.bf16 %v2785_v29, %v2778_v1  ;;  %12467 = vst [vmem:[#allocation59_spill] sm:$0xff] %v11018_v35  ;;  %12468 = vst [vmem:[#allocation60_spill] sm:$0xff] %v11020_v43  ;;  %v2694_v29 = vand.u32 4294901760, %v10918_v6  ;;  %v2702_v9 = vsub.f32 %v10920_v51, %v2701_v8 }
 0x37f   :  { %3880 = vrot.lane.b32.xlu0 %v10852_v24, %s9893_s20 }
 0x380   :  { %12463 = vst [vmem:[#allocation55_spill] sm:$0xff] %v10996_v0  ;;  %v11040_v33 = vpack.c.bf16 %v2701_v8, %v2694_v29 }
 0x382   :  { %3878 = vrot.lane.b32.xlu1 %v10958_v5, %s9893_s20  ;;  %12472 = vst [vmem:[#allocation64_spill] sm:$0xff] %v11040_v33 }
 0x383   :  { %3891 = vrot.lane.b32.xlu0 %v10869_v30, %s9894_s21 }
 0x386   :  { %3889 = vrot.lane.b32.xlu1 %v10935_v56, %s9894_s21 }
 0x387   :  { %3876 = vrot.lane.b32.xlu0 %v10935_v56, %s9893_s20 }
 0x38a   :  { %3865 = vrot.lane.b32.xlu1 %v10976_v60, %s9892_s19 }
 0x38b   :  { %3900 = vrot.lane.b32.xlu0 %v10958_v5, %s9895_s22  ;;  %v2766_v5 = vand.u32 4294901760, %v2765_v46  ;;  %v2779_v46 = vsub.f32 %v10809_v41, %v2778_v1  ;;  %v2668_v41 = vand.u32 4294901760, %v2667_v39  ;;  %v2800_v1 = vsub.f32 %v10884_v57, %v2799_v45 }
 0x38c   :  { %v2688_v39 = vsub.f32 %v10909_v28, %v2687_v42  ;;  %v2695_v57 = vsub.f32 %v10918_v6, %v2694_v29  ;;  %v2703_v42 = vand.u32 4294901760, %v2702_v9 }
 0x38d   :  { %v11012_v47 = vpack.c.bf16 %v2773_v14, %v2766_v5  ;;  %v2780_v17 = vand.u32 4294901760, %v2779_v46  ;;  %v2787_v14 = vand.u32 4294901760, %v2786_v34  ;;  %v2806_v5 = vand.u32 4294901760, %v10913_v31 }
 0x38e   :  { %3887 = vrot.lane.b32.xlu1 %v10976_v60, %s9894_s21  ;;  %v11038_v25 = vpack.c.bf16 %v2675_v12, %v2668_v41  ;;  %v2681_v46 = vsub.f32 %v10903_v26, %v2680_v44  ;;  %v2794_v34 = vand.u32 4294901760, %v2793_v13  ;;  %v2801_v50 = vand.u32 4294901760, %v2800_v1 }
 0x38f   :  { %3911 = vrot.lane.b32.xlu0 %v10935_v56, %s9897_s23  ;;  %12465 = vst [vmem:[#allocation57_spill] sm:$0xff] %v11012_v47  ;;  %v11032_v36 = vpack.c.bf16 %v2787_v14, %v2780_v17  ;;  %v11034_v55 = vpack.c.bf16 %v2813_v22, %v2806_v5  ;;  %v2689_v14 = vand.u32 4294901760, %v2688_v39  ;;  %v2815_v44 = vand.u32 4294901760, %v2814_v16 }
 0x390   :  { %12471 = vst [vmem:[#allocation63_spill] sm:$0xff] %v11038_v25  ;;  %v2682_v17 = vand.u32 4294901760, %v2681_v46  ;;  %v11048_v45 = vpack.c.bf16 %v2801_v50, %v2794_v34  ;;  %v2596_v46 = vand.u32 4294901760, %v10646_v27  ;;  %v2603_v39 = vand.u32 4294901760, %v10650_v20 }
 0x391   :  { %12469 = vst [vmem:[#allocation61_spill] sm:$0xff] %v11032_v36  ;;  %12470 = vst [vmem:[#allocation62_spill] sm:$0xff] %v11034_v55  ;;  %v2722_v50 = vand.u32 4294901760, %v10677_v38 }
 0x392   :  { %3902 = vrot.lane.b32.xlu1 %v10852_v24, %s9895_s22  ;;  %v2807_v24 = vsub.f32 %v10913_v31, %v2806_v5  ;;  %12473 = vst [vmem:[#allocation65_spill] sm:$0xff] %v11048_v45  ;;  %v11052_v26 = vpack.c.bf16 %v2689_v14, %v2682_v17  ;;  %v2729_v17 = vand.u32 4294901760, %v10679_v58  ;;  %v2597_v16 = vsub.f32 %v10646_v27, %v2596_v46 }
 0x393   :  { %3898 = vrot.lane.b32.xlu0 %v10935_v56, %s9895_s22  ;;  %v2736_v27 = vand.u32 4294901760, %v10725_v40 }
 0x394   :  { %12474 = vst [vmem:[#allocation66_spill] sm:$0xff] %v11052_v26  ;;  %v2808_v28 = vand.u32 4294901760, %v2807_v24  ;;  %v2730_v9 = vsub.f32 %v10679_v58, %v2729_v17 }
 0x396   :  { %3913 = vrot.lane.b32.xlu1 %v10869_v30, %s9897_s23  ;;  %v2696_v30 = vand.u32 4294901760, %v2695_v57  ;;  %v11056_v41 = vpack.c.bf16 %v2815_v44, %v2808_v28  ;;  %v2723_v57 = vsub.f32 %v10677_v38, %v2722_v50 }
 0x398   :  { %12475 = vst [vmem:[#allocation67_spill] sm:$0xff] %v11056_v41  ;;  %v11058_v31 = vpack.c.bf16 %v2703_v42, %v2696_v30  ;;  %v2610_v30 = vand.u32 4294901760, %v10681_v19  ;;  %v2617_v42 = vand.u32 4294901760, %v10686_v7 }
 0x39a   :  { %3909 = vrot.lane.b32.xlu1 %v10976_v60, %s9897_s23  ;;  %12476 = vst [vmem:[#allocation68_spill] sm:$0xff] %v11058_v31 }
 0x3e1   :  { %v11060_v22 = vpop.permute.xlu0 %2445 }
 0x3e4   :  { %v2442_v23 = vpop.permute.xlu1 %2441 }
 0x3e5   :  { %v2458_v5 = vpop.permute.xlu0 %2457 }
 0x3e8   :  { %v2444_v6 = vpop.permute.xlu1 %2443 }
 0x3e9   :  { %v2447_v51 = vsel %vm72_vm0, %v2442_v23, %v2444_v6  ;;  %v2448_v24 = vsel %vm72_vm0, %v2444_v6, %v11060_v22  ;;  %v2456_v12 = vpop.permute.xlu0 %2455  ;;  %v11089_v23 = vpack.c.bf16 %v2603_v39, %v2596_v46  ;;  %v2598_v6 = vand.u32 4294901760, %v2597_v16 }
 0x3ea   :  { %v2452_v29 = vmax.f32 %v10847_v52, %v2447_v51  ;;  %v2461_v60 = vsel %vm84_vm2, %v2456_v12, %v2458_v5  ;;  %v2453_v8 = vmax.f32 %v10857_v63, %v2448_v24  ;;  %v2604_v63 = vsub.f32 %v10650_v20, %v2603_v39 }
 0x3eb   :  { %12477 = vst [vmem:[#allocation69_spill] sm:$0xff] %v11089_v23  ;;  %v2743_v20 = vand.u32 4294901760, %v10727_v21  ;;  %v2724_v24 = vand.u32 4294901760, %v2723_v57  ;;  %v2731_v12 = vand.u32 4294901760, %v2730_v9  ;;  %v2737_v46 = vsub.f32 %v10725_v40, %v2736_v27 }
 0x3ec   :  { %v2466_v13 = vmax.f32 %v2452_v29, %v2461_v60  ;;  %v11068_v1 = vpop.permute.xlu1 %2459  ;;  %v2605_v51 = vand.u32 4294901760, %v2604_v63  ;;  %v2611_v29 = vsub.f32 %v10681_v19, %v2610_v30  ;;  %v2618_v60 = vsub.f32 %v10686_v7, %v2617_v42 }
 0x3ed   :  { %v2462_v34 = vsel %vm84_vm2, %v2458_v5, %v11068_v1  ;;  %v11091_v5 = vpack.c.bf16 %v2729_v17, %v2722_v50  ;;  %v2631_v19 = vand.u32 4294901760, %v10734_v53  ;;  %v2744_v7 = vsub.f32 %v10727_v21, %v2743_v20 }
 0x3ee   :  { %v11076_v14 = vand.u32 4294901760, %v2466_v13  ;;  %v2467_v52 = vmax.f32 %v2453_v8, %v2462_v34  ;;  %v11102_v8 = vpack.c.bf16 %v2617_v42, %v2610_v30  ;;  %v2624_v34 = vand.u32 4294901760, %v10729_v37 }
 0x3ef   :  { %12478 = vst [vmem:[#allocation70_spill] sm:$0xff] %v11091_v5  ;;  %v11118_v50 = vpack.c.bf16 %v2605_v51, %v2598_v6  ;;  %v11120_v17 = vpack.c.bf16 %v2743_v20, %v2736_v27  ;;  %v11124_v16 = vpack.c.bf16 %v2731_v12, %v2724_v24  ;;  %v2612_v63 = vand.u32 4294901760, %v2611_v29 }
 0x3f0   :  { %v11083_v28 = vsub.f32 %v2466_v13, %v11076_v14  ;;  %v11085_v44 = vand.u32 4294901760, %v2467_v52  ;;  %12479 = vst [vmem:[#allocation71_spill] sm:$0xff] %v11102_v8  ;;  %v2619_v21 = vand.u32 4294901760, %v2618_v60  ;;  %v2757_v57 = vand.u32 4294901760, %v10744_v3 }
 0x3f1   :  { %12480 = vst [vmem:[#allocation72_spill] sm:$0xff] %v11118_v50  ;;  %12481 = vst [vmem:[#allocation73_spill] sm:$0xff] %v11120_v17  ;;  %v2738_v30 = vand.u32 4294901760, %v2737_v46  ;;  %v2625_v42 = vsub.f32 %v10729_v37, %v2624_v34  ;;  %v2745_v51 = vand.u32 4294901760, %v2744_v7  ;;  %v11132_v24 = vpack.c.bf16 %v2631_v19, %v2624_v34 }
 0x3f2   :  { %v12279_v38 = vand.u32 4294901760, %v11083_v28  ;;  %v11097_v58 = vsub.f32 %v2467_v52, %v11085_v44  ;;  %v2750_v52 = vand.u32 4294901760, %v10738_v54  ;;  %12482 = vst [vmem:[#allocation74_spill] sm:$0xff] %v11124_v16  ;;  %v2758_v20 = vsub.f32 %v10744_v3, %v2757_v57 }
 0x3f3   :  { %12483 = vst [vmem:[#allocation75_spill] sm:$0xff] %v11132_v24  ;;  %v2638_v12 = vand.u32 4294901760, %v10759_v49  ;;  %v2645_v29 = vand.u32 4294901760, %v10761_v61  ;;  %v11137_v37 = vpack.c.bf16 %v2619_v21, %v2612_v63  ;;  %v2454_v63 = vmax.f32 %v10838_v59, %v11060_v22 }
 0x3f4   :  { %2955 = vmatprep.mubr.f32.mxu0 %v11097_v58  ;;  %v12282_v13 = vand.u32 4294901760, %v11097_v58  ;;  %v2586_v39 = vsub.f32 %v11083_v28, %v12279_v38  ;;  %v2632_v38 = vsub.f32 %v10734_v53, %v2631_v19  ;;  %v2751_v27 = vsub.f32 %v10738_v54, %v2750_v52 }
 0x3f5   :  { %2958 = vmatmul.mubr.f32.vlgmr.msra.gmra.mrb[4].mxu0 %v11083_v28  ;;  %12484 = vst [vmem:[#allocation76_spill] sm:$0xff] %v11137_v37  ;;  %v11139_v53 = vpack.c.bf16 %v2757_v57, %v2750_v52  ;;  %v2626_v54 = vand.u32 4294901760, %v2625_v42  ;;  %v2639_v60 = vsub.f32 %v10759_v49, %v2638_v12  ;;  %v2646_v46 = vsub.f32 %v10761_v61, %v2645_v29  ;;  %v52_v57 = vld [vmem:[%s12181_s3 + $0x100] sm:$0xff]  ;;  %v55_v42 = vld [vmem:[%s12181_s3 + $0x118] sm:$0xff] }
 0x3f6   :  { %9151 = vmatpush3.bf16.msra.mxu0 %v11089_v23  ;;  %3232 = vmatprep.mubr.f32.mxu0 %v11085_v44  ;;  %v2580_v40 = vsub.f32 %v11097_v58, %v12282_v13  ;;  %v2587_v6 = vand.u32 4294901760, %v2586_v39  ;;  %v2633_v3 = vand.u32 4294901760, %v2632_v38  ;;  %v11146_v39 = vpack.c.bf16 %v2745_v51, %v2738_v30  ;;  %v54_v30 = vld [vmem:[%s12181_s3 + $0x110] sm:$0xff] }
 0x3f7   :  { %9153 = vmatprep.subr.bf16.mxu0 %v11091_v5  ;;  %12485 = vst [vmem:[#allocation77_spill] sm:$0xff] %v11139_v53  ;;  %v2752_v34 = vand.u32 4294901760, %v2751_v27  ;;  %v2759_v19 = vand.u32 4294901760, %v2758_v20  ;;  %v11149_v7 = vpack.c.bf16 %v2645_v29, %v2638_v12  ;;  %v2640_v38 = vand.u32 4294901760, %v2639_v60  ;;  %v57_v27 = vld [vmem:[%s12181_s3 + $0x128] sm:$0x3f] }
 0x3f8   :  { %v2581_v9 = vand.u32 4294901760, %v2580_v40  ;;  %12486 = vst [vmem:[#allocation78_spill] sm:$0xff] %v11146_v39  ;;  %v11153_v40 = vpack.c.bf16 %v2633_v3, %v2626_v54  ;;  %v2647_v49 = vand.u32 4294901760, %v2646_v46  ;;  %v2468_v21 = vmax.f32 %v2454_v63, %v11068_v1  ;;  %v56_v54 = vld [vmem:[%s12181_s3 + $0x120] sm:$0xff] }
 0x3f9   :  { %12487 = vst [vmem:[#allocation79_spill] sm:$0xff] %v11149_v7  ;;  %v11156_v61 = vpack.c.bf16 %v2759_v19, %v2752_v34  ;;  %v3344_v59 = vand.u32 4294901760, %v52_v57  ;;  %v3350_v12 = vand.u32 4294901760, %v54_v30  ;;  %v3353_v29 = vand.u32 4294901760, %v55_v42 }
 0x3fa   :  { %9155 = vmatpush3.bf16.msra.mxu0 %v11102_v8  ;;  %2582 = vmatprep.mubr.f32.mxu1 %v2581_v9  ;;  %12488 = vst [vmem:[#allocation80_spill] sm:$0xff] %v11153_v40  ;;  %v11161_v52 = vpack.c.bf16 %v2647_v49, %v2640_v38  ;;  %v53_v9 = vld [vmem:[%s12181_s3 + $0x108] sm:$0xff]  ;;  %v2475_v1 = vsel %vm2473_vm13, %v2468_v21, 0  ;;  %v2479_v3 = vsel %vm2477_vm14, %v57_v27, 0  ;;  %v3356_v63 = vand.u32 4294901760, %v56_v54 }
 0x3fb   :  { %2588 = vmatmul.mubr.f32.vlgmr.msra.gmra.mrb[6].mxu1 %v2587_v6  ;;  %9157 = vmatprep.subr.bf16.mxu0 %v11120_v17  ;;  %12489 = vst [vmem:[#allocation81_spill] sm:$0xff] %v11156_v61  ;;  %v3347_v22 = vand.u32 4294901760, %v53_v9  ;;  %v11188_v6 = vsub.f32 %v52_v57, %v3344_v59  ;;  %v11196_v20 = vand.u32 4294901760, %v2475_v1  ;;  %v11209_v19 = vsub.f32 %v54_v30, %v3350_v12 }
 0x3fc   :  { %9055 = vmatpush3.bf16.msra.mxu1 %v11118_v50  ;;  %2818 = vmatprep.mubr.f32.mxu1 %v11085_v44  ;;  %12490 = vst [vmem:[#allocation82_spill] sm:$0xff] %v11161_v52  ;;  %v11211_v38 = vsub.f32 %v55_v42, %v3353_v29  ;;  %v3359_v21 = vand.u32 4294901760, %v2479_v3  ;;  %v11220_v57 = vpack.c.bf16 %v3353_v29, %v3350_v12 }
 0x3fd   :  { %9057 = vmatprep.subr.bf16.mxu1 %v11124_v16  ;;  %v11190_v51 = vsub.f32 %v53_v9, %v3347_v22  ;;  %v12281_v60 = vand.u32 4294901760, %v11188_v6  ;;  %v11207_v34 = vpack.c.bf16 %v3347_v22, %v3344_v59  ;;  %v11214_v49 = vsub.f32 %v2475_v1, %v11196_v20 }
 0x3fe   :  { %9159 = vmatpush3.bf16.msra.mxu0 %v11132_v24  ;;  %12492 = vst [vmem:[#allocation84_spill] sm:$0xff] %v11220_v57  ;;  %v12284_v22 = vand.u32 4294901760, %v11209_v19  ;;  %v12283_v1 = vand.u32 4294901760, %v11211_v38  ;;  %v11233_v30 = vsub.f32 %v56_v54, %v3356_v63  ;;  %v11235_v42 = vsub.f32 %v2479_v3, %v3359_v21 }
 0x3ff   :  { %9161 = vmatprep.subr.bf16.mxu0 %v11139_v53  ;;  %v12280_v46 = vand.u32 4294901760, %v11190_v51  ;;  %12491 = vst [vmem:[#allocation83_spill] sm:$0xff] %v11207_v34  ;;  %v3428_v9 = vsub.f32 %v11188_v6, %v12281_v60  ;;  %v12285_v27 = vand.u32 4294901760, %v11214_v49  ;;  %v11241_v12 = vpack.c.bf16 %v3359_v21, %v3356_v63 }
 0x400   :  { %9059 = vmatpush3.bf16.msra.mxu1 %v11137_v37  ;;  %v3442_v54 = vsub.f32 %v11209_v19, %v12284_v22  ;;  %v3449_v3 = vsub.f32 %v11211_v38, %v12283_v1  ;;  %v12288_v60 = vand.u32 4294901760, %v11233_v30  ;;  %v12287_v13 = vand.u32 4294901760, %v11235_v42 }
 0x401   :  { %9061 = vmatprep.subr.bf16.mxu1 %v11146_v39  ;;  %v3435_v59 = vsub.f32 %v11190_v51, %v12280_v46  ;;  %12493 = vst [vmem:[#allocation85_spill] sm:$0xff] %v11241_v12  ;;  %v3429_v29 = vand.u32 4294901760, %v3428_v9  ;;  %v3417_v63 = vsub.f32 %v11214_v49, %v12285_v27  ;;  %v12494_v21 = vand.u32 4294901760, %v11097_v58  ;;  %v12496_v58 = vld [vmem:[#allocation9_spill] sm:$0xff] }
 0x402   :  { %9163 = vmatpush3.bf16.msra.mxu0 %v11149_v7  ;;  %v3450_v1 = vand.u32 4294901760, %v3449_v3  ;;  %v3456_v22 = vsub.f32 %v11233_v30, %v12288_v60  ;;  %v3463_v27 = vsub.f32 %v11235_v42, %v12287_v13  ;;  %v12500_v13 = vld [vmem:[#allocation27_spill] sm:$0xff]  ;;  %v11294_v60 = vpack.c.bf16 %v11190_v51, %v11188_v6 }
 0x403   :  { %9165 = vmatprep.subr.bf16.mxu0 %v10984_v48  ;;  %v3436_v46 = vand.u32 4294901760, %v3435_v59  ;;  %v3443_v59 = vand.u32 4294901760, %v3442_v54  ;;  %v12513_v48 = vld [vmem:[#allocation47_spill] sm:$0xff]  ;;  %v12514_v53 = vand.u32 4294901760, %v11083_v28  ;;  %v12515_v28 = vand.u32 4294901760, %v11188_v6 }
 0x404   :  { %9063 = vmatpush3.bf16.msra.mxu1 %v11153_v40  ;;  %v3457_v54 = vand.u32 4294901760, %v3456_v22  ;;  %v3464_v3 = vand.u32 4294901760, %v3463_v27  ;;  %v12503_v22 = vld [vmem:[#allocation33_spill] sm:$0xff]  ;;  %v11289_v27 = vpop.permute.xlu0 %3869  ;;  %12504 = vst [vmem:[#allocation89_spill] sm:$0xff] %v11294_v60  ;;  %v12518_v17 = vand.u32 4294901760, %v11209_v19  ;;  %v12519_v8 = vand.u32 4294901760, %v11211_v38 }
 0x405   :  { %9065 = vmatprep.subr.bf16.mxu1 %v11156_v61  ;;  %v11261_v9 = vpack.c.bf16 %v3436_v46, %v3429_v29  ;;  %v12497_v46 = vld [vmem:[#allocation25_spill] sm:$0xff]  ;;  %v11274_v29 = vpack.c.bf16 %v3450_v1, %v3443_v59  ;;  %v12502_v1 = vld [vmem:[#allocation31_spill] sm:$0xff] }
 0x406   :  { %9167 = vmatpush3.bf16.msra.mxu0 %v10986_v11  ;;  %v12512_v11 = vld [vmem:[#allocation45_spill] sm:$0xff]  ;;  %v11355_v5 = vpack.c.bf16 %v12519_v8, %v12518_v17 }
 0x407   :  { %9169 = vmatprep.subr.bf16.mxu0 %v10996_v0  ;;  %12495 = vst [vmem:[#allocation86_spill] sm:$0xff] %v11261_v9  ;;  %12498 = vst [vmem:[#allocation87_spill] sm:$0xff] %v11274_v29 }
 0x408   :  { %9067 = vmatpush3.bf16.msra.mxu1 %v11161_v52  ;;  %12520 = vst [vmem:[#allocation93_spill] sm:$0xff] %v11355_v5 }
 0x409   :  { %9069 = vmatprep.subr.bf16.mxu1 %v11012_v47 }
 0x40a   :  { %9171 = vmatpush3.bf16.msra.mxu0 %v11000_v4 }
 0x40b   :  { %9173 = vmatprep.subr.bf16.mxu0 %v11014_v18  ;;  %v12511_v18 = vld [vmem:[#allocation44_spill] sm:$0xff] }
 0x40c   :  { %9071 = vmatpush3.bf16.msra.mxu1 %v11018_v35 }
 0x40d   :  { %9073 = vmatprep.subr.bf16.mxu1 %v11032_v36 }
 0x40e   :  { %9175 = vmatpush3.bf16.msra.mxu0 %v11020_v43  ;;  %v12509_v43 = vld [vmem:[#allocation42_spill] sm:$0xff] }
 0x40f   :  { %9177 = vmatprep.subr.bf16.mxu0 %v11034_v55  ;;  %v12508_v55 = vld [vmem:[#allocation39_spill] sm:$0xff] }
 0x410   :  { %9075 = vmatpush3.bf16.msra.mxu1 %v11038_v25 }
 0x411   :  { %9077 = vmatprep.subr.bf16.mxu1 %v11048_v45 }
 0x412   :  { %9179 = vmatpush3.bf16.msra.mxu0 %v11040_v33  ;;  %v3418_v33 = vand.u32 4294901760, %v3417_v63  ;;  %v12499_v63 = vld [vmem:[#allocation26_spill] sm:$0xff] }
 0x413   :  { %9212 = vmatprep.subr.bf16.mxu0 %v12376_v2 }
 0x414   :  { %9079 = vmatpush3.bf16.msra.mxu1 %v11052_v26 }
 0x415   :  { %3234 = vmatmul.mubr.f32.vlgmr.msra.gmra.mrb[6].mxu0 %v11076_v14  ;;  %9081 = vmatprep.subr.bf16.mxu1 %v11056_v41 }
 0x416   :  { %9214 = vmatpush3.bf16.msra.mxu0 %v11207_v34  ;;  %8474 = vmatprep.mubr.msk.f32.mxu0 %vm9900_vm7, %v12395_v15 }
 0x417   :  { %9215 = vmatprep.subr.bf16.mxu0 %v12376_v2 }
 0x418   :  { %9083 = vmatpush3.bf16.msra.mxu1 %v11058_v31 }
 0x419   :  { %9117 = vmatprep.subr.bf16.mxu1 %v10640_v32 }
 0x41a   :  { %9217 = vmatpush3.bf16.msra.mxu0 %v11220_v57 }
 0x41b   :  { %2820 = vmatmul.mubr.f32.vlgmr.msra.gmra.mrb[8].mxu1 %v11076_v14  ;;  %9218 = vmatprep.subr.bf16.mxu0 %v12376_v2 }
 0x41c   :  { %9119 = vmatpush3.bf16.msra.mxu1 %v10648_v10  ;;  %3062 = vmatprep.mubr.f32.mxu1 %v12494_v21  ;;  %v11279_v21 = vpop.permute.xlu1 %3867 }
 0x41d   :  { %9121 = vmatprep.subr.bf16.mxu1 %v10675_v62  ;;  %v3872_v23 = vsel %vm72_vm0, %v11279_v21, %v11289_v27 }
 0x41e   :  { %9220 = vmatpush3.bf16.msra.mxu0 %v11241_v12 }
 0x41f   :  { %9221 = vmatprep.subr.bf16.mxu0 %v12376_v2 }
 0x420   :  { %9123 = vmatpush3.bf16.msra.mxu1 %v12496_v58  ;;  %v3879_v59 = vpop.permute.xlu1 %3878 }
 0x421   :  { %8475 = vmatmul.mubr.f32.vlgmr.msra.gmra.mrb[8].mxu0 %v3418_v33  ;;  %9125 = vmatprep.subr.bf16.mxu1 %v12497_v46  ;;  %v11284_v33 = vpack.c.bf16 %v3464_v3, %v3457_v54  ;;  %v12506_v54 = vld [vmem:[#allocation36_spill] sm:$0xff]  ;;  %v11303_v3 = vpack.c.bf16 %v11211_v38, %v11209_v19 }
 0x422   :  { %9223 = vmatpush3.bf16.msra.mxu0 %v11261_v9  ;;  %8489 = vmatprep.mubr.msk.f32.mxu0 %vm9900_vm7, %v12395_v15 }
 0x423   :  { %9224 = vmatprep.subr.bf16.mxu0 %v12376_v2  ;;  %12501 = vst [vmem:[#allocation88_spill] sm:$0xff] %v11284_v33  ;;  %12507 = vst [vmem:[#allocation90_spill] sm:$0xff] %v11303_v3 }
 0x424   :  { %9127 = vmatpush3.bf16.msra.mxu1 %v12499_v63  ;;  %v3890_v9 = vpop.permute.xlu1 %3889 }
 0x425   :  { %9129 = vmatprep.subr.bf16.mxu1 %v12500_v13 }
 0x426   :  { %9226 = vmatpush3.bf16.msra.mxu0 %v11274_v29  ;;  %v12505_v29 = vld [vmem:[#allocation35_spill] sm:$0xff] }
 0x427   :  { %9227 = vmatprep.subr.bf16.mxu0 %v12376_v2 }
 0x428   :  { %9131 = vmatpush3.bf16.msra.mxu1 %v12502_v1  ;;  %v3866_v0 = vpop.permute.xlu1 %3865 }
 0x429   :  { %9133 = vmatprep.subr.bf16.mxu1 %v12503_v22  ;;  %v3871_v8 = vsel %vm72_vm0, %v3866_v0, %v11279_v21 }
 0x42a   :  { %9229 = vmatpush3.bf16.msra.mxu0 %v11284_v33  ;;  %v11307_v33 = vpop.permute.xlu0 %3880  ;;  %v3920_v0 = vsel %vm126_vm1, %v10935_v56, %v3871_v8 }
 0x42b   :  { %9230 = vmatprep.subr.bf16.mxu0 %v12376_v2  ;;  %v3883_v6 = vsel %vm84_vm2, %v3879_v59, %v11307_v33 }
 0x42c   :  { %9135 = vmatpush3.bf16.msra.mxu1 %v12505_v29  ;;  %v3888_v7 = vpop.permute.xlu1 %3887 }
 0x42d   :  { %8490 = vmatmul.mubr.f32.vlgmr.msra.gmra.mrb[8].mxu0 %v11196_v20  ;;  %9137 = vmatprep.subr.bf16.mxu1 %v12506_v54  ;;  %v3893_v38 = vsel %vm96_vm3, %v3888_v7, %v3890_v9  ;;  %v12523_v7 = vand.u32 4294901760, %v11233_v30 }
 0x42e   :  { %9232 = vmatpush3.bf16.msra.mxu0 %v11294_v60  ;;  %8504 = vmatprep.mubr.msk.f32.mxu0 %vm9900_vm7, %v12395_v15  ;;  %v11315_v60 = vpack.c.bf16 %v11235_v42, %v11233_v30  ;;  %v11319_v4 = vpop.permute.xlu0 %3891 }
 0x42f   :  { %9233 = vmatprep.subr.bf16.mxu0 %v12376_v2 }
 0x430   :  { %9139 = vmatpush3.bf16.msra.mxu1 %v12508_v55  ;;  %12510 = vst [vmem:[#allocation91_spill] sm:$0xff] %v11315_v60  ;;  %v11338_v24 = vpop.permute.xlu1 %3902 }
 0x431   :  { %9141 = vmatprep.subr.bf16.mxu1 %v12509_v43 }
 0x432   :  { %9235 = vmatpush3.bf16.msra.mxu0 %v11303_v3  ;;  %v3877_v3 = vpop.permute.xlu0 %3876 }
 0x433   :  { %9236 = vmatprep.subr.bf16.mxu0 %v12376_v2  ;;  %v3882_v17 = vsel %vm84_vm2, %v3877_v3, %v3879_v59 }
 0x434   :  { %9143 = vmatpush3.bf16.msra.mxu1 %v12511_v18  ;;  %v3923_v21 = vsel %vm126_vm1, %v3882_v17, %v3893_v38  ;;  %v3931_v17 = vand.u32 4294901760, %v3920_v0 }
 0x435   :  { %9145 = vmatprep.subr.bf16.mxu1 %v12512_v11  ;;  %v3935_v38 = vand.u32 4294901760, %v3923_v21 }
 0x436   :  { %9238 = vmatpush3.bf16.msra.mxu0 %v11315_v60  ;;  %v3901_v60 = vpop.permute.xlu0 %3900 }
 0x437   :  { %9239 = vmatprep.subr.bf16.mxu0 %v12376_v2  ;;  %v11410_v41 = vsub.f32 %v3923_v21, %v3935_v38 }
 0x438   :  { %9147 = vmatpush3.bf16.msra.mxu1 %v12513_v48 }
 0x439   :  { %8505 = vmatmul.mubr.f32.vlgmr.msra.gmra.mrb[8].mxu0 %v11214_v49  ;;  %9181 = vmatprep.subr.bf16.mxu1 %v10640_v32 }
 0x43a   :  { %9241 = vmatpush3.bf16.msra.mxu0 %v11207_v34  ;;  %8519 = vmatprep.mubr.msk.f32.mxu0 %vm9900_vm7, %v12395_v15  ;;  %v3912_v19 = vpop.permute.xlu0 %3911 }
 0x43b   :  { %3066 = vmatmul.mubr.f32.vlgmr.msra.gmra.mrb[10].mxu1 %v12514_v53  ;;  %9242 = vmatprep.subr.bf16.mxu0 %v12376_v2  ;;  %v12516_v53 = vand.u32 4294901760, %v11190_v51  ;;  %v3894_v51 = vsel %vm96_vm3, %v3890_v9, %v11319_v4  ;;  %v12524_v9 = vand.u32 4294901760, %v11235_v42 }
 0x43c   :  { %9183 = vmatpush3.bf16.msra.mxu1 %v10648_v10  ;;  %3336 = vmatprep.mubr.f32.mxu1 %v11085_v44  ;;  %v3924_v31 = vsel %vm126_vm1, %v3883_v6, %v3894_v51  ;;  %v3905_v6 = vsel %vm108_vm5, %v3901_v60, %v11338_v24 }
 0x43d   :  { %9185 = vmatprep.subr.bf16.mxu1 %v10675_v62  ;;  %v11347_v44 = vpack.c.bf16 %v12516_v53, %v12515_v28  ;;  %v12521_v28 = vand.u32 4294901760, %v11214_v49  ;;  %v11367_v53 = vpop.permute.xlu1 %3913  ;;  %v12522_v49 = vld [vmem:[#allocation51_spill] sm:$0xff]  ;;  %v11390_v59 = vpack.c.bf16 %v12524_v9, %v12523_v7  ;;  %v3933_v3 = vand.u32 4294901760, %v3924_v31 }
 0x43e   :  { %9244 = vmatpush3.bf16.msra.mxu0 %v11220_v57  ;;  %v3916_v56 = vsel %vm120_vm6, %v3912_v19, %v11367_v53  ;;  %v3899_v51 = vpop.permute.xlu0 %3898 }
 0x43f   :  { %9245 = vmatprep.subr.bf16.mxu0 %v12376_v2  ;;  %12517 = vst [vmem:[#allocation92_spill] sm:$0xff] %v11347_v44  ;;  %12525 = vst [vmem:[#allocation51_spill] sm:$0xff] %v11390_v59  ;;  %v3927_v30 = vsel %vm126_vm1, %v3905_v6, %v3916_v56  ;;  %v3904_v42 = vsel %vm108_vm5, %v3899_v51, %v3901_v60 }
 0x440   :  { %9187 = vmatpush3.bf16.msra.mxu1 %v12496_v58  ;;  %v11413_v26 = vand.u32 4294901760, %v3927_v30 }
 0x441   :  { %9189 = vmatprep.subr.bf16.mxu1 %v12497_v46  ;;  %v3910_v8 = vpop.permute.xlu1 %3909 }
 0x442   :  { %9247 = vmatpush3.bf16.msra.mxu0 %v11241_v12  ;;  %v3915_v7 = vsel %vm120_vm6, %v3910_v8, %v3912_v19  ;;  %v11430_v6 = vsub.f32 %v3927_v30, %v11413_v26 }
 0x443   :  { %9248 = vmatprep.subr.bf16.mxu0 %v12376_v2  ;;  %v3926_v60 = vsel %vm126_vm1, %v3904_v42, %v3915_v7 }
 0x444   :  { %9191 = vmatpush3.bf16.msra.mxu1 %v12499_v63  ;;  %v11426_v21 = vand.u32 4294901760, %v3926_v60  ;;  %v11447_v30 = vand.u32 4294901760, %v11430_v6 }
 0x445   :  { %8520 = vmatmul.mubr.f32.vlgmr.msra.gmra.mrb[8].mxu0 %v12521_v28  ;;  %9193 = vmatprep.subr.bf16.mxu1 %v12500_v13  ;;  %v3921_v28 = vsel %vm126_vm1, %v12522_v49, %v3872_v23 }
 0x446   :  { %9250 = vmatpush3.bf16.msra.mxu0 %v11347_v44  ;;  %8534 = vmatprep.mubr.msk.f32.mxu0 %vm9900_vm7, %v12395_v15  ;;  %v3929_v23 = vand.u32 4294901760, %v3921_v28  ;;  %v11408_v44 = vsub.f32 %v3920_v0, %v3931_v17  ;;  %v4031_v0 = vand.u32 4294901760, %v11410_v41  ;;  %12526 = vst [vmem:[#allocation94_spill] sm:$0xff] %v11447_v30 }
 0x447   :  { %9251 = vmatprep.subr.bf16.mxu0 %v12376_v2 }
 0x448   :  { %9195 = vmatpush3.bf16.msra.mxu1 %v12502_v1  ;;  %v11403_v9 = vsub.f32 %v3921_v28, %v3929_v23  ;;  %v4019_v28 = vand.u32 4294901760, %v11408_v44  ;;  %v11435_v56 = vpack.c.bf16 %v3933_v3, %v3929_v23  ;;  %v4032_v7 = vsub.f32 %v11410_v41, %v4031_v0 }
 0x449   :  { %9197 = vmatprep.subr.bf16.mxu1 %v12503_v22  ;;  %v9268_v23 = vpack.c.bf16 %v3935_v38, %v3931_v17  ;;  %v4038_v17 = vsub.f32 %v11430_v6, %v11447_v30 }
 0x44a   :  { %9253 = vmatpush3.bf16.msra.mxu0 %v11355_v5  ;;  %v11405_v5 = vsub.f32 %v3924_v31, %v3933_v3  ;;  %v4013_v31 = vand.u32 4294901760, %v11403_v9  ;;  %v4020_v42 = vsub.f32 %v11408_v44, %v4019_v28 }
 0x44b   :  { %9254 = vmatprep.subr.bf16.mxu0 %v12376_v2 }
 0x44c   :  { %9199 = vmatpush3.bf16.msra.mxu1 %v12505_v29  ;;  %v4025_v19 = vand.u32 4294901760, %v11405_v5  ;;  %v4014_v51 = vsub.f32 %v11403_v9, %v4013_v31 }
 0x44d   :  { %9201 = vmatprep.subr.bf16.mxu1 %v12506_v54 }
 0x44e   :  { %9256 = vmatpush3.bf16.msra.mxu0 %v11390_v59  ;;  %v4026_v8 = vsub.f32 %v11405_v5, %v4025_v19  ;;  %v11442_v59 = vsub.f32 %v3926_v60, %v11426_v21  ;;  %v4015_v3 = vand.u32 4294901760, %v4014_v51  ;;  %v4033_v60 = vand.u32 4294901760, %v4032_v7  ;;  %v12529_v7 = vld [vmem:[#allocation5_spill] sm:$0xff] }
 0x44f   :  { %9257 = vmatprep.subr.bf16.mxu0 %v12376_v2 }
 0x450   :  { %9203 = vmatpush3.bf16.msra.mxu1 %v12508_v55 }
 0x451   :  { %8535 = vmatmul.mubr.f32.vlgmr.msra.gmra.mrb[8].mxu0 %v11196_v20  ;;  %9205 = vmatprep.subr.bf16.mxu1 %v12509_v43 }
 0x452   :  { %9259 = vmatpush3.bf16.msra.mxu0 %v11207_v34  ;;  %8549 = vmatprep.mubr.msk.f32.mxu0 %vm9900_vm7, %v12395_v15  ;;  %v4021_v34 = vand.u32 4294901760, %v4020_v42  ;;  %v11464_v42 = vand.u32 4294901760, %v4038_v17  ;;  %v12532_v17 = vld [vmem:[#allocation7_spill] sm:$0xff] }
 0x453   :  { %9260 = vmatprep.subr.bf16.mxu0 %v12376_v2 }
 0x454   :  { %9207 = vmatpush3.bf16.msra.mxu1 %v12511_v18  ;;  %v9272_v38 = vpack.c.bf16 %v4033_v60, %v4021_v34  ;;  %v9276_v34 = vpack.c.bf16 %v11410_v41, %v11408_v44  ;;  %v12531_v41 = vld [vmem:[#allocation41_spill] sm:$0xff]  ;;  %v9284_v60 = vpack.c.bf16 %v4031_v0, %v4019_v28 }
 0x455   :  { %9209 = vmatprep.subr.bf16.mxu1 %v12512_v11  ;;  %v11453_v11 = vand.u32 4294901760, %v11442_v59  ;;  %v3922_v44 = vsel %vm126_vm1, %v12531_v41, %v11289_v27  ;;  %v3928_v27 = vsel %vm126_vm1, %v11338_v24, %v11367_v53 }
 0x456   :  { %9262 = vmatpush3.bf16.msra.mxu0 %v11220_v57  ;;  %v4027_v57 = vand.u32 4294901760, %v4026_v8  ;;  %v12528_v8 = vld [vmem:[#allocation8_spill] sm:$0xff]  ;;  %v11499_v28 = vand.u32 4294901760, %v3928_v27 }
 0x457   :  { %9263 = vmatprep.subr.bf16.mxu0 %v12376_v2  ;;  %12527 = vst [vmem:[#allocation95_spill] sm:$0xff] %v11453_v11  ;;  %v4044_v51 = vsub.f32 %v11442_v59, %v11453_v11 }
 0x458   :  { %9211 = vmatpush3.bf16.msra.mxu1 %v12513_v48 }
 0x459   :  { %9267 = vmatprep.subr.bf16.mxu1 %v11435_v56 }
 0x45a   :  { %9265 = vmatpush3.bf16.msra.mxu0 %v11241_v12 }
 0x45b   :  { %3338 = vmatmul.mubr.f32.vlgmr.msra.gmra.mrb[12].mxu1 %v11076_v14  ;;  %v9270_v14 = vpack.c.bf16 %v4027_v57, %v4015_v3  ;;  %v9274_v57 = vpack.c.bf16 %v11405_v5, %v11403_v9  ;;  %v12530_v3 = vld [vmem:[#allocation6_spill] sm:$0xff]  ;;  %v9282_v5 = vpack.c.bf16 %v4025_v19, %v4013_v31  ;;  %v3925_v9 = vsel %vm126_vm1, %v11307_v33, %v11319_v4 }
 0x45c   :  { %9269 = vmatpush1.bf16.msra.mxu1 %v9268_v23  ;;  %3999 = vmatprep.mubr.f32.mxu1 %v12395_v15 }
 0x45d   :  { %8550 = vmatmul.mubr.f32.vlgmr.msra.gmra.mrb[8].mxu0 %v11196_v20  ;;  %3938 = vmatprep.subr.mxu1 %v11413_v26  ;;  %v11468_v20 = vand.u32 4294901760, %v4044_v51 }
 0x45e   :  { %5097 = vmatprep.mubr.f32.mxu0 %v12395_v15 }
 0x460   :  { %3940 = vmatpush1.msra.mxu1 %v11426_v21 }
 0x461   :  { %4005 = vmatmul.mubr.f32.vlgmr.msra.gmra.mrb[14].mxu1 %v12528_v8  ;;  %9271 = vmatprep.subr.bf16.mxu1 %v9270_v14  ;;  %v4447_v14 = vand.u32 4294901760, %v3922_v44 }
 0x462   :  { %9273 = vmatpush1.bf16.msra.mxu1 %v9272_v38  ;;  %4105 = vmatprep.mubr.f32.mxu1 %v12395_v15  ;;  %v4450_v38 = vand.u32 4294901760, %v3925_v9 }
 0x463   :  { %4040 = vmatprep.subr.mxu1 %v11464_v42  ;;  %v4526_v31 = vsub.f32 %v3922_v44, %v4447_v14 }
 0x464   :  { %v4533_v19 = vsub.f32 %v3925_v9, %v4450_v38  ;;  %v9291_v24 = vpack.c.bf16 %v4450_v38, %v4447_v14 }
 0x465   :  { %v4527_v4 = vand.u32 4294901760, %v4526_v31 }
 0x466   :  { %4046 = vmatpush1.msra.mxu1 %v11468_v20  ;;  %v4534_v33 = vand.u32 4294901760, %v4533_v19  ;;  %v9297_v44 = vpack.c.bf16 %v4533_v19, %v4526_v31 }
 0x467   :  { %9275 = vmatprep.subr.bf16.mxu1 %v9274_v57  ;;  %v4528_v0 = vsub.f32 %v4526_v31, %v4527_v4  ;;  %v11504_v57 = vsub.f32 %v3928_v27, %v11499_v28 }
 0x468   :  { %v4535_v51 = vsub.f32 %v4533_v19, %v4534_v33 }
 0x469   :  { %4107 = vmatmul.mubr.f32.vlgmr.msra.gmra.mrb[14].mxu1 %v12529_v7  ;;  %v4529_v53 = vand.u32 4294901760, %v4528_v0 }
 0x46a   :  { %9277 = vmatpush1.bf16.msra.mxu1 %v9276_v34  ;;  %4189 = vmatprep.mubr.f32.mxu1 %v12395_v15 }
 0x46b   :  { %4127 = vmatprep.subr.mxu1 %v11430_v6 }
 0x46e   :  { %4130 = vmatpush1.msra.mxu1 %v11442_v59 }
 0x46f   :  { %9279 = vmatprep.subr.bf16.mxu1 %v11435_v56 }
 0x471   :  { %4192 = vmatmul.mubr.f32.vlgmr.msra.gmra.mrb[14].mxu1 %v12530_v3 }
 0x472   :  { %9281 = vmatpush1.bf16.msra.mxu1 %v9268_v23  ;;  %4268 = vmatprep.mubr.f32.mxu1 %v12395_v15 }
 0x473   :  { %4207 = vmatprep.subr.mxu1 %v11413_v26 }
 0x476   :  { %4209 = vmatpush1.msra.mxu1 %v11426_v21 }
 0x477   :  { %9283 = vmatprep.subr.bf16.mxu1 %v9282_v5 }
 0x479   :  { %4272 = vmatmul.mubr.f32.vlgmr.msra.gmra.mrb[14].mxu1 %v12532_v17 }
 0x47a   :  { %9285 = vmatpush1.bf16.msra.mxu1 %v9284_v60  ;;  %4360 = vmatprep.mubr.f32.mxu1 %v12395_v15 }
 0x47b   :  { %4297 = vmatprep.subr.mxu1 %v11447_v30 }
 0x47e   :  { %4301 = vmatpush1.msra.mxu1 %v11453_v11 }
 0x47f   :  { %9287 = vmatprep.subr.bf16.mxu1 %v11435_v56  ;;  %v4536_v56 = vand.u32 4294901760, %v4535_v51 }
 0x481   :  { %4362 = vmatmul.mubr.f32.vlgmr.msra.gmra.mrb[14].mxu1 %v12529_v7  ;;  %v9294_v34 = vpack.c.bf16 %v4536_v56, %v4529_v53 }
 0x482   :  { %9289 = vmatpush1.bf16.msra.mxu1 %v9268_v23  ;;  %4438 = vmatprep.mubr.f32.mxu1 %v12395_v15  ;;  %v11510_v23 = vand.u32 4294901760, %v11504_v57 }
 0x483   :  { %4377 = vmatprep.subr.mxu1 %v11413_v26 }
 0x484   :  { %12533 = vst [vmem:[#allocation8_spill] sm:$0xff] %v11510_v23  ;;  %v4542_v5 = vsub.f32 %v11504_v57, %v11510_v23 }
 0x486   :  { %4379 = vmatpush1.msra.mxu1 %v11426_v21  ;;  %v11523_v41 = vand.u32 4294901760, %v4542_v5 }
 0x487   :  { %9290 = vmatprep.subr.bf16.mxu1 %v12376_v2 }
 0x489   :  { %4440 = vmatmul.mubr.f32.vlgmr.msra.gmra.mrb[14].mxu1 %v12529_v7 }
 0x48a   :  { %9292 = vmatpush3.bf16.msra.mxu1 %v9291_v24  ;;  %8558 = vmatprep.mubr.msk.f32.mxu1 %vm9900_vm7, %v12395_v15 }
 0x48b   :  { %8556 = vmatprep.subr.mxu1 %v12395_v15 }
 0x48e   :  { %8557 = vmatpush3.msra.mxu1 %v11499_v28 }
 0x48f   :  { %8559 = vmatmul.mubr.f32.vlgmr.msra.gmra.mrb[16].mxu1 %v12528_v8  ;;  %9293 = vmatprep.subr.bf16.mxu1 %v12376_v2  ;;  %v9303_v8 = vpack.c.bf16 %v4534_v33, %v4527_v4 }
 0x490   :  { %9295 = vmatpush3.bf16.msra.mxu1 %v9294_v34  ;;  %8567 = vmatprep.mubr.msk.f32.mxu1 %vm9900_vm7, %v12395_v15 }
 0x491   :  { %8565 = vmatprep.subr.mxu1 %v12395_v15 }
 0x494   :  { %8566 = vmatpush3.msra.mxu1 %v11523_v41 }
 0x495   :  { %9296 = vmatprep.subr.bf16.mxu1 %v12376_v2 }
 0x497   :  { %8568 = vmatmul.mubr.f32.vlgmr.msra.gmra.mrb[16].mxu1 %v12529_v7 }
 0x498   :  { %9298 = vmatpush3.bf16.msra.mxu1 %v9297_v44  ;;  %8576 = vmatprep.mubr.msk.f32.mxu1 %vm9900_vm7, %v12395_v15 }
 0x499   :  { %8574 = vmatprep.subr.mxu1 %v12395_v15 }
 0x49c   :  { %8575 = vmatpush3.msra.mxu1 %v11504_v57 }
 0x49d   :  { %9299 = vmatprep.subr.bf16.mxu1 %v12376_v2 }
 0x49f   :  { %8577 = vmatmul.mubr.f32.vlgmr.msra.gmra.mrb[16].mxu1 %v12530_v3 }
 0x4a0   :  { %9301 = vmatpush3.bf16.msra.mxu1 %v9291_v24  ;;  %8585 = vmatprep.mubr.msk.f32.mxu1 %vm9900_vm7, %v12395_v15 }
 0x4a1   :  { %8583 = vmatprep.subr.mxu1 %v12395_v15 }
 0x4a4   :  { %8584 = vmatpush3.msra.mxu1 %v11499_v28 }
 0x4a5   :  { %9302 = vmatprep.subr.bf16.mxu1 %v12376_v2 }
 0x4a7   :  { %8586 = vmatmul.mubr.f32.vlgmr.msra.gmra.mrb[16].mxu1 %v12532_v17 }
 0x4a8   :  { %9304 = vmatpush3.bf16.msra.mxu1 %v9303_v8  ;;  %8594 = vmatprep.mubr.msk.f32.mxu1 %vm9900_vm7, %v12395_v15 }
 0x4a9   :  { %8592 = vmatprep.subr.mxu1 %v12395_v15 }
 0x4ac   :  { %8593 = vmatpush3.msra.mxu1 %v11510_v23 }
 0x4ad   :  { %9305 = vmatprep.subr.bf16.mxu1 %v12376_v2 }
 0x4af   :  { %8595 = vmatmul.mubr.f32.vlgmr.msra.gmra.mrb[16].mxu1 %v12529_v7 }
 0x4b0   :  { %9307 = vmatpush3.bf16.msra.mxu1 %v9291_v24  ;;  %8603 = vmatprep.mubr.msk.f32.mxu1 %vm9900_vm7, %v12395_v15 }
 0x4b1   :  { %8601 = vmatprep.subr.mxu1 %v12395_v15 }
 0x4b4   :  { %8602 = vmatpush3.msra.mxu1 %v11499_v28 }
 0x4b5   :  { %9404 = vmatprep.subr.bf16.mxu1 %v12376_v2 }
 0x4b7   :  { %8604 = vmatmul.mubr.f32.vlgmr.msra.gmra.mrb[16].mxu1 %v12529_v7 }
 0x4b8   :  { %8622 = vmatprep.mubr.msk.f32.mxu1 %vm9900_vm7, %v12395_v15 }
 0x4c8   :  { %v7814_v3 = vpop.f32.mrb[4].mxu0 }
 0x4c9   :  { %v7815_v9 = vpop.f32.mrb[5].mxu0 }
 0x4ca   :  { %v11554_v60 = vadd.f32 %v7815_v9, %v7814_v3  ;;  %v12541_v3 = vld [vmem:[#allocation12_spill] sm:$0xff] }
 0x4cc   :  { %12534 = vst [vmem:[#allocation5_spill] sm:$0xff] %v11554_v60 }
 0x4ce   :  { %v7744_v17 = vpop.f32.mrb[6].mxu1 }
 0x4cf   :  { %v7745_v14 = vpop.f32.mrb[7].mxu1 }
 0x4d0   :  { %v11556_v38 = vadd.f32 %v7745_v14, %v7744_v17 }
 0x4d2   :  { %12535 = vst [vmem:[#allocation6_spill] sm:$0xff] %v11556_v38 }
 0x4e8   :  { %v7884_v31 = vpop.f32.mrb[6].mxu0 }
 0x4e9   :  { %v7885_v19 = vpop.f32.mrb[7].mxu0 }
 0x4ea   :  { %v11558_v27 = vadd.f32 %v7885_v19, %v7884_v31 }
 0x4ec   :  { %12536 = vst [vmem:[#allocation41_spill] sm:$0xff] %v11558_v27  ;;  %v12542_v27 = vld [vmem:[#allocation13_spill] sm:$0xff] }
 0x4ee   :  { %v7779_v4 = vpop.f32.mrb[8].mxu1 }
 0x4ef   :  { %v7780_v33 = vpop.f32.mrb[9].mxu1 }
 0x4f0   :  { %v11560_v0 = vadd.f32 %v7780_v33, %v7779_v4 }
 0x4f2   :  { %12537 = vst [vmem:[#allocation7_spill] sm:$0xff] %v11560_v0 }
 0x50e   :  { %v7849_v7 = vpop.f32.mrb[10].mxu1 }
 0x50f   :  { %v7850_v51 = vpop.f32.mrb[11].mxu1 }
 0x510   :  { %v11562_v24 = vadd.f32 %v7850_v51, %v7849_v7 }
 0x512   :  { %12538 = vst [vmem:[#allocation96_spill] sm:$0xff] %v11562_v24 }
 0x52e   :  { %v7919_v53 = vpop.f32.mrb[12].mxu1 }
 0x52f   :  { %v7920_v56 = vpop.f32.mrb[13].mxu1 }
 0x530   :  { %v11564_v34 = vadd.f32 %v7920_v56, %v7919_v53  ;;  %v11566_v5 = vpop.f32.mrb[8].mxu0 }
 0x531   :  { %12540 = vst [vmem:[#allocation98_spill] sm:$0xff] %v11566_v5  ;;  %v8551_v44 = vpop.f32.mrb[9].mxu0 }
 0x532   :  { %12539 = vst [vmem:[#allocation97_spill] sm:$0xff] %v11564_v34 }
 0x55c   :  { %v4441_v8 = vpop.f32.mrb[14].mxu1 }
 0x55d   :  { %v9728_v9 = vadd.f32 %v4441_v8, %v12541_v3  ;;  %v4443_v17 = vpop.f32.mrb[15].mxu1 }
 0x55e   :  { %v9729_v14 = vadd.f32 %v4443_v17, %v12541_v3 }
 0x55f   :  { %v4921_v31 = vmin.f32 %v9728_v9, 0.0  ;;  %vm4918_vm15 = vcmp.gt.f32.partialorder %v9728_v9, 0.0 }
 0x560   :  { %v4922_v19 = vmin.f32 %v9729_v14, 0.0  ;;  %vm4919_vm4 = vcmp.gt.f32.partialorder %v9729_v14, 0.0 }
 0x561   :  { %v4924_v4 = vmul.f32 1.442695, %v4921_v31  ;;  %v12543_v31 = vld [vmem:[#allocation14_spill] sm:$0xff] }
 0x562   :  { %v4926_v33 = vmul.f32 1.442695, %v4922_v19 }
 0x563   :  { %9859 = vpow2.f32 %v4924_v4 }
 0x564   :  { %9861 = vpow2.f32 %v4926_v33 }
 0x56d   :  { %v9860_v7 = vpop.eup %9859 }
 0x56e   :  { %v9862_v51 = vpop.eup %9861  ;;  %v7631_v12 = vadd.f32 -1.0, %v9860_v7 }
 0x56f   :  { %v7632_v53 = vadd.f32 -1.0, %v9862_v51 }
 0x570   :  { %v4933_v56 = vmul.f32 1.6732632, %v7631_v12 }
 0x571   :  { %v4934_v5 = vmul.f32 1.6732632, %v7632_v53  ;;  %v12544_v53 = vld [vmem:[#allocation15_spill] sm:$0xff] }
 0x572   :  { %v4936_v44 = vsel %vm4918_vm15, %v9728_v9, %v4933_v56 }
 0x573   :  { %v4939_v34 = vmul.f32 1.050701, %v4936_v44  ;;  %v4937_v8 = vsel %vm4919_vm4, %v9729_v14, %v4934_v5  ;;  %v9866_v44 = vld [vmem:[%s12178_s0 + $0x14] sm:$0xf] }
 0x574   :  { %v4940_v17 = vmul.f32 1.050701, %v4937_v8 }
 0x575   :  { %v11571_v24 = vmul.f32 %v4939_v34, %v12542_v27 }
 0x576   :  { %v11578_v19 = vmul.f32 %v4940_v17, %v12543_v31 }
 0x577   :  { %4959 = vrot.lane.b32.xlu1 %v11571_v24, %s9893_s20  ;;  %4948 = vrot.lane.b32.xlu0 %v11571_v24, %s9892_s19 }
 0x57b   :  { %4961 = vrot.lane.b32.xlu1 %v11578_v19, %s9893_s20  ;;  %4970 = vrot.lane.b32.xlu0 %v11571_v24, %s9894_s21 }
 0x57f   :  { %4972 = vrot.lane.b32.xlu1 %v11578_v19, %s9894_s21  ;;  %4950 = vrot.lane.b32.xlu0 %v11578_v19, %s9892_s19 }
 0x583   :  { %4983 = vrot.lane.b32.xlu1 %v11578_v19, %s9895_s22  ;;  %4992 = vrot.lane.b32.xlu0 %v11571_v24, %s9897_s23 }
 0x587   :  { %4994 = vrot.lane.b32.xlu1 %v11578_v19, %s9897_s23 }
 0x58a   :  { %v4914_v12 = vpop.f32.mrb[16].mxu1 }
 0x58b   :  { %v9730_v27 = vadd.f32 %v4914_v12, %v12541_v3  ;;  %v8605_v34 = vpop.f32.mrb[17].mxu1  ;;  %v9865_v3 = vld [vmem:[%s12178_s0 + $0xc] sm:$0xff] }
 0x58d   :  { %v4923_v5 = vmin.f32 %v9730_v27, 0.0  ;;  %vm4920_vm8 = vcmp.gt.f32.partialorder %v9730_v27, 0.0 }
 0x58f   :  { %v4928_v9 = vmul.f32 1.442695, %v4923_v5  ;;  %v5019_v5 = vand.u32 4294901760, %v11571_v24 }
 0x591   :  { %9863 = vpow2.f32 %v4928_v9 }
 0x59b   :  { %v9864_v14 = vpop.eup %9863 }
 0x59c   :  { %v7633_v4 = vadd.f32 -1.0, %v9864_v14  ;;  %v5017_v14 = vand.u32 4294901760, %v11578_v19 }
 0x59e   :  { %v4935_v33 = vmul.f32 1.6732632, %v7633_v4  ;;  %v11626_v60 = vsub.f32 %v11578_v19, %v5017_v14 }
 0x5a0   :  { %v4938_v7 = vsel %vm4920_vm8, %v9730_v27, %v4935_v33 }
 0x5a1   :  { %v4941_v51 = vmul.f32 1.050701, %v4938_v7 }
 0x5a3   :  { %v4944_v56 = vmul.f32 %v4941_v51, %v12544_v53  ;;  %v11621_v53 = vsub.f32 %v11571_v24, %v5019_v5 }
 0x5a5   :  { %4952 = vrot.lane.b32.xlu1 %v4944_v56, %s9892_s19  ;;  %4963 = vrot.lane.b32.xlu0 %v4944_v56, %s9893_s20  ;;  %v5665_v4 = vand.u32 4294901760, %v4944_v56  ;;  %v12545_v43 = vand.u32 4294901760, %v11621_v53 }
 0x5a7   :  { %v11628_v38 = vsub.f32 %v4944_v56, %v5665_v4 }
 0x5a9   :  { %4981 = vrot.lane.b32.xlu1 %v11571_v24, %s9895_s22  ;;  %4974 = vrot.lane.b32.xlu0 %v4944_v56, %s9894_s21 }
 0x5ad   :  { %5005 = vrot.lane.b32.xlu1 %v12522_v49, %s9901_s2  ;;  %4985 = vrot.lane.b32.xlu0 %v4944_v56, %s9895_s22 }
 0x5b1   :  { %5003 = vrot.lane.b32.xlu1 %v9865_v3, %s9901_s2  ;;  %4996 = vrot.lane.b32.xlu0 %v4944_v56, %s9897_s23 }
 0x5b5   :  { %5007 = vrot.lane.b32.xlu0 %v9866_v44, %s9901_s2 }
 0x5e9   :  { %v4960_v8 = vpop.permute.xlu1 %4959  ;;  %v4949_v17 = vpop.permute.xlu0 %4948 }
 0x5ed   :  { %v4962_v31 = vpop.permute.xlu1 %4961  ;;  %v4971_v49 = vpop.permute.xlu0 %4970 }
 0x5ee   :  { %v4965_v33 = vsel %vm84_vm2, %v4960_v8, %v4962_v31 }
 0x5ef   :  { %v5027_v0 = vand.u32 4294901760, %v4965_v33 }
 0x5f1   :  { %v4973_v12 = vpop.permute.xlu1 %4972  ;;  %v4951_v27 = vpop.permute.xlu0 %4950  ;;  %v11634_v24 = vsub.f32 %v4965_v33, %v5027_v0  ;;  %v11648_v33 = vsub.f32 %v11621_v53, %v12545_v43 }
 0x5f2   :  { %v4954_v9 = vsel %vm72_vm0, %v4949_v17, %v4951_v27  ;;  %v4976_v7 = vsel %vm96_vm3, %v4971_v49, %v4973_v12 }
 0x5f3   :  { %v5023_v51 = vand.u32 4294901760, %v4954_v9  ;;  %v5031_v17 = vand.u32 4294901760, %v4976_v7  ;;  %v12549_v63 = vand.u32 4294901760, %v11634_v24 }
 0x5f5   :  { %v11613_v34 = vpop.permute.xlu1 %4983  ;;  %v4993_v3 = vpop.permute.xlu0 %4992  ;;  %v11630_v48 = vsub.f32 %v4954_v9, %v5023_v51  ;;  %v11638_v25 = vsub.f32 %v4976_v7, %v5031_v17  ;;  %v12546_v9 = vand.u32 4294901760, %v11626_v60 }
 0x5f7   :  { %v11658_v22 = vsub.f32 %v11626_v60, %v12546_v9 }
 0x5f9   :  { %v11623_v44 = vpop.permute.xlu1 %4994 }
 0x5fa   :  { %v4998_v8 = vsel %vm120_vm6, %v4993_v3, %v11623_v44  ;;  %v11661_v3 = vpack.c.bf16 %v5023_v51, %v5019_v5  ;;  %v12548_v5 = vand.u32 4294901760, %v11630_v48 }
 0x617   :  { %v4953_v18 = vpop.permute.xlu1 %4952  ;;  %v4964_v49 = vpop.permute.xlu0 %4963 }
 0x618   :  { %v4955_v55 = vsel %vm72_vm0, %v4951_v27, %v4953_v18  ;;  %v5668_v45 = vand.u32 4294901760, %v4953_v18  ;;  %v5671_v54 = vand.u32 4294901760, %v4964_v49  ;;  %v4966_v19 = vsel %vm84_vm2, %v4962_v31, %v4964_v49 }
 0x619   :  { %v5021_v56 = vand.u32 4294901760, %v4955_v55  ;;  %v5025_v51 = vand.u32 4294901760, %v4966_v19  ;;  %v12550_v31 = vand.u32 4294901760, %v11638_v25 }
 0x61a   :  { %v11643_v29 = vpack.c.bf16 %v5668_v45, %v5665_v4  ;;  %v11650_v27 = vsub.f32 %v4953_v18, %v5668_v45  ;;  %v12547_v18 = vand.u32 4294901760, %v11628_v38  ;;  %v11671_v1 = vsub.f32 %v4964_v49, %v5671_v54 }
 0x61b   :  { %v4982_v7 = vpop.permute.xlu1 %4981  ;;  %v4975_v36 = vpop.permute.xlu0 %4974  ;;  %v11653_v35 = vpack.c.bf16 %v5021_v56, %v5017_v14  ;;  %v5039_v14 = vand.u32 4294901760, %v4998_v8 }
 0x61c   :  { %v4977_v43 = vsel %vm96_vm3, %v4973_v12, %v4975_v36  ;;  %9406 = vmatpush3.bf16.msra.mxu1 %v11643_v29  ;;  %v11668_v45 = vsub.f32 %v11628_v38, %v12547_v18  ;;  %v5674_v9 = vand.u32 4294901760, %v4975_v36  ;;  %v11678_v12 = vsub.f32 %v11630_v48, %v12548_v5 }
 0x61d   :  { %9309 = vmatprep.subr.bf16.mxu0 %v11653_v35  ;;  %9407 = vmatprep.subr.bf16.mxu1 %v12376_v2  ;;  %v5029_v4 = vand.u32 4294901760, %v4977_v43  ;;  %v11681_v18 = vsub.f32 %v4955_v55, %v5021_v56  ;;  %v4987_v49 = vsel %vm108_vm5, %v4982_v7, %v11613_v34  ;;  %v11691_v5 = vsub.f32 %v11634_v24, %v12549_v63 }
 0x61e   :  { %9311 = vmatpush1.bf16.msra.mxu0 %v11661_v3  ;;  %v11686_v47 = vpack.c.bf16 %v5674_v9, %v5671_v54  ;;  %v11696_v56 = vpack.c.bf16 %v5031_v17, %v5027_v0  ;;  %v11701_v54 = vsub.f32 %v11638_v25, %v12550_v31  ;;  %v11703_v7 = vsub.f32 %v4998_v8, %v5039_v14 }
 0x61f   :  { %v5006_v52 = vpop.permute.xlu1 %5005  ;;  %v4986_v13 = vpop.permute.xlu0 %4985  ;;  %v11707_v63 = vsub.f32 %v4966_v19, %v5025_v51  ;;  %v5035_v61 = vand.u32 4294901760, %v4987_v49  ;;  %v11711_v55 = vpack.c.bf16 %v5029_v4, %v5025_v51  ;;  %v12551_v17 = vand.u32 4294901760, %v11650_v27 }
 0x620   :  { %9409 = vmatpush3.bf16.msra.mxu1 %v11686_v47  ;;  %v4988_v40 = vsel %vm108_vm5, %v11613_v34, %v4986_v13  ;;  %v11718_v31 = vsub.f32 %v4975_v36, %v5674_v9  ;;  %v5677_v39 = vand.u32 4294901760, %v4986_v13  ;;  %v12552_v62 = vand.u32 4294901760, %v11671_v1 }
 0x621   :  { %9410 = vmatprep.subr.bf16.mxu1 %v12376_v2  ;;  %v5758_v8 = vsub.f32 %v11650_v27, %v12551_v17  ;;  %9313 = vmatprep.subr.bf16.mxu0 %v11711_v55  ;;  %v5033_v9 = vand.u32 4294901760, %v4988_v40  ;;  %v11732_v19 = vpack.c.bf16 %v5039_v14, %v5035_v61  ;;  %v11734_v10 = vsub.f32 %v4987_v49, %v5035_v61 }
 0x622   :  { %v11729_v36 = vsub.f32 %v11671_v1, %v12552_v62  ;;  %9315 = vmatpush1.bf16.msra.mxu0 %v11696_v56  ;;  %v11739_v16 = vsub.f32 %v4977_v43, %v5029_v4  ;;  %v12553_v62 = vand.u32 4294901760, %v11681_v18  ;;  %v12355_v14 = vand.u32 4294901760, %v11718_v31 }
 0x623   :  { %v5004_v46 = vpop.permute.xlu1 %5003  ;;  %v4997_v58 = vpop.permute.xlu0 %4996  ;;  %v5759_v23 = vand.u32 4294901760, %v5758_v8  ;;  %v11752_v4 = vsub.f32 %v4988_v40, %v5033_v9  ;;  %v11754_v43 = vsub.f32 %v4986_v13, %v5677_v39  ;;  %v12554_v13 = vand.u32 4294901760, %v11707_v63 }
 0x624   :  { %v5009_v34 = vsel %vm1240_vm11, %v5004_v46, %v5006_v52  ;;  %v4999_v51 = vsel %vm120_vm6, %v11623_v44, %v4997_v58  ;;  %v5680_v37 = vand.u32 4294901760, %v4997_v58  ;;  %v5124_v11 = vsub.f32 %v11681_v18, %v12553_v62 }
 0x625   :  { %v5037_v17 = vand.u32 4294901760, %v4999_v51  ;;  %v5011_v0 = vsel %vm126_vm1, %v5009_v34, 0  ;;  %v5766_v40 = vand.u32 4294901760, %v11729_v36 }
 0x626   :  { %v11736_v46 = vpack.c.bf16 %v5680_v37, %v5677_v39  ;;  %v11748_v61 = vsub.f32 %v4997_v58, %v5680_v37  ;;  %v5047_v8 = vand.u32 4294901760, %v5011_v0  ;;  %v5136_v39 = vsub.f32 %v11707_v63, %v12554_v13 }
 0x627   :  { %v5008_v50 = vpop.permute.xlu0 %5007  ;;  %v11742_v32 = vpack.c.bf16 %v5037_v17, %v5033_v9  ;;  %v11760_v62 = vsub.f32 %v4999_v51, %v5037_v17  ;;  %v5772_v9 = vsub.f32 %v11718_v31, %v12355_v14 }
 0x628   :  { %v5010_v49 = vsel %vm1240_vm11, %v5006_v52, %v5008_v50  ;;  %9412 = vmatpush3.bf16.msra.mxu1 %v11736_v46  ;;  %v5015_v44 = vsel %vm126_vm1, %v5008_v50, 0  ;;  %v5125_v52 = vand.u32 4294901760, %v5124_v11  ;;  %v12356_v50 = vand.u32 4294901760, %v11739_v16 }
 0x629   :  { %v5013_v34 = vsel %vm126_vm1, %v5010_v49, 0  ;;  %9317 = vmatprep.subr.bf16.mxu0 %v11742_v32  ;;  %9413 = vmatprep.subr.bf16.mxu1 %v12376_v2  ;;  %v5686_v58 = vand.u32 4294901760, %v5015_v44  ;;  %v11788_v51 = vpack.c.bf16 %v5047_v8, %v11426_v21  ;;  %v5773_v14 = vand.u32 4294901760, %v5772_v9 }
 0x62a   :  { %v5045_v37 = vand.u32 4294901760, %v5013_v34  ;;  %9319 = vmatpush1.bf16.msra.mxu0 %v11732_v19  ;;  %v5148_v13 = vsub.f32 %v11739_v16, %v12356_v50 }
 0x62b   :  { %v11775_v49 = vpack.c.bf16 %v5686_v58, %v11499_v28  ;;  %v11777_v30 = vsub.f32 %v5015_v44, %v5686_v58  ;;  %12556 = vst [vmem:[#allocation13_spill] sm:$0xff] %v11788_v51  ;;  %v12357_v28 = vand.u32 4294901760, %v11760_v62  ;;  %v12557_v44 = vand.u32 4294901760, %v11658_v22 }
 0x62c   :  { %v11772_v17 = vsub.f32 %v5013_v34, %v5045_v37  ;;  %v11780_v11 = vpack.c.bf16 %v5045_v37, %v11413_v26  ;;  %v11790_v34 = vsub.f32 %v5011_v0, %v5047_v8  ;;  %v12558_v58 = vand.u32 4294901760, %v11668_v45 }
 0x62d   :  { %12555 = vst [vmem:[#allocation12_spill] sm:$0xff] %v11775_v49  ;;  %9415 = vmatpush3.bf16.msra.mxu1 %v11775_v49  ;;  %v9324_v37 = vpack.c.bf16 %v5125_v52, %v12557_v44  ;;  %v5149_v21 = vand.u32 4294901760, %v5148_v13  ;;  %v12559_v0 = vand.u32 4294901760, %v11748_v61  ;;  %v5172_v22 = vsub.f32 %v11760_v62, %v12357_v28  ;;  %v12560_v44 = vld [vmem:[#allocation24_spill] sm:$0xff] }
 0x62e   :  { %9321 = vmatprep.subr.bf16.mxu0 %v11780_v11  ;;  %9416 = vmatprep.subr.bf16.mxu1 %v12376_v2  ;;  %v9417_v50 = vpack.c.bf16 %v5759_v23, %v12558_v58  ;;  %v5155_v52 = vand.u32 4294901760, %v11701_v54  ;;  %v12561_v23 = vand.u32 4294901760, %v11648_v33  ;;  %v12562_v45 = vand.u32 4294901760, %v11678_v12 }
 0x62f   :  { %v5786_v8 = vsub.f32 %v11748_v61, %v12559_v0  ;;  %9323 = vmatpush1.bf16.msra.mxu0 %v11788_v51  ;;  %v5137_v13 = vand.u32 4294901760, %v5136_v39  ;;  %v12563_v58 = vand.u32 4294901760, %v11752_v4  ;;  %v12564_v26 = vand.u32 4294901760, %v11734_v10 }
 0x630   :  { %9325 = vmatprep.subr.bf16.mxu0 %v9324_v37  ;;  %8623 = vmatmul.mubr.f32.vlgmr.msra.gmra.mrb[18].mxu1 %v12560_v44  ;;  %v9326_v9 = vpack.c.bf16 %v12562_v45, %v12561_v23  ;;  %v12565_v54 = vand.u32 4294901760, %v11754_v43  ;;  %v5143_v12 = vand.u32 4294901760, %v11691_v5  ;;  %v5173_v36 = vand.u32 4294901760, %v5172_v22 }
 0x631   :  { %v5160_v0 = vsub.f32 %v11752_v4, %v12563_v58  ;;  %v5166_v28 = vsub.f32 %v11734_v10, %v12564_v26  ;;  %9418 = vmatpush3.bf16.msra.mxu1 %v9417_v50  ;;  %8641 = vmatprep.mubr.msk.f32.mxu1 %vm9900_vm7, %v12395_v15  ;;  %v9328_v39 = vpack.c.bf16 %v5149_v21, %v5137_v13  ;;  %v12566_v26 = vand.u32 4294901760, %v11772_v17 }
 0x632   :  { %v5779_v37 = vsub.f32 %v11754_v43, %v12565_v54  ;;  %5103 = vmatmul.mubr.f32.vlgmr.msra.gmra.mrb[10].mxu0 %v12560_v44  ;;  %9419 = vmatprep.subr.bf16.mxu1 %v12376_v2  ;;  %v12567_v45 = vand.u32 4294901760, %v11703_v7  ;;  %v5787_v50 = vand.u32 4294901760, %v5786_v8  ;;  %v12568_v54 = vand.u32 4294901760, %v11777_v30 }
 0x633   :  { %v5196_v23 = vsub.f32 %v11772_v17, %v12566_v26  ;;  %9327 = vmatpush1.bf16.msra.mxu0 %v9326_v9  ;;  %v9420_v5 = vpack.c.bf16 %v5773_v14, %v5766_v40  ;;  %5253 = vmatprep.mubr.f32.mxu0 %v12395_v15  ;;  %v5161_v21 = vand.u32 4294901760, %v5160_v0  ;;  %v5167_v22 = vand.u32 4294901760, %v5166_v28 }
 0x634   :  { %v5178_v58 = vsub.f32 %v11703_v7, %v12567_v45  ;;  %v5800_v33 = vsub.f32 %v11777_v30, %v12568_v54  ;;  %9329 = vmatprep.subr.bf16.mxu0 %v9328_v39  ;;  %v5780_v44 = vand.u32 4294901760, %v5779_v37  ;;  %v12569_v13 = vand.u32 4294901760, %v11790_v34 }
 0x635   :  { %9421 = vmatpush3.bf16.msra.mxu1 %v9420_v5  ;;  %v9330_v51 = vpack.c.bf16 %v5155_v52, %v5143_v12  ;;  %v9332_v45 = vpack.c.bf16 %v5173_v36, %v5161_v21  ;;  %v5197_v8 = vand.u32 4294901760, %v5196_v23  ;;  %v9340_v37 = vpack.c.bf16 %v11681_v18, %v11626_v60  ;;  %v12571_v5 = vld [vmem:[#allocation21_spill] sm:$0xff] }
 0x636   :  { %v5202_v26 = vsub.f32 %v11790_v34, %v12569_v13  ;;  %9422 = vmatprep.subr.bf16.mxu1 %v12376_v2  ;;  %v5179_v49 = vand.u32 4294901760, %v5178_v58  ;;  %v5801_v54 = vand.u32 4294901760, %v5800_v33  ;;  %v9423_v14 = vpack.c.bf16 %v5787_v50, %v5780_v44 }
 0x637   :  { %9331 = vmatpush1.bf16.msra.mxu0 %v9330_v51  ;;  %v9336_v28 = vpack.c.bf16 %v5197_v8, %v11464_v42  ;;  %v9429_v51 = vpack.c.bf16 %v11650_v27, %v11628_v38  ;;  %v12570_v42 = vld [vmem:[#allocation19_spill] sm:$0xff]  ;;  %v9346_v33 = vpack.c.bf16 %v11638_v25, %v11634_v24  ;;  %v9348_v12 = vpack.c.bf16 %v11760_v62, %v11752_v4 }
 0x638   :  { %9333 = vmatprep.subr.bf16.mxu0 %v9332_v45  ;;  %v5203_v40 = vand.u32 4294901760, %v5202_v26  ;;  %v9334_v9 = vpack.c.bf16 %v5179_v49, %v5167_v22  ;;  %v9426_v0 = vpack.c.bf16 %v5801_v54, %v11523_v41  ;;  %v9342_v49 = vpack.c.bf16 %v11630_v48, %v11621_v53  ;;  %v12575_v22 = vld [vmem:[#allocation13_spill] sm:$0xff]  ;;  %v12578_v45 = vld [vmem:[#allocation22_spill] sm:$0xff] }
 0x639   :  { %9424 = vmatpush3.bf16.msra.mxu1 %v9423_v14  ;;  %v9432_v41 = vpack.c.bf16 %v11718_v31, %v11671_v1  ;;  %v9435_v39 = vpack.c.bf16 %v11748_v61, %v11754_v43  ;;  %v9350_v36 = vpack.c.bf16 %v11703_v7, %v11734_v10  ;;  %v9352_v23 = vpack.c.bf16 %v11772_v17, %v11430_v6 }
 0x63a   :  { %9425 = vmatprep.subr.bf16.mxu1 %v12376_v2  ;;  %v9338_v52 = vpack.c.bf16 %v5203_v40, %v11468_v20  ;;  %v9344_v20 = vpack.c.bf16 %v11739_v16, %v11707_v63  ;;  %v9438_v58 = vpack.c.bf16 %v11777_v30, %v11504_v57  ;;  %v9354_v50 = vpack.c.bf16 %v11790_v34, %v11442_v59  ;;  %v12572_v59 = vld [vmem:[#allocation12_spill] sm:$0xff] }
 0x63b   :  { %9335 = vmatpush1.bf16.msra.mxu0 %v9334_v9  ;;  %v12573_v6 = vand.u32 4294901760, %v11626_v60  ;;  %v12574_v57 = vand.u32 4294901760, %v11681_v18  ;;  %v12576_v44 = vand.u32 4294901760, %v11628_v38  ;;  %v12577_v13 = vand.u32 4294901760, %v11650_v27 }
 0x63c   :  { %9337 = vmatprep.subr.bf16.mxu0 %v9336_v28  ;;  %v12579_v8 = vand.u32 4294901760, %v11621_v53  ;;  %v12580_v60 = vand.u32 4294901760, %v11630_v48  ;;  %v12581_v18 = vand.u32 4294901760, %v11707_v63  ;;  %v12582_v38 = vand.u32 4294901760, %v11739_v16 }
 0x63d   :  { %9427 = vmatpush3.bf16.msra.mxu1 %v9426_v0  ;;  %v9372_v21 = vpack.c.bf16 %v12574_v57, %v12573_v6  ;;  %v9453_v26 = vpack.c.bf16 %v12577_v13, %v12576_v44  ;;  %v12583_v14 = vand.u32 4294901760, %v11671_v1  ;;  %v12584_v53 = vand.u32 4294901760, %v11718_v31  ;;  %v12623_v6 = vld [vmem:[#allocation39_spill] sm:$0xff]  ;;  %v12624_v57 = vld [vmem:[#allocation42_spill] sm:$0xff]  ;;  %v12627_v44 = vld [vmem:[#allocation44_spill] sm:$0xff] }
 0x63e   :  { %9428 = vmatprep.subr.bf16.mxu1 %v12376_v2  ;;  %v9374_v54 = vpack.c.bf16 %v12580_v60, %v12579_v8  ;;  %v9376_v27 = vpack.c.bf16 %v12582_v38, %v12581_v18  ;;  %v12585_v48 = vand.u32 4294901760, %v11634_v24  ;;  %v12586_v9 = vand.u32 4294901760, %v11638_v25  ;;  %v12628_v13 = vld [vmem:[#allocation45_spill] sm:$0xff]  ;;  %v12631_v8 = vld [vmem:[#allocation18_spill] sm:$0xff] }
 0x63f   :  { %9339 = vmatpush1.bf16.msra.mxu0 %v9338_v52  ;;  %v9456_v40 = vpack.c.bf16 %v12584_v53, %v12583_v14  ;;  %v12587_v16 = vand.u32 4294901760, %v11752_v4  ;;  %v12588_v28 = vand.u32 4294901760, %v11760_v62  ;;  %v12589_v1 = vand.u32 4294901760, %v11754_v43  ;;  %v9867_v14 = vld [vmem:[%s12179_s1] sm:$0xff]  ;;  %s9904_s1 = smov [#allocation2]  }
 0x640   :  { %9341 = vmatprep.subr.bf16.mxu0 %v9340_v37  ;;  %8642 = vmatmul.mubr.f32.vlgmr.msra.gmra.mrb[18].mxu1 %v12570_v42  ;;  %v9378_v63 = vpack.c.bf16 %v12586_v9, %v12585_v48  ;;  %v12590_v31 = vand.u32 4294901760, %v11748_v61  ;;  %v12591_v24 = vand.u32 4294901760, %v11734_v10  ;;  %v12592_v25 = vand.u32 4294901760, %v11703_v7  ;;  %v12597_v61 = vld [vmem:[#allocation95_spill] sm:$0xff]  ;;  %v12607_v7 = vld [vmem:[#allocation9_spill] sm:$0xff] }
 0x641   :  { %9430 = vmatpush3.bf16.msra.mxu1 %v9429_v51  ;;  %8660 = vmatprep.mubr.msk.f32.mxu1 %vm9900_vm7, %v12395_v15  ;;  %v9380_v0 = vpack.c.bf16 %v12588_v28, %v12587_v16  ;;  %v12593_v51 = vld [vmem:[#allocation94_spill] sm:$0xff]  ;;  %v12594_v4 = vand.u32 4294901760, %v11772_v17  ;;  %v12596_v43 = vand.u32 4294901760, %v11777_v30  ;;  %v12603_v30 = vld [vmem:[#allocation20_spill] sm:$0xff]  ;;  %v12610_v17 = vld [vmem:[#allocation81_spill] sm:$0xff]  ;;  %v9903_v60 = vmov 85  }
 0x642   :  { %5255 = vmatmul.mubr.f32.vlgmr.msra.gmra.mrb[10].mxu0 %v12570_v42  ;;  %9431 = vmatprep.subr.bf16.mxu1 %v12376_v2  ;;  %v9459_v52 = vpack.c.bf16 %v12590_v31, %v12589_v1  ;;  %v9382_v37 = vpack.c.bf16 %v12592_v25, %v12591_v24 }
 0x643   :  { %9343 = vmatpush1.bf16.msra.mxu0 %v9342_v49  ;;  %5357 = vmatprep.mubr.f32.mxu0 %v12395_v15  ;;  %v9384_v62 = vpack.c.bf16 %v12594_v4, %v12593_v51  ;;  %v12595_v49 = vld [vmem:[#allocation8_spill] sm:$0xff] }
 0x644   :  { %9345 = vmatprep.subr.bf16.mxu0 %v9344_v20  ;;  %v9462_v20 = vpack.c.bf16 %v12596_v43, %v12595_v49  ;;  %9846 = vset.pattern.permute.xlu0 %v9903_v60  ;;  %v12641_v60 = vld [vmem:[#allocation30_spill] sm:$0xff] }
 0x645   :  { %9433 = vmatpush3.bf16.msra.mxu1 %v9432_v41  ;;  %v12598_v41 = vand.u32 4294901760, %v11790_v34  ;;  %v12612_v34 = vld [vmem:[#allocation27_spill] sm:$0xff] }
 0x646   :  { %9434 = vmatprep.subr.bf16.mxu1 %v12376_v2 }
 0x647   :  { %9347 = vmatpush1.bf16.msra.mxu0 %v9346_v33  ;;  %v9386_v10 = vpack.c.bf16 %v12598_v41, %v12597_v61  ;;  %v12614_v33 = vld [vmem:[#allocation57_spill] sm:$0xff] }
 0x648   :  { %9349 = vmatprep.subr.bf16.mxu0 %v9348_v12  ;;  %v12615_v12 = vld [vmem:[#allocation31_spill] sm:$0xff] }
 0x649   :  { %9436 = vmatpush3.bf16.msra.mxu1 %v9435_v39  ;;  %v12616_v39 = vld [vmem:[#allocation33_spill] sm:$0xff] }
 0x64a   :  { %9437 = vmatprep.subr.bf16.mxu1 %v12376_v2 }
 0x64b   :  { %9351 = vmatpush1.bf16.msra.mxu0 %v9350_v36  ;;  %v12617_v36 = vld [vmem:[#allocation59_spill] sm:$0xff] }
 0x64c   :  { %9353 = vmatprep.subr.bf16.mxu0 %v9352_v23  ;;  %v12618_v23 = vld [vmem:[#allocation61_spill] sm:$0xff] }
 0x64d   :  { %9439 = vmatpush3.bf16.msra.mxu1 %v9438_v58  ;;  %v12619_v58 = vld [vmem:[#allocation35_spill] sm:$0xff] }
 0x64e   :  { %9440 = vmatprep.subr.bf16.mxu1 %v12376_v2 }
 0x64f   :  { %9355 = vmatpush1.bf16.msra.mxu0 %v9354_v50  ;;  %v12620_v50 = vld [vmem:[#allocation36_spill] sm:$0xff] }
 0x650   :  { %9357 = vmatprep.subr.bf16.mxu0 %v11653_v35  ;;  %8661 = vmatmul.mubr.f32.vlgmr.msra.gmra.mrb[18].mxu1 %v12571_v5 }
 0x651   :  { %9442 = vmatpush3.bf16.msra.mxu1 %v11643_v29  ;;  %8679 = vmatprep.mubr.msk.f32.mxu1 %vm9900_vm7, %v12395_v15 }
 0x652   :  { %5360 = vmatmul.mubr.f32.vlgmr.msra.gmra.mrb[10].mxu0 %v12571_v5  ;;  %9443 = vmatprep.subr.bf16.mxu1 %v12376_v2  ;;  %v12621_v5 = vld [vmem:[#allocation63_spill] sm:$0xff] }
 0x653   :  { %9359 = vmatpush1.bf16.msra.mxu0 %v11661_v3  ;;  %5446 = vmatprep.mubr.f32.mxu0 %v12395_v15 }
 0x654   :  { %9361 = vmatprep.subr.bf16.mxu0 %v11711_v55 }
 0x655   :  { %9445 = vmatpush3.bf16.msra.mxu1 %v11686_v47 }
 0x656   :  { %9446 = vmatprep.subr.bf16.mxu1 %v12376_v2 }
 0x657   :  { %9363 = vmatpush1.bf16.msra.mxu0 %v11696_v56 }
 0x658   :  { %9365 = vmatprep.subr.bf16.mxu0 %v11742_v32 }
 0x659   :  { %9448 = vmatpush3.bf16.msra.mxu1 %v11736_v46 }
 0x65a   :  { %9449 = vmatprep.subr.bf16.mxu1 %v12376_v2 }
 0x65b   :  { %9367 = vmatpush1.bf16.msra.mxu0 %v11732_v19 }
 0x65c   :  { %9369 = vmatprep.subr.bf16.mxu0 %v11780_v11 }
 0x65d   :  { %9451 = vmatpush3.bf16.msra.mxu1 %v12572_v59 }
 0x65e   :  { %9452 = vmatprep.subr.bf16.mxu1 %v12376_v2 }
 0x65f   :  { %9371 = vmatpush1.bf16.msra.mxu0 %v12575_v22 }
 0x660   :  { %9373 = vmatprep.subr.bf16.mxu0 %v9372_v21  ;;  %8680 = vmatmul.mubr.f32.vlgmr.msra.gmra.mrb[18].mxu1 %v12578_v45  ;;  %v12625_v21 = vld [vmem:[#allocation66_spill] sm:$0xff] }
 0x661   :  { %9454 = vmatpush3.bf16.msra.mxu1 %v9453_v26  ;;  %8698 = vmatprep.mubr.msk.f32.mxu1 %vm9900_vm7, %v12395_v15  ;;  %v12629_v26 = vld [vmem:[#allocation68_spill] sm:$0xff] }
 0x662   :  { %5450 = vmatmul.mubr.f32.vlgmr.msra.gmra.mrb[10].mxu0 %v12578_v45  ;;  %9455 = vmatprep.subr.bf16.mxu1 %v12376_v2  ;;  %v12630_v45 = vld [vmem:[#allocation47_spill] sm:$0xff] }
 0x663   :  { %9375 = vmatpush1.bf16.msra.mxu0 %v9374_v54  ;;  %5568 = vmatprep.mubr.f32.mxu0 %v12395_v15 }
 0x664   :  { %9377 = vmatprep.subr.bf16.mxu0 %v9376_v27 }
 0x665   :  { %9457 = vmatpush3.bf16.msra.mxu1 %v9456_v40 }
 0x666   :  { %9458 = vmatprep.subr.bf16.mxu1 %v12376_v2 }
 0x667   :  { %9379 = vmatpush1.bf16.msra.mxu0 %v9378_v63 }
 0x668   :  { %9381 = vmatprep.subr.bf16.mxu0 %v9380_v0 }
 0x669   :  { %9460 = vmatpush3.bf16.msra.mxu1 %v9459_v52 }
 0x66a   :  { %9461 = vmatprep.subr.bf16.mxu1 %v12376_v2 }
 0x66b   :  { %9383 = vmatpush1.bf16.msra.mxu0 %v9382_v37 }
 0x66c   :  { %9385 = vmatprep.subr.bf16.mxu0 %v9384_v62 }
 0x66d   :  { %9463 = vmatpush3.bf16.msra.mxu1 %v9462_v20 }
 0x66e   :  { %9464 = vmatprep.subr.bf16.mxu1 %v12376_v2 }
 0x66f   :  { %9387 = vmatpush1.bf16.msra.mxu0 %v9386_v10 }
 0x670   :  { %9389 = vmatprep.subr.bf16.mxu0 %v11653_v35  ;;  %8699 = vmatmul.mubr.f32.vlgmr.msra.gmra.mrb[18].mxu1 %v12570_v42  ;;  %v12599_v35 = vld [vmem:[#allocation52_spill] sm:$0xff] }
 0x671   :  { %9466 = vmatpush3.bf16.msra.mxu1 %v11643_v29  ;;  %8717 = vmatprep.mubr.msk.f32.mxu1 %vm9900_vm7, %v12395_v15  ;;  %v12601_v29 = vld [vmem:[#allocation72_spill] sm:$0xff] }
 0x672   :  { %5570 = vmatmul.mubr.f32.vlgmr.msra.gmra.mrb[10].mxu0 %v12570_v42  ;;  %9467 = vmatprep.subr.bf16.mxu1 %v12376_v2 }
 0x673   :  { %9391 = vmatpush1.bf16.msra.mxu0 %v11661_v3  ;;  %5656 = vmatprep.mubr.f32.mxu0 %v12395_v15  ;;  %v12604_v3 = vld [vmem:[#allocation17_spill] sm:$0xff] }
 0x674   :  { %9393 = vmatprep.subr.bf16.mxu0 %v11711_v55  ;;  %v12605_v55 = vld [vmem:[#allocation76_spill] sm:$0xff] }
 0x675   :  { %9469 = vmatpush3.bf16.msra.mxu1 %v11686_v47  ;;  %v12600_v47 = vld [vmem:[#allocation16_spill] sm:$0xff] }
 0x676   :  { %9470 = vmatprep.subr.bf16.mxu1 %v12376_v2 }
 0x677   :  { %9395 = vmatpush1.bf16.msra.mxu0 %v11696_v56  ;;  %v12606_v56 = vld [vmem:[#allocation78_spill] sm:$0xff] }
 0x678   :  { %9397 = vmatprep.subr.bf16.mxu0 %v11742_v32  ;;  %v12602_v32 = vld [vmem:[#allocation74_spill] sm:$0xff] }
 0x679   :  { %9472 = vmatpush3.bf16.msra.mxu1 %v11736_v46  ;;  %v12609_v46 = vld [vmem:[#allocation80_spill] sm:$0xff] }
 0x67a   :  { %9473 = vmatprep.subr.bf16.mxu1 %v12376_v2 }
 0x67b   :  { %9399 = vmatpush1.bf16.msra.mxu0 %v11732_v19  ;;  %v12608_v19 = vld [vmem:[#allocation25_spill] sm:$0xff] }
 0x67c   :  { %9401 = vmatprep.subr.bf16.mxu0 %v11780_v11  ;;  %v12611_v11 = vld [vmem:[#allocation26_spill] sm:$0xff] }
 0x67d   :  { %9475 = vmatpush3.bf16.msra.mxu1 %v12572_v59  ;;  %v12622_v59 = vld [vmem:[#allocation65_spill] sm:$0xff] }
 0x67e   :  { %9509 = vmatprep.subr.bf16.mxu1 %v12599_v35 }
 0x67f   :  { %9403 = vmatpush1.bf16.msra.mxu0 %v12575_v22  ;;  %v12626_v22 = vld [vmem:[#allocation67_spill] sm:$0xff] }
 0x680   :  { %8718 = vmatmul.mubr.f32.vlgmr.msra.gmra.mrb[18].mxu1 %v12570_v42  ;;  %9477 = vmatprep.subr.bf16.mxu0 %v12600_v47 }
 0x681   :  { %9511 = vmatpush3.bf16.msra.mxu1 %v12601_v29 }
 0x682   :  { %5658 = vmatmul.mubr.f32.vlgmr.msra.gmra.mrb[10].mxu0 %v12570_v42  ;;  %9513 = vmatprep.subr.bf16.mxu1 %v12602_v32  ;;  %v12613_v42 = vld [vmem:[#allocation82_spill] sm:$0xff] }
 0x683   :  { %9479 = vmatpush3.bf16.msra.mxu0 %v12603_v30 }
 0x684   :  { %9481 = vmatprep.subr.bf16.mxu0 %v12604_v3 }
 0x685   :  { %9515 = vmatpush3.bf16.msra.mxu1 %v12605_v55  ;;  %v12632_v55 = vld [vmem:[#allocation23_spill] sm:$0xff] }
 0x686   :  { %9517 = vmatprep.subr.bf16.mxu1 %v12606_v56 }
 0x687   :  { %9483 = vmatpush3.bf16.msra.mxu0 %v12607_v7 }
 0x688   :  { %9485 = vmatprep.subr.bf16.mxu0 %v12608_v19 }
 0x689   :  { %9519 = vmatpush3.bf16.msra.mxu1 %v12609_v46  ;;  %v12633_v46 = vld [vmem:[#allocation10_spill] sm:$0xff] }
 0x68a   :  { %9521 = vmatprep.subr.bf16.mxu1 %v12610_v17  ;;  %v12634_v17 = vld [vmem:[#allocation6_spill] sm:$0xff] }
 0x68b   :  { %9487 = vmatpush3.bf16.msra.mxu0 %v12611_v11 }
 0x68c   :  { %9489 = vmatprep.subr.bf16.mxu0 %v12612_v34 }
 0x68d   :  { %9523 = vmatpush3.bf16.msra.mxu1 %v12613_v42 }
 0x68e   :  { %9525 = vmatprep.subr.bf16.mxu1 %v12614_v33  ;;  %v12635_v33 = vld [vmem:[#allocation7_spill] sm:$0xff] }
 0x68f   :  { %9491 = vmatpush3.bf16.msra.mxu0 %v12615_v12 }
 0x690   :  { %9493 = vmatprep.subr.bf16.mxu0 %v12616_v39 }
 0x691   :  { %9527 = vmatpush3.bf16.msra.mxu1 %v12617_v36 }
 0x692   :  { %9529 = vmatprep.subr.bf16.mxu1 %v12618_v23  ;;  %v12636_v23 = vld [vmem:[#allocation11_spill] sm:$0xff] }
 0x693   :  { %9495 = vmatpush3.bf16.msra.mxu0 %v12619_v58 }
 0x694   :  { %9497 = vmatprep.subr.bf16.mxu0 %v12620_v50 }
 0x695   :  { %9531 = vmatpush3.bf16.msra.mxu1 %v12621_v5  ;;  %v12637_v5 = vld [vmem:[#allocation28_spill] sm:$0xff] }
 0x696   :  { %9533 = vmatprep.subr.bf16.mxu1 %v12622_v59  ;;  %v12638_v59 = vld [vmem:[#allocation5_spill] sm:$0xff] }
 0x697   :  { %9499 = vmatpush3.bf16.msra.mxu0 %v12623_v6 }
 0x698   :  { %9501 = vmatprep.subr.bf16.mxu0 %v12624_v57 }
 0x699   :  { %9535 = vmatpush3.bf16.msra.mxu1 %v12625_v21 }
 0x69a   :  { %9537 = vmatprep.subr.bf16.mxu1 %v12626_v22  ;;  %v12639_v22 = vld [vmem:[#allocation96_spill] sm:$0xff] }
 0x69b   :  { %9503 = vmatpush3.bf16.msra.mxu0 %v12627_v44 }
 0x69c   :  { %9505 = vmatprep.subr.bf16.mxu0 %v12628_v13 }
 0x69d   :  { %9539 = vmatpush3.bf16.msra.mxu1 %v12629_v26 }
 0x69e   :  { %9573 = vmatprep.subr.bf16.mxu1 %v12600_v47 }
 0x69f   :  { %9507 = vmatpush3.bf16.msra.mxu0 %v12630_v45 }
 0x6a0   :  { %9541 = vmatprep.subr.bf16.mxu0 %v12631_v8  ;;  %v12640_v8 = vld [vmem:[#allocation29_spill] sm:$0xff] }
 0x753   :  { %v6197_v54 = vpop.f32.mrb[18].mxu1 }
 0x754   :  { %6208 = vrot.lane.b32.xlu1 %v6197_v54, %s9892_s19  ;;  %v8719_v18 = vpop.f32.mrb[19].mxu1 }
 0x755   :  { %v5659_v38 = vpop.f32.mrb[10].mxu0 }
 0x756   :  { %6204 = vrot.lane.b32.xlu0 %v5659_v38, %s9892_s19  ;;  %v5661_v27 = vpop.f32.mrb[11].mxu0 }
 0x758   :  { %6220 = vrot.lane.b32.xlu1 %v5661_v27, %s9893_s20 }
 0x75a   :  { %6206 = vrot.lane.b32.xlu0 %v5661_v27, %s9892_s19  ;;  %s7615_s19 = sshll.u32 %s9904_s1, 4  ;;  %s7616_s19 = int_to_ptr.vmem [resolvable:$true] %s7615_s19 }
 0x75b   :  { %p9873_p1 = scmp.lt.s32.totalorder %s7616_s19, %s7616_s19 }
 0x75c   :  { %6218 = vrot.lane.b32.xlu1 %v5659_v38, %s9893_s20 }
 0x75e   :  { %6222 = vrot.lane.b32.xlu0 %v6197_v54, %s9893_s20  ;;  %s9868_s20 = scalar_lea.vmem %s7616_s19, 256 }
 0x75f   :  { %p9869_p0 = scmp.ne.s32.totalorder %s7616_s19, %s9868_s20  ;;  %p9874_p2 = scmp.lt.s32.totalorder %s9868_s20, %s9868_s20 }
 0x761   :  { %p9875_p3 = por %p9874_p2, %p9873_p1 }
 0x762   :  { %2470 = vperm.xlu0 %9846, %v9867_v14  }
 0x763   :  { %p9876_p4 = pnand %p9875_p3, %p9869_p0 }
 0x7c6   :  { %v6209_v53 = vpop.permute.xlu1 %6208 }
 0x7c7   :  { %v6217_v40 = vmax.f32 %v6197_v54, %v6209_v53  ;;  %v12642_v54 = vld [vmem:[#allocation41_spill] sm:$0xff] }
 0x7c8   :  { %v6205_v48 = vpop.permute.xlu0 %6204 }
 0x7ca   :  { %v6221_v9 = vpop.permute.xlu1 %6220 }
 0x7cc   :  { %v6207_v63 = vpop.permute.xlu0 %6206 }
 0x7cd   :  { %v6210_v16 = vsel %vm72_vm0, %v6205_v48, %v6207_v63  ;;  %v6211_v28 = vsel %vm72_vm0, %v6207_v63, %v6209_v53  ;;  %v12645_v53 = vld [vmem:[#allocation34_spill] sm:$0xff]  ;;  %vm3854_vm0 = vcmask 654336  }
 0x7ce   :  { %v6215_v0 = vmax.f32 %v5659_v38, %v6210_v16  ;;  %v6219_v1 = vpop.permute.xlu1 %6218  ;;  %v6216_v52 = vmax.f32 %v5661_v27, %v6211_v28  ;;  %v12643_v38 = vld [vmem:[#allocation32_spill] sm:$0xff]  ;;  %v12644_v27 = vld [vmem:[#allocation97_spill] sm:$0xff]  ;;  %v12648_v63 = vld [vmem:[#allocation38_spill] sm:$0xff] }
 0x7cf   :  { %v6224_v31 = vsel %vm84_vm2, %v6219_v1, %v6221_v9  ;;  %v12649_v16 = vld [vmem:[#allocation40_spill] sm:$0xff]  ;;  %v12650_v28 = vld [vmem:[#allocation43_spill] sm:$0xff] }
 0x7d0   :  { %v6229_v24 = vmax.f32 %v6215_v0, %v6224_v31  ;;  %v6223_v25 = vpop.permute.xlu0 %6222  ;;  %v12651_v0 = vld [vmem:[#allocation46_spill] sm:$0xff]  ;;  %v12652_v1 = vld [vmem:[#allocation48_spill] sm:$0xff]  ;;  %v12653_v31 = vld [vmem:[#allocation49_spill] sm:$0xff] }
 0x7d1   :  { %v6225_v37 = vsel %vm84_vm2, %v6221_v9, %v6223_v25  ;;  %v12027_v51 = vmax.f32 %v6217_v40, %v6223_v25  ;;  %v12646_v40 = vld [vmem:[#allocation98_spill] sm:$0xff]  ;;  %v12647_v9 = vld [vmem:[#allocation37_spill] sm:$0xff] }
 0x7d2   :  { %v12029_v4 = vand.u32 4294901760, %v6229_v24  ;;  %v6230_v62 = vmax.f32 %v6216_v52, %v6225_v37  ;;  %v12654_v52 = vld [vmem:[#allocation50_spill] sm:$0xff] }
 0x7d3   :  { %v12668_v37 = vld [vmem:[#allocation62_spill] sm:$0xff] }
 0x7d4   :  { %v6338_v49 = vsub.f32 %v6229_v24, %v12029_v4  ;;  %v12032_v43 = vand.u32 4294901760, %v6230_v62  ;;  %v12660_v24 = vld [vmem:[#allocation77_spill] sm:$0xff] }
 0x7d6   :  { %v6339_v20 = vand.u32 4294901760, %v6338_v49  ;;  %v6332_v61 = vsub.f32 %v6230_v62, %v12032_v43  ;;  %6572 = vmatprep.mubr.f32.mxu1 %v12032_v43 }
 0x7d7   :  { %6574 = vmatmul.mubr.f32.vlgmr.msra.gmra.mrb[20].mxu1 %v12029_v4 }
 0x7d8   :  { %9575 = vmatpush3.bf16.msra.mxu1 %v12603_v30  ;;  %v6333_v41 = vand.u32 4294901760, %v6332_v61  ;;  %v6340_v10 = vsub.f32 %v6338_v49, %v6339_v20 }
 0x7d9   :  { %9577 = vmatprep.subr.bf16.mxu1 %v12604_v3 }
 0x7da   :  { %6816 = vmatprep.mubr.f32.mxu1 %v6333_v41  ;;  %v6334_v35 = vsub.f32 %v6332_v61, %v6333_v41  ;;  %v6341_v32 = vand.u32 4294901760, %v6340_v10  ;;  %v12675_v41 = vld [vmem:[#allocation88_spill] sm:$0xff]  ;;  %v12676_v10 = vld [vmem:[#allocation89_spill] sm:$0xff] }
 0x7dc   :  { %9579 = vmatpush3.bf16.msra.mxu1 %v12607_v7  ;;  %v6335_v29 = vand.u32 4294901760, %v6334_v35  ;;  %v12677_v35 = vld [vmem:[#allocation90_spill] sm:$0xff] }
 0x7dd   :  { %9581 = vmatprep.subr.bf16.mxu1 %v12608_v19 }
 0x7de   :  { %6336 = vmatprep.mubr.f32.mxu0 %v6335_v29  ;;  %v12678_v29 = vld [vmem:[#allocation91_spill] sm:$0xff] }
 0x7df   :  { %6342 = vmatmul.mubr.f32.vlgmr.msra.gmra.mrb[12].mxu0 %v6341_v32  ;;  %v12679_v32 = vld [vmem:[#allocation92_spill] sm:$0xff] }
 0x7e0   :  { %9543 = vmatpush3.bf16.msra.mxu0 %v12632_v55  ;;  %9583 = vmatpush3.bf16.msra.mxu1 %v12611_v11  ;;  %v12680_v55 = vld [vmem:[#allocation93_spill] sm:$0xff] }
 0x7e1   :  { %6709 = vmatprep.mubr.f32.mxu0 %v6332_v61  ;;  %v12043_v56 = vpop.permute.xlu0 %2470  ;;  %9545 = vmatprep.subr.bf16.mxu0 %v12633_v46  ;;  %v12674_v61 = vld [vmem:[#allocation87_spill] sm:$0xff] }
 0x7e2   :  { %v2590_v42 = vadd.f32 %v12634_v17, %v12043_v56  ;;  %9585 = vmatprep.subr.bf16.mxu1 %v12612_v34  ;;  %v12681_v46 = vld [vmem:[#allocation51_spill] sm:$0xff] }
 0x7e4   :  { %v2822_v36 = vadd.f32 %v12635_v33, %v2590_v42  ;;  %9547 = vmatpush3.bf16.msra.mxu0 %v12636_v23  ;;  %9587 = vmatpush3.bf16.msra.mxu1 %v12615_v12 }
 0x7e5   :  { %9549 = vmatprep.subr.bf16.mxu0 %v12637_v5  ;;  %9589 = vmatprep.subr.bf16.mxu1 %v12616_v39 }
 0x7e6   :  { %v2960_v21 = vadd.f32 %v12638_v59, %v2822_v36 }
 0x7e8   :  { %v3068_v26 = vadd.f32 %v12639_v22, %v2960_v21  ;;  %9551 = vmatpush3.bf16.msra.mxu0 %v12640_v8  ;;  %9591 = vmatpush3.bf16.msra.mxu1 %v12619_v58 }
 0x7e9   :  { %9553 = vmatprep.subr.bf16.mxu0 %v12641_v60  ;;  %9593 = vmatprep.subr.bf16.mxu1 %v12620_v50 }
 0x7ea   :  { %v3236_v18 = vadd.f32 %v12642_v54, %v3068_v26 }
 0x7ec   :  { %9555 = vmatpush3.bf16.msra.mxu0 %v12643_v38  ;;  %9595 = vmatpush3.bf16.msra.mxu1 %v12623_v6  ;;  %v3340_v14 = vadd.f32 %v12644_v27, %v3236_v18 }
 0x7ed   :  { %9557 = vmatprep.subr.bf16.mxu0 %v12645_v53  ;;  %9597 = vmatprep.subr.bf16.mxu1 %v12624_v57 }
 0x7ee   :  { %v9727_v48 = vadd.f32 %v12646_v40, %v3340_v14 }
 0x7f0   :  { %9559 = vmatpush3.bf16.msra.mxu0 %v12647_v9  ;;  %9599 = vmatpush3.bf16.msra.mxu1 %v12627_v44  ;;  %3855 = vst.msk [vmem:[#allocation2] sm:$0xff] %vm3854_vm0, %v9727_v48 }
 0x7f1   :  { %9561 = vmatprep.subr.bf16.mxu0 %v12648_v63  ;;  %9601 = vmatprep.subr.bf16.mxu1 %v12628_v13 }
 0x7f4   :  { %9563 = vmatpush3.bf16.msra.mxu0 %v12649_v16  ;;  %9603 = vmatpush3.bf16.msra.mxu1 %v12630_v45 }
 0x7f5   :  { %9565 = vmatprep.subr.bf16.mxu0 %v12650_v28  ;;  %9637 = vmatprep.subr.bf16.mxu1 %v12600_v47  ;;  %v12655_v47 = vld [vmem:[#allocation69_spill] sm:$0xff] }
 0x7f7   :  { %6820 = vmatmul.mubr.f32.vlgmr.msra.gmra.mrb[22].mxu1 %v6339_v20 }
 0x7f8   :  { %9567 = vmatpush3.bf16.msra.mxu0 %v12651_v0  ;;  %9639 = vmatpush3.bf16.msra.mxu1 %v12603_v30  ;;  %v12656_v30 = vld [vmem:[#allocation70_spill] sm:$0xff] }
 0x7f9   :  { %7090 = vmatprep.mubr.f32.mxu1 %v12032_v43  ;;  %9569 = vmatprep.subr.bf16.mxu0 %v12652_v1 }
 0x7fa   :  { %9641 = vmatprep.subr.bf16.mxu1 %v12604_v3  ;;  %v12657_v3 = vld [vmem:[#allocation71_spill] sm:$0xff] }
 0x7fc   :  { %9571 = vmatpush3.bf16.msra.mxu0 %v12653_v31  ;;  %9643 = vmatpush3.bf16.msra.mxu1 %v12607_v7  ;;  %v12658_v7 = vld [vmem:[#allocation73_spill] sm:$0xff] }
 0x7fd   :  { %9605 = vmatprep.subr.bf16.mxu0 %v12654_v52  ;;  %9645 = vmatprep.subr.bf16.mxu1 %v12608_v19  ;;  %v12659_v19 = vld [vmem:[#allocation75_spill] sm:$0xff] }
 0x7ff   :  { %6712 = vmatmul.mubr.f32.vlgmr.msra.gmra.mrb[14].mxu0 %v6338_v49 }
 0x800   :  { %9607 = vmatpush3.bf16.msra.mxu0 %v12655_v47  ;;  %6986 = vmatprep.mubr.f32.mxu0 %v12032_v43  ;;  %v12672_v43 = vld [vmem:[#allocation85_spill] sm:$0xff] }
 0x801   :  { %9647 = vmatpush3.bf16.msra.mxu1 %v12611_v11  ;;  %9609 = vmatprep.subr.bf16.mxu0 %v12656_v30  ;;  %v12661_v11 = vld [vmem:[#allocation79_spill] sm:$0xff] }
 0x802   :  { %9649 = vmatprep.subr.bf16.mxu1 %v12612_v34  ;;  %v12662_v34 = vld [vmem:[#allocation53_spill] sm:$0xff] }
 0x804   :  { %9611 = vmatpush3.bf16.msra.mxu0 %v12657_v3 }
 0x805   :  { %9651 = vmatpush3.bf16.msra.mxu1 %v12615_v12  ;;  %9613 = vmatprep.subr.bf16.mxu0 %v12658_v7  ;;  %v12663_v12 = vld [vmem:[#allocation54_spill] sm:$0xff] }
 0x806   :  { %9653 = vmatprep.subr.bf16.mxu1 %v12616_v39  ;;  %v12664_v39 = vld [vmem:[#allocation55_spill] sm:$0xff] }
 0x808   :  { %9615 = vmatpush3.bf16.msra.mxu0 %v12659_v19 }
 0x809   :  { %9655 = vmatpush3.bf16.msra.mxu1 %v12619_v58  ;;  %9617 = vmatprep.subr.bf16.mxu0 %v12660_v24  ;;  %v12665_v58 = vld [vmem:[#allocation56_spill] sm:$0xff] }
 0x80a   :  { %9657 = vmatprep.subr.bf16.mxu1 %v12620_v50  ;;  %v12666_v50 = vld [vmem:[#allocation58_spill] sm:$0xff] }
 0x80c   :  { %9619 = vmatpush3.bf16.msra.mxu0 %v12661_v11 }
 0x80d   :  { %9659 = vmatpush3.bf16.msra.mxu1 %v12623_v6  ;;  %9621 = vmatprep.subr.bf16.mxu0 %v12662_v34  ;;  %v6233_v6 = vsel %vm2473_vm13, %v12027_v51, 0  ;;  %v12671_v51 = vld [vmem:[#allocation84_spill] sm:$0xff] }
 0x80e   :  { %9661 = vmatprep.subr.bf16.mxu1 %v12624_v57  ;;  %v12667_v57 = vld [vmem:[#allocation60_spill] sm:$0xff]  ;;  %v7168_v25 = vand.u32 4294901760, %v6233_v6 }
 0x810   :  { %9623 = vmatpush3.bf16.msra.mxu0 %v12663_v12  ;;  %v7169_v62 = vsub.f32 %v6233_v6, %v7168_v25 }
 0x811   :  { %9663 = vmatpush3.bf16.msra.mxu1 %v12627_v44  ;;  %9625 = vmatprep.subr.bf16.mxu0 %v12664_v39  ;;  %v12669_v44 = vld [vmem:[#allocation64_spill] sm:$0xff] }
 0x812   :  { %9665 = vmatprep.subr.bf16.mxu1 %v12628_v13  ;;  %v12670_v13 = vld [vmem:[#allocation83_spill] sm:$0xff] }
 0x814   :  { %9627 = vmatpush3.bf16.msra.mxu0 %v12665_v58 }
 0x815   :  { %9667 = vmatpush3.bf16.msra.mxu1 %v12630_v45  ;;  %9629 = vmatprep.subr.bf16.mxu0 %v12666_v50  ;;  %v7170_v45 = vand.u32 4294901760, %v7169_v62 }
 0x817   :  { %v7171_v49 = vsub.f32 %v7169_v62, %v7170_v45 }
 0x818   :  { %7092 = vmatmul.mubr.f32.vlgmr.msra.gmra.mrb[24].mxu1 %v12029_v4  ;;  %9631 = vmatpush3.bf16.msra.mxu0 %v12667_v57 }
 0x819   :  { %9633 = vmatprep.subr.bf16.mxu0 %v12668_v37  ;;  %v7172_v20 = vand.u32 4294901760, %v7171_v49 }
 0x81c   :  { %9635 = vmatpush3.bf16.msra.mxu0 %v12669_v44 }
 0x81d   :  { %9668 = vmatprep.subr.bf16.mxu0 %v12376_v2 }
 0x81f   :  { %6988 = vmatmul.mubr.f32.vlgmr.msra.gmra.mrb[16].mxu0 %v12029_v4  ;;  %v12673_v4 = vld [vmem:[#allocation86_spill] sm:$0xff] }
 0x820   :  { %9670 = vmatpush3.bf16.msra.mxu0 %v12670_v13  ;;  %8732 = vmatprep.mubr.msk.f32.mxu0 %vm9900_vm7, %v12395_v15 }
 0x821   :  { %9671 = vmatprep.subr.bf16.mxu0 %v12376_v2 }
 0x824   :  { %9673 = vmatpush3.bf16.msra.mxu0 %v12671_v51 }
 0x825   :  { %9674 = vmatprep.subr.bf16.mxu0 %v12376_v2 }
 0x828   :  { %9676 = vmatpush3.bf16.msra.mxu0 %v12672_v43 }
 0x829   :  { %9677 = vmatprep.subr.bf16.mxu0 %v12376_v2 }
 0x82b   :  { %8733 = vmatmul.mubr.f32.vlgmr.msra.gmra.mrb[18].mxu0 %v7172_v20 }
 0x82c   :  { %9679 = vmatpush3.bf16.msra.mxu0 %v12673_v4  ;;  %8747 = vmatprep.mubr.msk.f32.mxu0 %vm9900_vm7, %v12395_v15 }
 0x82d   :  { %9680 = vmatprep.subr.bf16.mxu0 %v12376_v2 }
 0x830   :  { %9682 = vmatpush3.bf16.msra.mxu0 %v12674_v61 }
 0x831   :  { %9683 = vmatprep.subr.bf16.mxu0 %v12376_v2 }
 0x834   :  { %9685 = vmatpush3.bf16.msra.mxu0 %v12675_v41 }
 0x835   :  { %9686 = vmatprep.subr.bf16.mxu0 %v12376_v2 }
 0x837   :  { %8748 = vmatmul.mubr.f32.vlgmr.msra.gmra.mrb[18].mxu0 %v7168_v25 }
 0x838   :  { %9688 = vmatpush3.bf16.msra.mxu0 %v12676_v10  ;;  %8762 = vmatprep.mubr.msk.f32.mxu0 %vm9900_vm7, %v12395_v15 }
 0x839   :  { %9689 = vmatprep.subr.bf16.mxu0 %v12376_v2 }
 0x83c   :  { %9691 = vmatpush3.bf16.msra.mxu0 %v12677_v35 }
 0x83d   :  { %9692 = vmatprep.subr.bf16.mxu0 %v12376_v2 }
 0x840   :  { %9694 = vmatpush3.bf16.msra.mxu0 %v12678_v29 }
 0x841   :  { %9695 = vmatprep.subr.bf16.mxu0 %v12376_v2 }
 0x843   :  { %8763 = vmatmul.mubr.f32.vlgmr.msra.gmra.mrb[18].mxu0 %v7169_v62 }
 0x844   :  { %9697 = vmatpush3.bf16.msra.mxu0 %v12670_v13  ;;  %8777 = vmatprep.mubr.msk.f32.mxu0 %vm9900_vm7, %v12395_v15 }
 0x845   :  { %9698 = vmatprep.subr.bf16.mxu0 %v12376_v2 }
 0x848   :  { %9700 = vmatpush3.bf16.msra.mxu0 %v12671_v51 }
 0x849   :  { %9701 = vmatprep.subr.bf16.mxu0 %v12376_v2 }
 0x84c   :  { %9703 = vmatpush3.bf16.msra.mxu0 %v12672_v43 }
 0x84d   :  { %9704 = vmatprep.subr.bf16.mxu0 %v12376_v2 }
 0x84f   :  { %8778 = vmatmul.mubr.f32.vlgmr.msra.gmra.mrb[18].mxu0 %v7170_v45 }
 0x850   :  { %9706 = vmatpush3.bf16.msra.mxu0 %v12679_v32  ;;  %8792 = vmatprep.mubr.msk.f32.mxu0 %vm9900_vm7, %v12395_v15 }
 0x851   :  { %9707 = vmatprep.subr.bf16.mxu0 %v12376_v2 }
 0x854   :  { %9709 = vmatpush3.bf16.msra.mxu0 %v12680_v55 }
 0x855   :  { %9710 = vmatprep.subr.bf16.mxu0 %v12376_v2 }
 0x858   :  { %9712 = vmatpush3.bf16.msra.mxu0 %v12681_v46 }
 0x859   :  { %9713 = vmatprep.subr.bf16.mxu0 %v12376_v2 }
 0x85b   :  { %8793 = vmatmul.mubr.f32.vlgmr.msra.gmra.mrb[18].mxu0 %v7168_v25 }
 0x85c   :  { %9715 = vmatpush3.bf16.msra.mxu0 %v12670_v13  ;;  %8807 = vmatprep.mubr.msk.f32.mxu0 %vm9900_vm7, %v12395_v15 }
 0x85d   :  { %9716 = vmatprep.subr.bf16.mxu0 %v12376_v2 }
 0x860   :  { %9718 = vmatpush3.bf16.msra.mxu0 %v12671_v51 }
 0x861   :  { %9719 = vmatprep.subr.bf16.mxu0 %v12376_v2 }
 0x864   :  { %9721 = vmatpush3.bf16.msra.mxu0 %v12672_v43 }
 0x867   :  { %8808 = vmatmul.mubr.f32.vlgmr.msra.gmra.mrb[18].mxu0 %v7168_v25 }
 0x8aa   :  { %v8109_v17 = vpop.f32.mrb[20].mxu1 }
 0x8ab   :  { %v8110_v42 = vpop.f32.mrb[21].mxu1 }
 0x8ac   :  { %v8111_v33 = vadd.f32 %v8110_v42, %v8109_v17 }
 0x8b2   :  { %v8074_v36 = vpop.f32.mrb[12].mxu0 }
 0x8b3   :  { %v8075_v23 = vpop.f32.mrb[13].mxu0 }
 0x8b4   :  { %v8076_v5 = vadd.f32 %v8075_v23, %v8074_v36 }
 0x8b6   :  { %v6344_v59 = vadd.f32 %v8076_v5, %v12043_v56 }
 0x8b8   :  { %v6576_v21 = vadd.f32 %v8111_v33, %v6344_v59 }
 0x8ca   :  { %v8179_v22 = vpop.f32.mrb[22].mxu1 }
 0x8cb   :  { %v8180_v15 = vpop.f32.mrb[23].mxu1 }
 0x8cc   :  { %v8181_v26 = vadd.f32 %v8180_v15, %v8179_v22 }
 0x8d2   :  { %v8144_v8 = vpop.f32.mrb[14].mxu0 }
 0x8d3   :  { %v8145_v60 = vpop.f32.mrb[15].mxu0 }
 0x8d4   :  { %v8146_v54 = vadd.f32 %v8145_v60, %v8144_v8 }
 0x8d6   :  { %v6714_v18 = vadd.f32 %v8146_v54, %v6576_v21 }
 0x8d8   :  { %v6822_v2 = vadd.f32 %v8181_v26, %v6714_v18 }
 0x8eb   :  { %v8249_v38 = vpop.f32.mrb[24].mxu1 }
 0x8ec   :  { %v8250_v27 = vpop.f32.mrb[25].mxu1 }
 0x8ed   :  { %v8251_v14 = vadd.f32 %v8250_v27, %v8249_v38 }
 0x8f2   :  { %v8214_v53 = vpop.f32.mrb[16].mxu0 }
 0x8f3   :  { %v8215_v40 = vpop.f32.mrb[17].mxu0 }
 0x8f4   :  { %v8216_v48 = vadd.f32 %v8215_v40, %v8214_v53 }
 0x8f6   :  { %v6990_v9 = vadd.f32 %v8216_v48, %v6822_v2 }
 0x8f8   :  { %v7094_v63 = vadd.f32 %v8251_v14, %v6990_v9 }
 0x93a   :  { %v7604_v56 = vpop.f32.mrb[18].mxu0 }
 0x93b   :  { %v9731_v16 = vadd.f32 %v7604_v56, %v7094_v63  ;;  %v8809_v28 = vpop.f32.mrb[19].mxu0 }
 0x93d   :  { %7609 = vst.msk [vmem:[#allocation2 + $0x8] sm:$0xff] %vm3854_vm0, %v9731_v16 }
 0x93e   :  { %9879 = shalt.err (!%p9876_p4)
}
 0x93f   :  { %s9880_s2 = scalar_lea.hbm %s12182_s4, 256 }
 0x940   :  { %p9881_p5 = scmp.ne.s32.totalorder %s12182_s4, %s9880_s2  ;;  %p9884_p6 = scmp.lt.u32.totalorder %s9880_s2, %s12182_s4 }
 0x942   :  { %p9886_p7 = pnand %p9884_p6, %p9881_p5 }
 0x944   :  { %9889 = shalt.err (!%p9886_p7)
}
 0x945   :  { %s9905_s6 = smov 128   ;;  %s9906_s7 = smov 8  }
 0x946   :  { %7621 = dma.vmem_to_hbm [thread:$0]  %s7616_s19, 256, %s12182_s4, [#allocation3], %s9905_s6, %s9905_s6, %s9906_s7  }
 0x947   :  { %9890 = dma.done.wait [#allocation3], 256  }
 0x948   :  { %9891 = vsyncadd [#allocation3], 4294967040 }
 0x949   :  { %7625 = vsyncpa [#allocation3], 1 }

</bundles_post_ra>
